<compile_context>
chip_gen: v5e
topology: v5e:2x2
jax: 0.10.0
libtpu: 0.0.40
codegen_flags: <defaults>
</compile_context>

<pallas_src>
from functools import partial

import jax
import jax.numpy as jnp
import numpy as np
from jax import lax
from jax.experimental import pallas as pl
from jax.experimental.pallas import tpu as pltpu


def _round_up(x, m):
    return (x + m - 1) // m * m


def _pick_tile(dim, candidates):
    for c in candidates:
        if dim % c == 0:
            return c
    return dim


# ---------------------------------------------------------------------------
# Kernel: generic tiled matmul + bias.  Used for both the input projection
# (X @ W_ih^T + bias) and the vocab projection (H @ W_lin^T + b_lin).
# Grid axes over M-tiles and N-tiles are 'parallel' (megacore-shardable on
# v7x); the contraction dim K is kept whole per tile (small here: E or H).
# ---------------------------------------------------------------------------
def matmul_bias_kernel(x_ref, w_ref, b_ref, o_ref):
    acc = jnp.dot(x_ref[...], w_ref[...], preferred_element_type=jnp.float32)
    o_ref[...] = (acc + b_ref[...]).astype(o_ref.dtype)


def matmul_bias(x, w, b, out_dtype=jnp.float32):
    """x (M, K) @ w (K, N) + b (1, N) -> (M, N).  Requires M % 8 == 0, N % 128 == 0."""
    M, K = x.shape
    _, N = w.shape
    tm = _pick_tile(M, (512, 256, 128, 64, 32, 16, 8))
    tn = _pick_tile(N, (1024, 512, 256, 128))
    flops = 2 * M * K * N
    bytes_accessed = int(M * K * x.dtype.itemsize + K * N * w.dtype.itemsize
                         + N * 4 + M * N * jnp.dtype(out_dtype).itemsize)
    return pl.pallas_call(
        matmul_bias_kernel,
        out_shape=jax.ShapeDtypeStruct((M, N), out_dtype),
        grid_spec=pltpu.PrefetchScalarGridSpec(
            num_scalar_prefetch=0,
            grid=(M // tm, N // tn),
            in_specs=[
                pl.BlockSpec((tm, K), lambda i, j: (i, 0)),   # activations tile
                pl.BlockSpec((K, tn), lambda i, j: (0, j)),   # weight tile (N tiled)
                pl.BlockSpec((1, tn), lambda i, j: (0, j)),   # bias tile
            ],
            out_specs=pl.BlockSpec((tm, tn), lambda i, j: (i, j)),
        ),
        compiler_params=pltpu.CompilerParams(
            dimension_semantics=("parallel", "parallel")),
        cost_estimate=pl.CostEstimate(flops=flops, transcendentals=0,
                                      bytes_accessed=bytes_accessed),
    )(x, w, b)


# ---------------------------------------------------------------------------
# Kernel: LSTM recurrence.  One grid step == TT timesteps (unrolled); only the
# h @ W_hh^T matmul remains inside the sequential loop.  h/c live in VMEM
# scratch across grid steps.  Emits h_t (bf16) for the hoisted vocab projection.
# ---------------------------------------------------------------------------
def lstm_recurrence_kernel(gx_ref, whh_ref, h_out_ref, h_sc, c_sc, *, hidden, steps):
    Hp = hidden

    @pl.when(pl.program_id(0) == 0)
    def _():
        h_sc[...] = jnp.zeros_like(h_sc)   # h_0 = 0 (PyTorch init_hidden returns zeros)
        c_sc[...] = jnp.zeros_like(c_sc)   # c_0 = 0

    def step(i, carry):
        h, c = carry
        # gate pre-activations: precomputed x-part (already includes b_ih+b_hh)
        # plus the recurrent part.  MXU inputs bf16, accumulate f32.
        gates = gx_ref[i] + jnp.dot(h.astype(jnp.bfloat16), whh_ref[...],
                                    preferred_element_type=jnp.float32)
        # gate slices are lane-aligned because Hp % 128 == 0
        i_g = jax.nn.sigmoid(gates[:, 0 * Hp:1 * Hp])
        f_g = jax.nn.sigmoid(gates[:, 1 * Hp:2 * Hp])
        g_g = jnp.tanh(gates[:, 2 * Hp:3 * Hp])
        o_g = jax.nn.sigmoid(gates[:, 3 * Hp:4 * Hp])
        c_new = f_g * c + i_g * g_g
        h_new = o_g * jnp.tanh(c_new)
        h_out_ref[i] = h_new.astype(jnp.bfloat16)
        return h_new, c_new

    h, c = lax.fori_loop(0, steps, step, (h_sc[...], c_sc[...]), unroll=True)
    h_sc[...] = h
    c_sc[...] = c


def lstm_recurrence(gx, whh_T, Bp, Hp, TT):
    """gx: (T, Bp, 4Hp) f32 gate pre-activations; whh_T: (Hp, 4Hp) bf16 -> h (T, Bp, Hp) bf16."""
    T = gx.shape[0]
    kernel = partial(lstm_recurrence_kernel, hidden=Hp, steps=TT)
    flops = 2 * T * Bp * Hp * 4 * Hp
    bytes_accessed = int(gx.size * 4 + whh_T.size * 2 + T * Bp * Hp * 2)
    return pl.pallas_call(
        kernel,
        out_shape=jax.ShapeDtypeStruct((T, Bp, Hp), jnp.bfloat16),
        grid_spec=pltpu.PrefetchScalarGridSpec(
            num_scalar_prefetch=0,
            grid=(T // TT,),
            in_specs=[
                pl.BlockSpec((TT, Bp, 4 * Hp), lambda t: (t, 0, 0)),  # precomputed gates
                pl.BlockSpec((Hp, 4 * Hp), lambda t: (0, 0)),         # W_hh^T (resident)
            ],
            out_specs=pl.BlockSpec((TT, Bp, Hp), lambda t: (t, 0, 0)),
            scratch_shapes=[
                pltpu.VMEM((Bp, Hp), jnp.float32),   # h state (f32)
                pltpu.VMEM((Bp, Hp), jnp.float32),   # c state (f32)
            ],
        ),
        compiler_params=pltpu.CompilerParams(
            dimension_semantics=("arbitrary",)),     # sequential recurrence over time
        cost_estimate=pl.CostEstimate(flops=flops,
                                      transcendentals=5 * T * Bp * Hp,
                                      bytes_accessed=bytes_accessed),
    )(gx, whh_T)


# ---------------------------------------------------------------------------
# Forward wrapper
# ---------------------------------------------------------------------------
def lstm_decoder_forward(features, captions, params):
    """features: (B, E) f32, captions: (B, L) int32 -> logits (B, T=L, V)."""
    B, E = features.shape
    H = params["w_hh"].shape[1]
    V = params["w_lin"].shape[0]
    T = captions.shape[1]

    # glue (embedding gather + concat) in plain JAX
    embeds = params["embedding"][captions[:, :-1]]                        # (B, L-1, E)
    inputs = jnp.concatenate([features[:, None, :], embeds], axis=1)      # (B, T, E)

    # TPU-friendly padding: B -> sublane multiple (8), H/V -> lane multiples (128).
    # Padded gate rows get zero weights/bias -> sigmoid(0)=0.5, tanh(0)=0, so padded
    # h/c columns stay exactly 0 and never influence real outputs.
    Bp = _round_up(B, 8)
    Hp = _round_up(H, 128)
    Vp = _round_up(V, 128)

    x = jnp.zeros((Bp, T, E), jnp.float32).at[:B].set(inputs.astype(jnp.float32))
    x_tm = jnp.transpose(x, (1, 0, 2)).astype(jnp.bfloat16)               # (T, Bp, E)

    # gate-blocked zero padding: gate g occupies rows [g*Hp, g*Hp + H)
    w_ih = params["w_ih"].reshape(4, H, E)
    w_ih = jnp.pad(w_ih, ((0, 0), (0, Hp - H), (0, 0))).reshape(4 * Hp, E)
    w_hh = params["w_hh"].reshape(4, H, H)
    w_hh = jnp.pad(w_hh, ((0, 0), (0, Hp - H), (0, Hp - H))).reshape(4 * Hp, Hp)
    bias = (params["b_ih"] + params["b_hh"]).reshape(4, H)
    bias = jnp.pad(bias, ((0, 0), (0, Hp - H))).reshape(1, 4 * Hp).astype(jnp.float32)
    w_lin = jnp.pad(params["w_lin"], ((0, Vp - V), (0, Hp - H)))          # (Vp, Hp)
    b_lin = jnp.pad(params["b_lin"], (0, Vp - V)).reshape(1, Vp).astype(jnp.float32)

    wih_T = w_ih.T.astype(jnp.bfloat16)        # (E, 4Hp)
    whh_T = w_hh.T.astype(jnp.bfloat16)        # (Hp, 4Hp)
    wl_T = w_lin.T.astype(jnp.bfloat16)        # (Hp, Vp)

    # 1) input projection for all timesteps at once (hoisted out of the recurrence)
    gx = matmul_bias(x_tm.reshape(T * Bp, E), wih_T, bias, jnp.float32)   # (T*Bp, 4Hp)
    gx = gx.reshape(T, Bp, 4 * Hp)

    # 2) sequential recurrence, TT timesteps per grid step (amortizes grid overhead)
    TT = _pick_tile(T, (8, 4, 2, 1))
    hs = lstm_recurrence(gx, whh_T, Bp, Hp, TT)                           # (T, Bp, Hp) bf16

    # 3) vocab projection as one big parallel matmul with V tiled.  Transpose the
    #    small H-wide hidden states (not the large V-wide logits) so the projection
    #    writes lane-dense, batch-major output directly.
    hs_bm = jnp.transpose(hs, (1, 0, 2)).reshape(Bp * T, Hp)              # (Bp*T, Hp)
    logits = matmul_bias(hs_bm, wl_T, b_lin, jnp.float32)                 # (Bp*T, Vp)
    logits = logits.reshape(Bp, T, Vp)

    # nn.Dropout(p=0.5) is identity in eval mode.
    return logits[:B, :, :V]                   # (B, T, V), batch_first


def init_params(key, vocab_size, embed_size, hidden_size):
    """Deterministic synthetic parameters matching the PyTorch module's shapes."""
    V, E, H = vocab_size, embed_size, hidden_size
    ks = jax.random.split(key, 8)
    s = 1.0 / np.sqrt(H)  # PyTorch LSTM / Linear default init scale
    params = {
        "embedding": jax.random.normal(ks[0], (V, E), jnp.float32) * np.sqrt(2.0 / E),
        "w_ih": jax.random.uniform(ks[1], (4 * H, E), jnp.float32, -s, s),
        "w_hh": jax.random.uniform(ks[2], (4 * H, H), jnp.float32, -s, s),
        "b_ih": jax.random.uniform(ks[3], (4 * H,), jnp.float32, -s, s),
        "b_hh": jax.random.uniform(ks[4], (4 * H,), jnp.float32, -s, s),
        "w_lin": jax.random.normal(ks[5], (V, H), jnp.float32) * np.sqrt(2.0 / H),
        "b_lin": jax.random.uniform(ks[6], (V,), jnp.float32, -s, s),
    }
    return params


def reference_forward(features, captions, params):
    """Pure-JAX f32 reference for correctness check."""
    H = params["w_hh"].shape[1]
    embeds = params["embedding"][captions[:, :-1]]
    inputs = jnp.concatenate([features[:, None, :], embeds], axis=1)   # (B, T, E)
    B = inputs.shape[0]
    h0 = jnp.zeros((B, H), jnp.float32)
    c0 = jnp.zeros((B, H), jnp.float32)

    def step(carry, x_t):
        h, c = carry
        gates = (x_t @ params["w_ih"].T + params["b_ih"]
                 + h @ params["w_hh"].T + params["b_hh"])
        i_g = jax.nn.sigmoid(gates[:, 0 * H:1 * H])
        f_g = jax.nn.sigmoid(gates[:, 1 * H:2 * H])
        g_g = jnp.tanh(gates[:, 2 * H:3 * H])
        o_g = jax.nn.sigmoid(gates[:, 3 * H:4 * H])
        c_new = f_g * c + i_g * g_g
        h_new = o_g * jnp.tanh(c_new)
        return (h_new, c_new), h_new

    _, hs = jax.lax.scan(step, (h0, c0), jnp.transpose(inputs, (1, 0, 2)))
    hs = jnp.transpose(hs, (1, 0, 2))                                  # (B, T, H)
    return hs @ params["w_lin"].T + params["b_lin"]


if __name__ == "__main__":
    # Small shapes: batch=2, embed=32, hidden=32, vocab=16, caption length=8
    B, E, H, V, L = 2, 32, 32, 16, 8

    key = jax.random.PRNGKey(0)
    k_par, k_feat, k_cap = jax.random.split(key, 3)

    params = init_params(k_par, V, E, H)
    features = jax.random.normal(k_feat, (B, E), jnp.float32)
    captions = jax.random.randint(k_cap, (B, L), 0, V, jnp.int32)

    out = jax.jit(lstm_decoder_forward)(features, captions, params)
    out = jax.block_until_ready(out)

    ref = reference_forward(features, captions, params)
    assert out.shape == (B, L, V), out.shape
    # bf16 MXU inputs -> loosen tolerance vs. the pure-f32 reference
    np.testing.assert_allclose(np.asarray(out), np.asarray(ref), rtol=5e-2, atol=5e-2)

    print("KERNEL_OK")
</pallas_src>

<mosaic_0001>
module attributes {stable_mosaic.version = 11 : i64} {
  func.func @matmul_bias_kernel(%arg0: i32, %arg1: i32, %arg2: memref<64x32xbf16, #tpu.memory_space<vmem>>, %arg3: memref<32x512xbf16, #tpu.memory_space<vmem>>, %arg4: memref<1x512xf32, #tpu.memory_space<vmem>>, %arg5: memref<64x512xf32, #tpu.memory_space<vmem>>) attributes {dimension_semantics = [#tpu.dimension_semantics<parallel>, #tpu.dimension_semantics<parallel>], iteration_bounds = array<i64: 1, 1>, scalar_prefetch = 0 : i64, scratch_operands = 0 : i64, tpu.core_type = #tpu.core_type<tc>, window_params = [{transform_indices = @transform_0, window_bounds = array<i64: 64, 32>}, {transform_indices = @transform_1, window_bounds = array<i64: 32, 512>}, {transform_indices = @transform_2, window_bounds = array<i64: 1, 512>}, {transform_indices = @transform_3, window_bounds = array<i64: 64, 512>}]} {
    %c0 = arith.constant 0 : index
    %c0_0 = arith.constant 0 : index
    %0 = vector.load %arg2[%c0, %c0_0] : memref<64x32xbf16, #tpu.memory_space<vmem>>, vector<64x32xbf16>
    %c0_1 = arith.constant 0 : index
    %c0_2 = arith.constant 0 : index
    %1 = vector.load %arg3[%c0_1, %c0_2] : memref<32x512xbf16, #tpu.memory_space<vmem>>, vector<32x512xbf16>
    %cst = arith.constant dense<0.000000e+00> : vector<64x512xf32>
    %2 = tpu.matmul %0, %1, %cst {dimension_numbers = #tpu.dot_dimension_numbers<[1], [0], [0], [1], [0, 0, 1, 1], [], []>} : vector<64x32xbf16>, vector<32x512xbf16>, vector<64x512xf32> -> vector<64x512xf32>
    %c0_3 = arith.constant 0 : index
    %c0_4 = arith.constant 0 : index
    %3 = vector.load %arg4[%c0_3, %c0_4] : memref<1x512xf32, #tpu.memory_space<vmem>>, vector<1x512xf32>
    %4 = vector.broadcast %3 : vector<1x512xf32> to vector<64x512xf32>
    %5 = arith.addf %2, %4 : vector<64x512xf32>
    %c0_5 = arith.constant 0 : index
    %c0_6 = arith.constant 0 : index
    %6 = vector.load %arg5[%c0_5, %c0_6] : memref<64x512xf32, #tpu.memory_space<vmem>>, vector<64x512xf32>
    tpu.vector_store %arg5[%c0_5, %c0_6], %5 {strides = array<i32>} : memref<64x512xf32, #tpu.memory_space<vmem>>, vector<64x512xf32>,
    return
  }
  func.func @transform_0(%arg0: i32, %arg1: i32) -> (i32, i32) {
    %c0_i32 = arith.constant 0 : i32
    %c0_i32_0 = arith.constant 0 : i32
    return %arg0, %c0_i32 : i32, i32
  }
  func.func @transform_1(%arg0: i32, %arg1: i32) -> (i32, i32) {
    %c0_i32 = arith.constant 0 : i32
    %c0_i32_0 = arith.constant 0 : i32
    return %c0_i32, %arg1 : i32, i32
  }
  func.func @transform_2(%arg0: i32, %arg1: i32) -> (i32, i32) {
    %c0_i32 = arith.constant 0 : i32
    %c0_i32_0 = arith.constant 0 : i32
    return %c0_i32, %arg1 : i32, i32
  }
  func.func @transform_3(%arg0: i32, %arg1: i32) -> (i32, i32) {
    %c0_i32 = arith.constant 0 : i32
    return %arg0, %arg1 : i32, i32
  }
}

module attributes {stable_mosaic.version = 11 : i64} {
  func.func @lstm_recurrence_kernel(%arg0: i32, %arg1: memref<8x8x512xf32, #tpu.memory_space<vmem>>, %arg2: memref<128x512xbf16, #tpu.memory_space<vmem>>, %arg3: memref<8x8x128xbf16, #tpu.memory_space<vmem>>, %arg4: memref<8x128xf32, #tpu.memory_space<vmem>>, %arg5: memref<8x128xf32, #tpu.memory_space<vmem>>) attributes {dimension_semantics = [#tpu.dimension_semantics<arbitrary>], iteration_bounds = array<i64: 1>, scalar_prefetch = 0 : i64, scratch_operands = 2 : i64, tpu.core_type = #tpu.core_type<tc>, window_params = [{transform_indices = @transform_0, window_bounds = array<i64: 8, 8, 512>}, {pipeline_mode = #tpu.pipeline_mode<synchronous>, transform_indices = @transform_1, window_bounds = array<i64: 128, 512>}, {transform_indices = @transform_2, window_bounds = array<i64: 8, 8, 128>}]} {
    %c0_i32 = arith.constant 0 : i32
    %0 = arith.cmpi eq, %arg0, %c0_i32 : i32
    %1 = arith.extui %0 : i1 to i32
    %c0_i32_0 = arith.constant 0 : i32
    %2 = arith.cmpi ne, %1, %c0_i32_0 : i32
    scf.if %2 {
      %cst_88 = arith.constant 0.000000e+00 : f32
      %303 = vector.broadcast %cst_88 : f32 to vector<8x128xf32>
      %c0_89 = arith.constant 0 : index
      %c0_90 = arith.constant 0 : index
      %304 = vector.load %arg4[%c0_89, %c0_90] : memref<8x128xf32, #tpu.memory_space<vmem>>, vector<8x128xf32>
      tpu.vector_store %arg4[%c0_89, %c0_90], %303 {strides = array<i32>} : memref<8x128xf32, #tpu.memory_space<vmem>>, vector<8x128xf32>,
      %cst_91 = arith.constant 0.000000e+00 : f32
      %305 = vector.broadcast %cst_91 : f32 to vector<8x128xf32>
      %c0_92 = arith.constant 0 : index
      %c0_93 = arith.constant 0 : index
      %306 = vector.load %arg5[%c0_92, %c0_93] : memref<8x128xf32, #tpu.memory_space<vmem>>, vector<8x128xf32>
      tpu.vector_store %arg5[%c0_92, %c0_93], %305 {strides = array<i32>} : memref<8x128xf32, #tpu.memory_space<vmem>>, vector<8x128xf32>,
    } else {
    }
    %c0 = arith.constant 0 : index
    %c0_1 = arith.constant 0 : index
    %3 = vector.load %arg4[%c0, %c0_1] : memref<8x128xf32, #tpu.memory_space<vmem>>, vector<8x128xf32>
    %c0_2 = arith.constant 0 : index
    %c0_3 = arith.constant 0 : index
    %4 = vector.load %arg5[%c0_2, %c0_3] : memref<8x128xf32, #tpu.memory_space<vmem>>, vector<8x128xf32>
    %c0_i32_4 = arith.constant 0 : i32
    %5 = arith.index_cast %c0_i32_4 : i32 to index
    %c0_5 = arith.constant 0 : index
    %c0_6 = arith.constant 0 : index
    %6 = vector.load %arg1[%5, %c0_5, %c0_6] : memref<8x8x512xf32, #tpu.memory_space<vmem>>, vector<1x8x512xf32>
    %7 = vector.shape_cast %6 : vector<1x8x512xf32> to vector<8x512xf32>
    %8 = arith.truncf %3 : vector<8x128xf32> to vector<8x128xbf16>
    %c0_7 = arith.constant 0 : index
    %c0_8 = arith.constant 0 : index
    %9 = vector.load %arg2[%c0_7, %c0_8] : memref<128x512xbf16, #tpu.memory_space<vmem>>, vector<128x512xbf16>
    %cst = arith.constant dense<0.000000e+00> : vector<8x512xf32>
    %10 = tpu.matmul %8, %9, %cst {dimension_numbers = #tpu.dot_dimension_numbers<[1], [0], [0], [1], [0, 0, 1, 1], [], []>} : vector<8x128xbf16>, vector<128x512xbf16>, vector<8x512xf32> -> vector<8x512xf32>
    %11 = arith.addf %7, %10 : vector<8x512xf32>
    %12 = vector.extract_strided_slice %11 {offsets = [0, 0], sizes = [8, 128], strides = [1, 1]} : vector<8x512xf32> to vector<8x128xf32>
    %13 = arith.negf %12 : vector<8x128xf32>
    %14 = math.exp %13 : vector<8x128xf32>
    %cst_9 = arith.constant 1.000000e+00 : f32
    %15 = vector.broadcast %cst_9 : f32 to vector<8x128xf32>
    %16 = arith.addf %15, %14 : vector<8x128xf32>
    %17 = arith.divf %15, %16 : vector<8x128xf32>
    %18 = vector.extract_strided_slice %11 {offsets = [0, 128], sizes = [8, 128], strides = [1, 1]} : vector<8x512xf32> to vector<8x128xf32>
    %19 = arith.negf %18 : vector<8x128xf32>
    %20 = math.exp %19 : vector<8x128xf32>
    %cst_10 = arith.constant 1.000000e+00 : f32
    %21 = vector.broadcast %cst_10 : f32 to vector<8x128xf32>
    %22 = arith.addf %21, %20 : vector<8x128xf32>
    %23 = arith.divf %21, %22 : vector<8x128xf32>
    %24 = vector.extract_strided_slice %11 {offsets = [0, 256], sizes = [8, 128], strides = [1, 1]} : vector<8x512xf32> to vector<8x128xf32>
    %25 = math.tanh %24 : vector<8x128xf32>
    %26 = vector.extract_strided_slice %11 {offsets = [0, 384], sizes = [8, 128], strides = [1, 1]} : vector<8x512xf32> to vector<8x128xf32>
    %27 = arith.negf %26 : vector<8x128xf32>
    %28 = math.exp %27 : vector<8x128xf32>
    %cst_11 = arith.constant 1.000000e+00 : f32
    %29 = vector.broadcast %cst_11 : f32 to vector<8x128xf32>
    %30 = arith.addf %29, %28 : vector<8x128xf32>
    %31 = arith.divf %29, %30 : vector<8x128xf32>
    %32 = arith.mulf %23, %4 : vector<8x128xf32>
    %33 = arith.mulf %17, %25 : vector<8x128xf32>
    %34 = arith.addf %32, %33 : vector<8x128xf32>
    %35 = math.tanh %34 : vector<8x128xf32>
    %36 = arith.mulf %31, %35 : vector<8x128xf32>
    %37 = arith.truncf %36 : vector<8x128xf32> to vector<8x128xbf16>
    %38 = arith.index_cast %c0_i32_4 : i32 to index
    %c0_12 = arith.constant 0 : index
    %c0_13 = arith.constant 0 : index
    %39 = vector.load %arg3[%38, %c0_12, %c0_13] : memref<8x8x128xbf16, #tpu.memory_space<vmem>>, vector<1x8x128xbf16>
    %40 = vector.shape_cast %39 : vector<1x8x128xbf16> to vector<8x128xbf16>
    %41 = vector.shape_cast %37 : vector<8x128xbf16> to vector<1x8x128xbf16>
    tpu.vector_store %arg3[%38, %c0_12, %c0_13], %41 {strides = array<i32>} : memref<8x8x128xbf16, #tpu.memory_space<vmem>>, vector<1x8x128xbf16>,
    %c1_i32 = arith.constant 1 : i32
    %42 = arith.index_cast %c1_i32 : i32 to index
    %c0_14 = arith.constant 0 : index
    %c0_15 = arith.constant 0 : index
    %43 = vector.load %arg1[%42, %c0_14, %c0_15] : memref<8x8x512xf32, #tpu.memory_space<vmem>>, vector<1x8x512xf32>
    %44 = vector.shape_cast %43 : vector<1x8x512xf32> to vector<8x512xf32>
    %45 = arith.truncf %36 : vector<8x128xf32> to vector<8x128xbf16>
    %c0_16 = arith.constant 0 : index
    %c0_17 = arith.constant 0 : index
    %46 = vector.load %arg2[%c0_16, %c0_17] : memref<128x512xbf16, #tpu.memory_space<vmem>>, vector<128x512xbf16>
    %cst_18 = arith.constant dense<0.000000e+00> : vector<8x512xf32>
    %47 = tpu.matmul %45, %46, %cst_18 {dimension_numbers = #tpu.dot_dimension_numbers<[1], [0], [0], [1], [0, 0, 1, 1], [], []>} : vector<8x128xbf16>, vector<128x512xbf16>, vector<8x512xf32> -> vector<8x512xf32>
    %48 = arith.addf %44, %47 : vector<8x512xf32>
    %49 = vector.extract_strided_slice %48 {offsets = [0, 0], sizes = [8, 128], strides = [1, 1]} : vector<8x512xf32> to vector<8x128xf32>
    %50 = arith.negf %49 : vector<8x128xf32>
    %51 = math.exp %50 : vector<8x128xf32>
    %cst_19 = arith.constant 1.000000e+00 : f32
    %52 = vector.broadcast %cst_19 : f32 to vector<8x128xf32>
    %53 = arith.addf %52, %51 : vector<8x128xf32>
    %54 = arith.divf %52, %53 : vector<8x128xf32>
    %55 = vector.extract_strided_slice %48 {offsets = [0, 128], sizes = [8, 128], strides = [1, 1]} : vector<8x512xf32> to vector<8x128xf32>
    %56 = arith.negf %55 : vector<8x128xf32>
    %57 = math.exp %56 : vector<8x128xf32>
    %cst_20 = arith.constant 1.000000e+00 : f32
    %58 = vector.broadcast %cst_20 : f32 to vector<8x128xf32>
    %59 = arith.addf %58, %57 : vector<8x128xf32>
    %60 = arith.divf %58, %59 : vector<8x128xf32>
    %61 = vector.extract_strided_slice %48 {offsets = [0, 256], sizes = [8, 128], strides = [1, 1]} : vector<8x512xf32> to vector<8x128xf32>
    %62 = math.tanh %61 : vector<8x128xf32>
    %63 = vector.extract_strided_slice %48 {offsets = [0, 384], sizes = [8, 128], strides = [1, 1]} : vector<8x512xf32> to vector<8x128xf32>
    %64 = arith.negf %63 : vector<8x128xf32>
    %65 = math.exp %64 : vector<8x128xf32>
    %cst_21 = arith.constant 1.000000e+00 : f32
    %66 = vector.broadcast %cst_21 : f32 to vector<8x128xf32>
    %67 = arith.addf %66, %65 : vector<8x128xf32>
    %68 = arith.divf %66, %67 : vector<8x128xf32>
    %69 = arith.mulf %60, %34 : vector<8x128xf32>
    %70 = arith.mulf %54, %62 : vector<8x128xf32>
    %71 = arith.addf %69, %70 : vector<8x128xf32>
    %72 = math.tanh %71 : vector<8x128xf32>
    %73 = arith.mulf %68, %72 : vector<8x128xf32>
    %74 = arith.truncf %73 : vector<8x128xf32> to vector<8x128xbf16>
    %75 = arith.index_cast %c1_i32 : i32 to index
    %c0_22 = arith.constant 0 : index
    %c0_23 = arith.constant 0 : index
    %76 = vector.load %arg3[%75, %c0_22, %c0_23] : memref<8x8x128xbf16, #tpu.memory_space<vmem>>, vector<1x8x128xbf16>
    %77 = vector.shape_cast %76 : vector<1x8x128xbf16> to vector<8x128xbf16>
    %78 = vector.shape_cast %74 : vector<8x128xbf16> to vector<1x8x128xbf16>
    tpu.vector_store %arg3[%75, %c0_22, %c0_23], %78 {strides = array<i32>} : memref<8x8x128xbf16, #tpu.memory_space<vmem>>, vector<1x8x128xbf16>,
    %c2_i32 = arith.constant 2 : i32
    %79 = arith.index_cast %c2_i32 : i32 to index
    %c0_24 = arith.constant 0 : index
    %c0_25 = arith.constant 0 : index
    %80 = vector.load %arg1[%79, %c0_24, %c0_25] : memref<8x8x512xf32, #tpu.memory_space<vmem>>, vector<1x8x512xf32>
    %81 = vector.shape_cast %80 : vector<1x8x512xf32> to vector<8x512xf32>
    %82 = arith.truncf %73 : vector<8x128xf32> to vector<8x128xbf16>
    %c0_26 = arith.constant 0 : index
    %c0_27 = arith.constant 0 : index
    %83 = vector.load %arg2[%c0_26, %c0_27] : memref<128x512xbf16, #tpu.memory_space<vmem>>, vector<128x512xbf16>
    %cst_28 = arith.constant dense<0.000000e+00> : vector<8x512xf32>
    %84 = tpu.matmul %82, %83, %cst_28 {dimension_numbers = #tpu.dot_dimension_numbers<[1], [0], [0], [1], [0, 0, 1, 1], [], []>} : vector<8x128xbf16>, vector<128x512xbf16>, vector<8x512xf32> -> vector<8x512xf32>
    %85 = arith.addf %81, %84 : vector<8x512xf32>
    %86 = vector.extract_strided_slice %85 {offsets = [0, 0], sizes = [8, 128], strides = [1, 1]} : vector<8x512xf32> to vector<8x128xf32>
    %87 = arith.negf %86 : vector<8x128xf32>
    %88 = math.exp %87 : vector<8x128xf32>
    %cst_29 = arith.constant 1.000000e+00 : f32
    %89 = vector.broadcast %cst_29 : f32 to vector<8x128xf32>
    %90 = arith.addf %89, %88 : vector<8x128xf32>
    %91 = arith.divf %89, %90 : vector<8x128xf32>
    %92 = vector.extract_strided_slice %85 {offsets = [0, 128], sizes = [8, 128], strides = [1, 1]} : vector<8x512xf32> to vector<8x128xf32>
    %93 = arith.negf %92 : vector<8x128xf32>
    %94 = math.exp %93 : vector<8x128xf32>
    %cst_30 = arith.constant 1.000000e+00 : f32
    %95 = vector.broadcast %cst_30 : f32 to vector<8x128xf32>
    %96 = arith.addf %95, %94 : vector<8x128xf32>
    %97 = arith.divf %95, %96 : vector<8x128xf32>
    %98 = vector.extract_strided_slice %85 {offsets = [0, 256], sizes = [8, 128], strides = [1, 1]} : vector<8x512xf32> to vector<8x128xf32>
    %99 = math.tanh %98 : vector<8x128xf32>
    %100 = vector.extract_strided_slice %85 {offsets = [0, 384], sizes = [8, 128], strides = [1, 1]} : vector<8x512xf32> to vector<8x128xf32>
    %101 = arith.negf %100 : vector<8x128xf32>
    %102 = math.exp %101 : vector<8x128xf32>
    %cst_31 = arith.constant 1.000000e+00 : f32
    %103 = vector.broadcast %cst_31 : f32 to vector<8x128xf32>
    %104 = arith.addf %103, %102 : vector<8x128xf32>
    %105 = arith.divf %103, %104 : vector<8x128xf32>
    %106 = arith.mulf %97, %71 : vector<8x128xf32>
    %107 = arith.mulf %91, %99 : vector<8x128xf32>
    %108 = arith.addf %106, %107 : vector<8x128xf32>
    %109 = math.tanh %108 : vector<8x128xf32>
    %110 = arith.mulf %105, %109 : vector<8x128xf32>
    %111 = arith.truncf %110 : vector<8x128xf32> to vector<8x128xbf16>
    %112 = arith.index_cast %c2_i32 : i32 to index
    %c0_32 = arith.constant 0 : index
    %c0_33 = arith.constant 0 : index
    %113 = vector.load %arg3[%112, %c0_32, %c0_33] : memref<8x8x128xbf16, #tpu.memory_space<vmem>>, vector<1x8x128xbf16>
    %114 = vector.shape_cast %113 : vector<1x8x128xbf16> to vector<8x128xbf16>
    %115 = vector.shape_cast %111 : vector<8x128xbf16> to vector<1x8x128xbf16>
    tpu.vector_store %arg3[%112, %c0_32, %c0_33], %115 {strides = array<i32>} : memref<8x8x128xbf16, #tpu.memory_space<vmem>>, vector<1x8x128xbf16>,
    %c3_i32 = arith.constant 3 : i32
    %116 = arith.index_cast %c3_i32 : i32 to index
    %c0_34 = arith.constant 0 : index
    %c0_35 = arith.constant 0 : index
    %117 = vector.load %arg1[%116, %c0_34, %c0_35] : memref<8x8x512xf32, #tpu.memory_space<vmem>>, vector<1x8x512xf32>
    %118 = vector.shape_cast %117 : vector<1x8x512xf32> to vector<8x512xf32>
    %119 = arith.truncf %110 : vector<8x128xf32> to vector<8x128xbf16>
    %c0_36 = arith.constant 0 : index
    %c0_37 = arith.constant 0 : index
    %120 = vector.load %arg2[%c0_36, %c0_37] : memref<128x512xbf16, #tpu.memory_space<vmem>>, vector<128x512xbf16>
    %cst_38 = arith.constant dense<0.000000e+00> : vector<8x512xf32>
    %121 = tpu.matmul %119, %120, %cst_38 {dimension_numbers = #tpu.dot_dimension_numbers<[1], [0], [0], [1], [0, 0, 1, 1], [], []>} : vector<8x128xbf16>, vector<128x512xbf16>, vector<8x512xf32> -> vector<8x512xf32>
    %122 = arith.addf %118, %121 : vector<8x512xf32>
    %123 = vector.extract_strided_slice %122 {offsets = [0, 0], sizes = [8, 128], strides = [1, 1]} : vector<8x512xf32> to vector<8x128xf32>
    %124 = arith.negf %123 : vector<8x128xf32>
    %125 = math.exp %124 : vector<8x128xf32>
    %cst_39 = arith.constant 1.000000e+00 : f32
    %126 = vector.broadcast %cst_39 : f32 to vector<8x128xf32>
    %127 = arith.addf %126, %125 : vector<8x128xf32>
    %128 = arith.divf %126, %127 : vector<8x128xf32>
    %129 = vector.extract_strided_slice %122 {offsets = [0, 128], sizes = [8, 128], strides = [1, 1]} : vector<8x512xf32> to vector<8x128xf32>
    %130 = arith.negf %129 : vector<8x128xf32>
    %131 = math.exp %130 : vector<8x128xf32>
    %cst_40 = arith.constant 1.000000e+00 : f32
    %132 = vector.broadcast %cst_40 : f32 to vector<8x128xf32>
    %133 = arith.addf %132, %131 : vector<8x128xf32>
    %134 = arith.divf %132, %133 : vector<8x128xf32>
    %135 = vector.extract_strided_slice %122 {offsets = [0, 256], sizes = [8, 128], strides = [1, 1]} : vector<8x512xf32> to vector<8x128xf32>
    %136 = math.tanh %135 : vector<8x128xf32>
    %137 = vector.extract_strided_slice %122 {offsets = [0, 384], sizes = [8, 128], strides = [1, 1]} : vector<8x512xf32> to vector<8x128xf32>
    %138 = arith.negf %137 : vector<8x128xf32>
    %139 = math.exp %138 : vector<8x128xf32>
    %cst_41 = arith.constant 1.000000e+00 : f32
    %140 = vector.broadcast %cst_41 : f32 to vector<8x128xf32>
    %141 = arith.addf %140, %139 : vector<8x128xf32>
    %142 = arith.divf %140, %141 : vector<8x128xf32>
    %143 = arith.mulf %134, %108 : vector<8x128xf32>
    %144 = arith.mulf %128, %136 : vector<8x128xf32>
    %145 = arith.addf %143, %144 : vector<8x128xf32>
    %146 = math.tanh %145 : vector<8x128xf32>
    %147 = arith.mulf %142, %146 : vector<8x128xf32>
    %148 = arith.truncf %147 : vector<8x128xf32> to vector<8x128xbf16>
    %149 = arith.index_cast %c3_i32 : i32 to index
    %c0_42 = arith.constant 0 : index
    %c0_43 = arith.constant 0 : index
    %150 = vector.load %arg3[%149, %c0_42, %c0_43] : memref<8x8x128xbf16, #tpu.memory_space<vmem>>, vector<1x8x128xbf16>
    %151 = vector.shape_cast %150 : vector<1x8x128xbf16> to vector<8x128xbf16>
    %152 = vector.shape_cast %148 : vector<8x128xbf16> to vector<1x8x128xbf16>
    tpu.vector_store %arg3[%149, %c0_42, %c0_43], %152 {strides = array<i32>} : memref<8x8x128xbf16, #tpu.memory_space<vmem>>, vector<1x8x128xbf16>,
    %c4_i32 = arith.constant 4 : i32
    %153 = arith.index_cast %c4_i32 : i32 to index
    %c0_44 = arith.constant 0 : index
    %c0_45 = arith.constant 0 : index
    %154 = vector.load %arg1[%153, %c0_44, %c0_45] : memref<8x8x512xf32, #tpu.memory_space<vmem>>, vector<1x8x512xf32>
    %155 = vector.shape_cast %154 : vector<1x8x512xf32> to vector<8x512xf32>
    %156 = arith.truncf %147 : vector<8x128xf32> to vector<8x128xbf16>
    %c0_46 = arith.constant 0 : index
    %c0_47 = arith.constant 0 : index
    %157 = vector.load %arg2[%c0_46, %c0_47] : memref<128x512xbf16, #tpu.memory_space<vmem>>, vector<128x512xbf16>
    %cst_48 = arith.constant dense<0.000000e+00> : vector<8x512xf32>
    %158 = tpu.matmul %156, %157, %cst_48 {dimension_numbers = #tpu.dot_dimension_numbers<[1], [0], [0], [1], [0, 0, 1, 1], [], []>} : vector<8x128xbf16>, vector<128x512xbf16>, vector<8x512xf32> -> vector<8x512xf32>
    %159 = arith.addf %155, %158 : vector<8x512xf32>
    %160 = vector.extract_strided_slice %159 {offsets = [0, 0], sizes = [8, 128], strides = [1, 1]} : vector<8x512xf32> to vector<8x128xf32>
    %161 = arith.negf %160 : vector<8x128xf32>
    %162 = math.exp %161 : vector<8x128xf32>
    %cst_49 = arith.constant 1.000000e+00 : f32
    %163 = vector.broadcast %cst_49 : f32 to vector<8x128xf32>
    %164 = arith.addf %163, %162 : vector<8x128xf32>
    %165 = arith.divf %163, %164 : vector<8x128xf32>
    %166 = vector.extract_strided_slice %159 {offsets = [0, 128], sizes = [8, 128], strides = [1, 1]} : vector<8x512xf32> to vector<8x128xf32>
    %167 = arith.negf %166 : vector<8x128xf32>
    %168 = math.exp %167 : vector<8x128xf32>
    %cst_50 = arith.constant 1.000000e+00 : f32
    %169 = vector.broadcast %cst_50 : f32 to vector<8x128xf32>
    %170 = arith.addf %169, %168 : vector<8x128xf32>
    %171 = arith.divf %169, %170 : vector<8x128xf32>
    %172 = vector.extract_strided_slice %159 {offsets = [0, 256], sizes = [8, 128], strides = [1, 1]} : vector<8x512xf32> to vector<8x128xf32>
    %173 = math.tanh %172 : vector<8x128xf32>
    %174 = vector.extract_strided_slice %159 {offsets = [0, 384], sizes = [8, 128], strides = [1, 1]} : vector<8x512xf32> to vector<8x128xf32>
    %175 = arith.negf %174 : vector<8x128xf32>
    %176 = math.exp %175 : vector<8x128xf32>
    %cst_51 = arith.constant 1.000000e+00 : f32
    %177 = vector.broadcast %cst_51 : f32 to vector<8x128xf32>
    %178 = arith.addf %177, %176 : vector<8x128xf32>
    %179 = arith.divf %177, %178 : vector<8x128xf32>
    %180 = arith.mulf %171, %145 : vector<8x128xf32>
    %181 = arith.mulf %165, %173 : vector<8x128xf32>
    %182 = arith.addf %180, %181 : vector<8x128xf32>
    %183 = math.tanh %182 : vector<8x128xf32>
    %184 = arith.mulf %179, %183 : vector<8x128xf32>
    %185 = arith.truncf %184 : vector<8x128xf32> to vector<8x128xbf16>
    %186 = arith.index_cast %c4_i32 : i32 to index
    %c0_52 = arith.constant 0 : index
    %c0_53 = arith.constant 0 : index
    %187 = vector.load %arg3[%186, %c0_52, %c0_53] : memref<8x8x128xbf16, #tpu.memory_space<vmem>>, vector<1x8x128xbf16>
    %188 = vector.shape_cast %187 : vector<1x8x128xbf16> to vector<8x128xbf16>
    %189 = vector.shape_cast %185 : vector<8x128xbf16> to vector<1x8x128xbf16>
    tpu.vector_store %arg3[%186, %c0_52, %c0_53], %189 {strides = array<i32>} : memref<8x8x128xbf16, #tpu.memory_space<vmem>>, vector<1x8x128xbf16>,
    %c5_i32 = arith.constant 5 : i32
    %190 = arith.index_cast %c5_i32 : i32 to index
    %c0_54 = arith.constant 0 : index
    %c0_55 = arith.constant 0 : index
    %191 = vector.load %arg1[%190, %c0_54, %c0_55] : memref<8x8x512xf32, #tpu.memory_space<vmem>>, vector<1x8x512xf32>
    %192 = vector.shape_cast %191 : vector<1x8x512xf32> to vector<8x512xf32>
    %193 = arith.truncf %184 : vector<8x128xf32> to vector<8x128xbf16>
    %c0_56 = arith.constant 0 : index
    %c0_57 = arith.constant 0 : index
    %194 = vector.load %arg2[%c0_56, %c0_57] : memref<128x512xbf16, #tpu.memory_space<vmem>>, vector<128x512xbf16>
    %cst_58 = arith.constant dense<0.000000e+00> : vector<8x512xf32>
    %195 = tpu.matmul %193, %194, %cst_58 {dimension_numbers = #tpu.dot_dimension_numbers<[1], [0], [0], [1], [0, 0, 1, 1], [], []>} : vector<8x128xbf16>, vector<128x512xbf16>, vector<8x512xf32> -> vector<8x512xf32>
    %196 = arith.addf %192, %195 : vector<8x512xf32>
    %197 = vector.extract_strided_slice %196 {offsets = [0, 0], sizes = [8, 128], strides = [1, 1]} : vector<8x512xf32> to vector<8x128xf32>
    %198 = arith.negf %197 : vector<8x128xf32>
    %199 = math.exp %198 : vector<8x128xf32>
    %cst_59 = arith.constant 1.000000e+00 : f32
    %200 = vector.broadcast %cst_59 : f32 to vector<8x128xf32>
    %201 = arith.addf %200, %199 : vector<8x128xf32>
    %202 = arith.divf %200, %201 : vector<8x128xf32>
    %203 = vector.extract_strided_slice %196 {offsets = [0, 128], sizes = [8, 128], strides = [1, 1]} : vector<8x512xf32> to vector<8x128xf32>
    %204 = arith.negf %203 : vector<8x128xf32>
    %205 = math.exp %204 : vector<8x128xf32>
    %cst_60 = arith.constant 1.000000e+00 : f32
    %206 = vector.broadcast %cst_60 : f32 to vector<8x128xf32>
    %207 = arith.addf %206, %205 : vector<8x128xf32>
    %208 = arith.divf %206, %207 : vector<8x128xf32>
    %209 = vector.extract_strided_slice %196 {offsets = [0, 256], sizes = [8, 128], strides = [1, 1]} : vector<8x512xf32> to vector<8x128xf32>
    %210 = math.tanh %209 : vector<8x128xf32>
    %211 = vector.extract_strided_slice %196 {offsets = [0, 384], sizes = [8, 128], strides = [1, 1]} : vector<8x512xf32> to vector<8x128xf32>
    %212 = arith.negf %211 : vector<8x128xf32>
    %213 = math.exp %212 : vector<8x128xf32>
    %cst_61 = arith.constant 1.000000e+00 : f32
    %214 = vector.broadcast %cst_61 : f32 to vector<8x128xf32>
    %215 = arith.addf %214, %213 : vector<8x128xf32>
    %216 = arith.divf %214, %215 : vector<8x128xf32>
    %217 = arith.mulf %208, %182 : vector<8x128xf32>
    %218 = arith.mulf %202, %210 : vector<8x128xf32>
    %219 = arith.addf %217, %218 : vector<8x128xf32>
    %220 = math.tanh %219 : vector<8x128xf32>
    %221 = arith.mulf %216, %220 : vector<8x128xf32>
    %222 = arith.truncf %221 : vector<8x128xf32> to vector<8x128xbf16>
    %223 = arith.index_cast %c5_i32 : i32 to index
    %c0_62 = arith.constant 0 : index
    %c0_63 = arith.constant 0 : index
    %224 = vector.load %arg3[%223, %c0_62, %c0_63] : memref<8x8x128xbf16, #tpu.memory_space<vmem>>, vector<1x8x128xbf16>
    %225 = vector.shape_cast %224 : vector<1x8x128xbf16> to vector<8x128xbf16>
    %226 = vector.shape_cast %222 : vector<8x128xbf16> to vector<1x8x128xbf16>
    tpu.vector_store %arg3[%223, %c0_62, %c0_63], %226 {strides = array<i32>} : memref<8x8x128xbf16, #tpu.memory_space<vmem>>, vector<1x8x128xbf16>,
    %c6_i32 = arith.constant 6 : i32
    %227 = arith.index_cast %c6_i32 : i32 to index
    %c0_64 = arith.constant 0 : index
    %c0_65 = arith.constant 0 : index
    %228 = vector.load %arg1[%227, %c0_64, %c0_65] : memref<8x8x512xf32, #tpu.memory_space<vmem>>, vector<1x8x512xf32>
    %229 = vector.shape_cast %228 : vector<1x8x512xf32> to vector<8x512xf32>
    %230 = arith.truncf %221 : vector<8x128xf32> to vector<8x128xbf16>
    %c0_66 = arith.constant 0 : index
    %c0_67 = arith.constant 0 : index
    %231 = vector.load %arg2[%c0_66, %c0_67] : memref<128x512xbf16, #tpu.memory_space<vmem>>, vector<128x512xbf16>
    %cst_68 = arith.constant dense<0.000000e+00> : vector<8x512xf32>
    %232 = tpu.matmul %230, %231, %cst_68 {dimension_numbers = #tpu.dot_dimension_numbers<[1], [0], [0], [1], [0, 0, 1, 1], [], []>} : vector<8x128xbf16>, vector<128x512xbf16>, vector<8x512xf32> -> vector<8x512xf32>
    %233 = arith.addf %229, %232 : vector<8x512xf32>
    %234 = vector.extract_strided_slice %233 {offsets = [0, 0], sizes = [8, 128], strides = [1, 1]} : vector<8x512xf32> to vector<8x128xf32>
    %235 = arith.negf %234 : vector<8x128xf32>
    %236 = math.exp %235 : vector<8x128xf32>
    %cst_69 = arith.constant 1.000000e+00 : f32
    %237 = vector.broadcast %cst_69 : f32 to vector<8x128xf32>
    %238 = arith.addf %237, %236 : vector<8x128xf32>
    %239 = arith.divf %237, %238 : vector<8x128xf32>
    %240 = vector.extract_strided_slice %233 {offsets = [0, 128], sizes = [8, 128], strides = [1, 1]} : vector<8x512xf32> to vector<8x128xf32>
    %241 = arith.negf %240 : vector<8x128xf32>
    %242 = math.exp %241 : vector<8x128xf32>
    %cst_70 = arith.constant 1.000000e+00 : f32
    %243 = vector.broadcast %cst_70 : f32 to vector<8x128xf32>
    %244 = arith.addf %243, %242 : vector<8x128xf32>
    %245 = arith.divf %243, %244 : vector<8x128xf32>
    %246 = vector.extract_strided_slice %233 {offsets = [0, 256], sizes = [8, 128], strides = [1, 1]} : vector<8x512xf32> to vector<8x128xf32>
    %247 = math.tanh %246 : vector<8x128xf32>
    %248 = vector.extract_strided_slice %233 {offsets = [0, 384], sizes = [8, 128], strides = [1, 1]} : vector<8x512xf32> to vector<8x128xf32>
    %249 = arith.negf %248 : vector<8x128xf32>
    %250 = math.exp %249 : vector<8x128xf32>
    %cst_71 = arith.constant 1.000000e+00 : f32
    %251 = vector.broadcast %cst_71 : f32 to vector<8x128xf32>
    %252 = arith.addf %251, %250 : vector<8x128xf32>
    %253 = arith.divf %251, %252 : vector<8x128xf32>
    %254 = arith.mulf %245, %219 : vector<8x128xf32>
    %255 = arith.mulf %239, %247 : vector<8x128xf32>
    %256 = arith.addf %254, %255 : vector<8x128xf32>
    %257 = math.tanh %256 : vector<8x128xf32>
    %258 = arith.mulf %253, %257 : vector<8x128xf32>
    %259 = arith.truncf %258 : vector<8x128xf32> to vector<8x128xbf16>
    %260 = arith.index_cast %c6_i32 : i32 to index
    %c0_72 = arith.constant 0 : index
    %c0_73 = arith.constant 0 : index
    %261 = vector.load %arg3[%260, %c0_72, %c0_73] : memref<8x8x128xbf16, #tpu.memory_space<vmem>>, vector<1x8x128xbf16>
    %262 = vector.shape_cast %261 : vector<1x8x128xbf16> to vector<8x128xbf16>
    %263 = vector.shape_cast %259 : vector<8x128xbf16> to vector<1x8x128xbf16>
    tpu.vector_store %arg3[%260, %c0_72, %c0_73], %263 {strides = array<i32>} : memref<8x8x128xbf16, #tpu.memory_space<vmem>>, vector<1x8x128xbf16>,
    %c7_i32 = arith.constant 7 : i32
    %264 = arith.index_cast %c7_i32 : i32 to index
    %c0_74 = arith.constant 0 : index
    %c0_75 = arith.constant 0 : index
    %265 = vector.load %arg1[%264, %c0_74, %c0_75] : memref<8x8x512xf32, #tpu.memory_space<vmem>>, vector<1x8x512xf32>
    %266 = vector.shape_cast %265 : vector<1x8x512xf32> to vector<8x512xf32>
    %267 = arith.truncf %258 : vector<8x128xf32> to vector<8x128xbf16>
    %c0_76 = arith.constant 0 : index
    %c0_77 = arith.constant 0 : index
    %268 = vector.load %arg2[%c0_76, %c0_77] : memref<128x512xbf16, #tpu.memory_space<vmem>>, vector<128x512xbf16>
    %cst_78 = arith.constant dense<0.000000e+00> : vector<8x512xf32>
    %269 = tpu.matmul %267, %268, %cst_78 {dimension_numbers = #tpu.dot_dimension_numbers<[1], [0], [0], [1], [0, 0, 1, 1], [], []>} : vector<8x128xbf16>, vector<128x512xbf16>, vector<8x512xf32> -> vector<8x512xf32>
    %270 = arith.addf %266, %269 : vector<8x512xf32>
    %271 = vector.extract_strided_slice %270 {offsets = [0, 0], sizes = [8, 128], strides = [1, 1]} : vector<8x512xf32> to vector<8x128xf32>
    %272 = arith.negf %271 : vector<8x128xf32>
    %273 = math.exp %272 : vector<8x128xf32>
    %cst_79 = arith.constant 1.000000e+00 : f32
    %274 = vector.broadcast %cst_79 : f32 to vector<8x128xf32>
    %275 = arith.addf %274, %273 : vector<8x128xf32>
    %276 = arith.divf %274, %275 : vector<8x128xf32>
    %277 = vector.extract_strided_slice %270 {offsets = [0, 128], sizes = [8, 128], strides = [1, 1]} : vector<8x512xf32> to vector<8x128xf32>
    %278 = arith.negf %277 : vector<8x128xf32>
    %279 = math.exp %278 : vector<8x128xf32>
    %cst_80 = arith.constant 1.000000e+00 : f32
    %280 = vector.broadcast %cst_80 : f32 to vector<8x128xf32>
    %281 = arith.addf %280, %279 : vector<8x128xf32>
    %282 = arith.divf %280, %281 : vector<8x128xf32>
    %283 = vector.extract_strided_slice %270 {offsets = [0, 256], sizes = [8, 128], strides = [1, 1]} : vector<8x512xf32> to vector<8x128xf32>
    %284 = math.tanh %283 : vector<8x128xf32>
    %285 = vector.extract_strided_slice %270 {offsets = [0, 384], sizes = [8, 128], strides = [1, 1]} : vector<8x512xf32> to vector<8x128xf32>
    %286 = arith.negf %285 : vector<8x128xf32>
    %287 = math.exp %286 : vector<8x128xf32>
    %cst_81 = arith.constant 1.000000e+00 : f32
    %288 = vector.broadcast %cst_81 : f32 to vector<8x128xf32>
    %289 = arith.addf %288, %287 : vector<8x128xf32>
    %290 = arith.divf %288, %289 : vector<8x128xf32>
    %291 = arith.mulf %282, %256 : vector<8x128xf32>
    %292 = arith.mulf %276, %284 : vector<8x128xf32>
    %293 = arith.addf %291, %292 : vector<8x128xf32>
    %294 = math.tanh %293 : vector<8x128xf32>
    %295 = arith.mulf %290, %294 : vector<8x128xf32>
    %296 = arith.truncf %295 : vector<8x128xf32> to vector<8x128xbf16>
    %297 = arith.index_cast %c7_i32 : i32 to index
    %c0_82 = arith.constant 0 : index
    %c0_83 = arith.constant 0 : index
    %298 = vector.load %arg3[%297, %c0_82, %c0_83] : memref<8x8x128xbf16, #tpu.memory_space<vmem>>, vector<1x8x128xbf16>
    %299 = vector.shape_cast %298 : vector<1x8x128xbf16> to vector<8x128xbf16>
    %300 = vector.shape_cast %296 : vector<8x128xbf16> to vector<1x8x128xbf16>
    tpu.vector_store %arg3[%297, %c0_82, %c0_83], %300 {strides = array<i32>} : memref<8x8x128xbf16, #tpu.memory_space<vmem>>, vector<1x8x128xbf16>,
    %c8_i32 = arith.constant 8 : i32
    %c0_84 = arith.constant 0 : index
    %c0_85 = arith.constant 0 : index
    %301 = vector.load %arg4[%c0_84, %c0_85] : memref<8x128xf32, #tpu.memory_space<vmem>>, vector<8x128xf32>
    tpu.vector_store %arg4[%c0_84, %c0_85], %295 {strides = array<i32>} : memref<8x128xf32, #tpu.memory_space<vmem>>, vector<8x128xf32>,
    %c0_86 = arith.constant 0 : index
    %c0_87 = arith.constant 0 : index
    %302 = vector.load %arg5[%c0_86, %c0_87] : memref<8x128xf32, #tpu.memory_space<vmem>>, vector<8x128xf32>
    tpu.vector_store %arg5[%c0_86, %c0_87], %293 {strides = array<i32>} : memref<8x128xf32, #tpu.memory_space<vmem>>, vector<8x128xf32>,
    return
  }
  func.func @transform_0(%arg0: i32) -> (i32, i32, i32) {
    %c0_i32 = arith.constant 0 : i32
    %c0_i32_0 = arith.constant 0 : i32
    %c0_i32_1 = arith.constant 0 : i32
    return %arg0, %c0_i32, %c0_i32_0 : i32, i32, i32
  }
  func.func @transform_1(%arg0: i32) -> (i32, i32) {
    %c0_i32 = arith.constant 0 : i32
    %c0_i32_0 = arith.constant 0 : i32
    %c0_i32_1 = arith.constant 0 : i32
    return %c0_i32, %c0_i32_0 : i32, i32
  }
  func.func @transform_2(%arg0: i32) -> (i32, i32, i32) {
    %c0_i32 = arith.constant 0 : i32
    %c0_i32_0 = arith.constant 0 : i32
    %c0_i32_1 = arith.constant 0 : i32
    return %arg0, %c0_i32, %c0_i32_0 : i32, i32, i32
  }
}

module attributes {stable_mosaic.version = 11 : i64} {
  func.func @matmul_bias_kernel(%arg0: i32, %arg1: i32, %arg2: memref<64x128xbf16, #tpu.memory_space<vmem>>, %arg3: memref<128x128xbf16, #tpu.memory_space<vmem>>, %arg4: memref<1x128xf32, #tpu.memory_space<vmem>>, %arg5: memref<64x128xf32, #tpu.memory_space<vmem>>) attributes {dimension_semantics = [#tpu.dimension_semantics<parallel>, #tpu.dimension_semantics<parallel>], iteration_bounds = array<i64: 1, 1>, scalar_prefetch = 0 : i64, scratch_operands = 0 : i64, tpu.core_type = #tpu.core_type<tc>, window_params = [{transform_indices = @transform_0, window_bounds = array<i64: 64, 128>}, {transform_indices = @transform_1, window_bounds = array<i64: 128, 128>}, {transform_indices = @transform_2, window_bounds = array<i64: 1, 128>}, {transform_indices = @transform_3, window_bounds = array<i64: 64, 128>}]} {
    %c0 = arith.constant 0 : index
    %c0_0 = arith.constant 0 : index
    %0 = vector.load %arg2[%c0, %c0_0] : memref<64x128xbf16, #tpu.memory_space<vmem>>, vector<64x128xbf16>
    %c0_1 = arith.constant 0 : index
    %c0_2 = arith.constant 0 : index
    %1 = vector.load %arg3[%c0_1, %c0_2] : memref<128x128xbf16, #tpu.memory_space<vmem>>, vector<128x128xbf16>
    %cst = arith.constant dense<0.000000e+00> : vector<64x128xf32>
    %2 = tpu.matmul %0, %1, %cst {dimension_numbers = #tpu.dot_dimension_numbers<[1], [0], [0], [1], [0, 0, 1, 1], [], []>} : vector<64x128xbf16>, vector<128x128xbf16>, vector<64x128xf32> -> vector<64x128xf32>
    %c0_3 = arith.constant 0 : index
    %c0_4 = arith.constant 0 : index
    %3 = vector.load %arg4[%c0_3, %c0_4] : memref<1x128xf32, #tpu.memory_space<vmem>>, vector<1x128xf32>
    %4 = vector.broadcast %3 : vector<1x128xf32> to vector<64x128xf32>
    %5 = arith.addf %2, %4 : vector<64x128xf32>
    %c0_5 = arith.constant 0 : index
    %c0_6 = arith.constant 0 : index
    %6 = vector.load %arg5[%c0_5, %c0_6] : memref<64x128xf32, #tpu.memory_space<vmem>>, vector<64x128xf32>
    tpu.vector_store %arg5[%c0_5, %c0_6], %5 {strides = array<i32>} : memref<64x128xf32, #tpu.memory_space<vmem>>, vector<64x128xf32>,
    return
  }
  func.func @transform_0(%arg0: i32, %arg1: i32) -> (i32, i32) {
    %c0_i32 = arith.constant 0 : i32
    %c0_i32_0 = arith.constant 0 : i32
    return %arg0, %c0_i32 : i32, i32
  }
  func.func @transform_1(%arg0: i32, %arg1: i32) -> (i32, i32) {
    %c0_i32 = arith.constant 0 : i32
    %c0_i32_0 = arith.constant 0 : i32
    return %c0_i32, %arg1 : i32, i32
  }
  func.func @transform_2(%arg0: i32, %arg1: i32) -> (i32, i32) {
    %c0_i32 = arith.constant 0 : i32
    %c0_i32_0 = arith.constant 0 : i32
    return %c0_i32, %arg1 : i32, i32
  }
  func.func @transform_3(%arg0: i32, %arg1: i32) -> (i32, i32) {
    %c0_i32 = arith.constant 0 : i32
    return %arg0, %arg1 : i32, i32
  }
}

</mosaic_0001>

<bundles_post_ra>
// kernel: lstm_decoder_forward.3
= control target key start
LH: loop header
LB: loop body
LE: loop exit
PB: predicated region body
PF: predicated region fallthrough
CT: control target
= control target key end

     0   :  { %vm101_vm0 = vcmask 261120   ;;  %s577_s1 = inlined_call_operand.vmem [shape: bf16[32,512], index: 1, kind: input, shape index: {}]   ;;  %s578_s0 = inlined_call_operand.vmem [shape: bf16[64,32], index: 0, kind: input, shape index: {}]   ;;  %s579_s2 = inlined_call_operand.vmem [shape: f32[1,512], index: 2, kind: input, shape index: {}]   ;;  %s580_s3 = inlined_call_operand.vmem [shape: f32[64,512], index: 3, kind: output, shape index: {}]  }
   0x1   :  { %v300_v0 = vld [vmem:[%s577_s1 + $0x20] sm:$0xf]  ;;  %v340_v1 = vld [vmem:[%s577_s1 + $0x2c] sm:$0xf0]  ;;  %v338_v2 = vld [vmem:[%s577_s1 + $0x24] sm:$0xf] }
   0x2   :  { %v301_v3 = vor.u32 %v340_v1, %v300_v0  ;;  %v302_v4 = vld [vmem:[%s577_s1 + $0x30] sm:$0xf0]  ;;  %v308_v5 = vld [vmem:[%s577_s1 + $0x28] sm:$0xf]  ;;  %v341_v6 = vld [vmem:[%s577_s1 + $0x34] sm:$0xf0] }
   0x3   :  { %v305_v7 = vor.u32 %v338_v2, %v302_v4  ;;  %v309_v8 = vor.u32 %v341_v6, %v308_v5  ;;  %v339_v9 = vld [vmem:[%s577_s1 + $0x2c] sm:$0xf]  ;;  %v310_v10 = vld [vmem:[%s577_s1 + $0x38] sm:$0xf0]  ;;  %v284_v11 = vld [vmem:[%s577_s1] sm:$0xf] }
   0x4   :  { %120 = vmatpush.bf16.msra.mxu0 %v301_v3  ;;  %v313_v12 = vor.u32 %v339_v9, %v310_v10  ;;  %v336_v13 = vld [vmem:[%s577_s1 + $0xc] sm:$0xf0]  ;;  %v334_v14 = vld [vmem:[%s577_s1 + $0x4] sm:$0xf]  ;;  %v286_v15 = vld [vmem:[%s577_s1 + $0x10] sm:$0xf0] }
   0x5   :  { %149 = vmatpush.bf16.msra.mxu1 %v305_v7  ;;  %178 = vmatpush.bf16.msra.mxu2 %v309_v8  ;;  %v285_v16 = vor.u32 %v336_v13, %v284_v11  ;;  %v289_v17 = vor.u32 %v334_v14, %v286_v15  ;;  %v292_v18 = vld [vmem:[%s577_s1 + $0x8] sm:$0xf]  ;;  %v337_v19 = vld [vmem:[%s577_s1 + $0x14] sm:$0xf0]  ;;  %v335_v20 = vld [vmem:[%s577_s1 + $0xc] sm:$0xf] }
   0x6   :  { %207 = vmatpush.bf16.msra.mxu3 %v313_v12  ;;  %v293_v21 = vor.u32 %v337_v19, %v292_v18  ;;  %v294_v22 = vld [vmem:[%s577_s1 + $0x18] sm:$0xf0]  ;;  %v330_v24 = vld [vmem:[%s578_s0] sm:$0xff]  ;;  %v331_v25 = vld [vmem:[%s578_s0 + $0x8] sm:$0xff] }
   0x7   :  { %v297_v23 = vor.u32 %v335_v20, %v294_v22  ;;  %v332_v26 = vld [vmem:[%s578_s0 + $0x10] sm:$0xff]  ;;  %v333_v27 = vld [vmem:[%s578_s0 + $0x18] sm:$0xff]  ;;  %v31_v28 = vld [vmem:[%s579_s2] sm:$0xf] }
   0x8   :  { %121 = vmatpush.bf16.msra.mxu0 %v285_v16  ;;  %v441_v29 = vperm.slane %v31_v28, 0  ;;  %v443_v30 = vperm.slane %v31_v28, 1  ;;  %v453_v35 = vperm.slane %v31_v28, 2  ;;  %v455_v36 = vperm.slane %v31_v28, 3 }
   0x9   :  { %150 = vmatpush.bf16.msra.mxu1 %v289_v17  ;;  %179 = vmatpush.bf16.msra.mxu2 %v293_v21 }
   0xa   :  { %208 = vmatpush.bf16.msra.mxu3 %v297_v23 }
   0xb   :  { %314 = vmatmul.msk.bf16.vlgmr.msra.gmra.mxu0 %vm101_vm0, %v330_v24 }
   0xc   :  { %318 = vmatmul.msk.bf16.vlgmr.msra.gmra.mxu1 %vm101_vm0, %v330_v24  ;;  %322 = vmatmul.msk.bf16.vlgmr.msra.gmra.mxu2 %vm101_vm0, %v330_v24 }
   0xd   :  { %326 = vmatmul.msk.bf16.vlgmr.msra.gmra.mxu3 %vm101_vm0, %v330_v24 }
  0x1b   :  { %315 = vmatmul.msk.bf16.gmra.mxu0 %vm101_vm0, %v331_v25 }
  0x1c   :  { %319 = vmatmul.msk.bf16.gmra.mxu1 %vm101_vm0, %v331_v25  ;;  %323 = vmatmul.msk.bf16.gmra.mxu2 %vm101_vm0, %v331_v25 }
  0x1d   :  { %327 = vmatmul.msk.bf16.gmra.mxu3 %vm101_vm0, %v331_v25 }
  0x2b   :  { %316 = vmatmul.msk.bf16.gmra.mxu0 %vm101_vm0, %v332_v26 }
  0x2c   :  { %320 = vmatmul.msk.bf16.gmra.mxu1 %vm101_vm0, %v332_v26  ;;  %324 = vmatmul.msk.bf16.gmra.mxu2 %vm101_vm0, %v332_v26 }
  0x2d   :  { %328 = vmatmul.msk.bf16.gmra.mxu3 %vm101_vm0, %v332_v26 }
  0x3b   :  { %317 = vmatmul.msk.bf16.gmra.mxu0 %vm101_vm0, %v333_v27 }
  0x3c   :  { %321 = vmatmul.msk.bf16.gmra.mxu1 %vm101_vm0, %v333_v27  ;;  %325 = vmatmul.msk.bf16.gmra.mxu2 %vm101_vm0, %v333_v27 }
  0x3d   :  { %329 = vmatmul.msk.bf16.gmra.mxu3 %vm101_vm0, %v333_v27 }
  0x88   :  { %v123_v31 = vpop.f32.mrf.mxu0 }
  0x89   :  { %v124_v32 = vadd.f32 %v123_v31, %v441_v29  ;;  %v152_v33 = vpop.f32.mrf.mxu1 }
  0x8a   :  { %v153_v34 = vadd.f32 %v152_v33, %v443_v30 }
  0x8b   :  { %230 = vst [vmem:[%s580_s3] sm:$0xff] %v124_v32 }
  0x8c   :  { %231 = vst [vmem:[%s580_s3 + $0x8] sm:$0xff] %v153_v34 }
  0x8f   :  { %v181_v37 = vpop.f32.mrf.mxu2 }
  0x90   :  { %v182_v38 = vadd.f32 %v181_v37, %v453_v35  ;;  %v210_v39 = vpop.f32.mrf.mxu3  ;;  %v125_v40 = vpop.f32.mrf.mxu0 }
  0x91   :  { %v211_v41 = vadd.f32 %v210_v39, %v455_v36  ;;  %v126_v42 = vadd.f32 %v125_v40, %v441_v29  ;;  %v154_v43 = vpop.f32.mrf.mxu1 }
  0x92   :  { %232 = vst [vmem:[%s580_s3 + $0x10] sm:$0xff] %v182_v38  ;;  %v155_v44 = vadd.f32 %v154_v43, %v443_v30 }
  0x93   :  { %233 = vst [vmem:[%s580_s3 + $0x18] sm:$0xff] %v211_v41 }
  0x94   :  { %234 = vst [vmem:[%s580_s3 + $0x20] sm:$0xff] %v126_v42 }
  0x95   :  { %235 = vst [vmem:[%s580_s3 + $0x28] sm:$0xff] %v155_v44 }
  0x97   :  { %v183_v45 = vpop.f32.mrf.mxu2 }
  0x98   :  { %v184_v46 = vadd.f32 %v183_v45, %v453_v35  ;;  %v212_v47 = vpop.f32.mrf.mxu3  ;;  %v128_v48 = vpop.f32.mrf.mxu0 }
  0x99   :  { %v213_v49 = vadd.f32 %v212_v47, %v455_v36  ;;  %v129_v50 = vadd.f32 %v128_v48, %v441_v29  ;;  %v157_v51 = vpop.f32.mrf.mxu1 }
  0x9a   :  { %236 = vst [vmem:[%s580_s3 + $0x30] sm:$0xff] %v184_v46  ;;  %v158_v52 = vadd.f32 %v157_v51, %v443_v30 }
  0x9b   :  { %237 = vst [vmem:[%s580_s3 + $0x38] sm:$0xff] %v213_v49 }
  0x9c   :  { %238 = vst [vmem:[%s580_s3 + $0x40] sm:$0xff] %v129_v50 }
  0x9d   :  { %239 = vst [vmem:[%s580_s3 + $0x48] sm:$0xff] %v158_v52 }
  0x9f   :  { %v186_v53 = vpop.f32.mrf.mxu2 }
  0xa0   :  { %v187_v54 = vadd.f32 %v186_v53, %v453_v35  ;;  %v215_v55 = vpop.f32.mrf.mxu3  ;;  %v130_v56 = vpop.f32.mrf.mxu0 }
  0xa1   :  { %v216_v57 = vadd.f32 %v215_v55, %v455_v36  ;;  %v131_v58 = vadd.f32 %v130_v56, %v441_v29  ;;  %v159_v59 = vpop.f32.mrf.mxu1 }
  0xa2   :  { %240 = vst [vmem:[%s580_s3 + $0x50] sm:$0xff] %v187_v54  ;;  %v160_v60 = vadd.f32 %v159_v59, %v443_v30 }
  0xa3   :  { %241 = vst [vmem:[%s580_s3 + $0x58] sm:$0xff] %v216_v57 }
  0xa4   :  { %242 = vst [vmem:[%s580_s3 + $0x60] sm:$0xff] %v131_v58 }
  0xa5   :  { %243 = vst [vmem:[%s580_s3 + $0x68] sm:$0xff] %v160_v60 }
  0xa7   :  { %v188_v61 = vpop.f32.mrf.mxu2 }
  0xa8   :  { %v189_v62 = vadd.f32 %v188_v61, %v453_v35  ;;  %v217_v63 = vpop.f32.mrf.mxu3  ;;  %v133_v0 = vpop.f32.mrf.mxu0 }
  0xa9   :  { %v218_v1 = vadd.f32 %v217_v63, %v455_v36  ;;  %v134_v2 = vadd.f32 %v133_v0, %v441_v29  ;;  %v162_v3 = vpop.f32.mrf.mxu1 }
  0xaa   :  { %244 = vst [vmem:[%s580_s3 + $0x70] sm:$0xff] %v189_v62  ;;  %v163_v4 = vadd.f32 %v162_v3, %v443_v30 }
  0xab   :  { %245 = vst [vmem:[%s580_s3 + $0x78] sm:$0xff] %v218_v1 }
  0xac   :  { %246 = vst [vmem:[%s580_s3 + $0x80] sm:$0xff] %v134_v2 }
  0xad   :  { %247 = vst [vmem:[%s580_s3 + $0x88] sm:$0xff] %v163_v4 }
  0xaf   :  { %v191_v5 = vpop.f32.mrf.mxu2 }
  0xb0   :  { %v192_v6 = vadd.f32 %v191_v5, %v453_v35  ;;  %v220_v7 = vpop.f32.mrf.mxu3  ;;  %v135_v8 = vpop.f32.mrf.mxu0 }
  0xb1   :  { %v221_v9 = vadd.f32 %v220_v7, %v455_v36  ;;  %v136_v10 = vadd.f32 %v135_v8, %v441_v29  ;;  %v164_v11 = vpop.f32.mrf.mxu1 }
  0xb2   :  { %248 = vst [vmem:[%s580_s3 + $0x90] sm:$0xff] %v192_v6  ;;  %v165_v12 = vadd.f32 %v164_v11, %v443_v30 }
  0xb3   :  { %249 = vst [vmem:[%s580_s3 + $0x98] sm:$0xff] %v221_v9 }
  0xb4   :  { %250 = vst [vmem:[%s580_s3 + $0xa0] sm:$0xff] %v136_v10 }
  0xb5   :  { %251 = vst [vmem:[%s580_s3 + $0xa8] sm:$0xff] %v165_v12 }
  0xb7   :  { %v193_v13 = vpop.f32.mrf.mxu2 }
  0xb8   :  { %v194_v14 = vadd.f32 %v193_v13, %v453_v35  ;;  %v222_v15 = vpop.f32.mrf.mxu3  ;;  %v138_v16 = vpop.f32.mrf.mxu0 }
  0xb9   :  { %v223_v17 = vadd.f32 %v222_v15, %v455_v36  ;;  %v139_v18 = vadd.f32 %v138_v16, %v441_v29  ;;  %v167_v19 = vpop.f32.mrf.mxu1 }
  0xba   :  { %252 = vst [vmem:[%s580_s3 + $0xb0] sm:$0xff] %v194_v14  ;;  %v168_v20 = vadd.f32 %v167_v19, %v443_v30 }
  0xbb   :  { %253 = vst [vmem:[%s580_s3 + $0xb8] sm:$0xff] %v223_v17 }
  0xbc   :  { %254 = vst [vmem:[%s580_s3 + $0xc0] sm:$0xff] %v139_v18 }
  0xbd   :  { %255 = vst [vmem:[%s580_s3 + $0xc8] sm:$0xff] %v168_v20 }
  0xbf   :  { %v196_v21 = vpop.f32.mrf.mxu2 }
  0xc0   :  { %v197_v22 = vadd.f32 %v196_v21, %v453_v35  ;;  %v225_v23 = vpop.f32.mrf.mxu3  ;;  %v140_v24 = vpop.f32.mrf.mxu0 }
  0xc1   :  { %v226_v25 = vadd.f32 %v225_v23, %v455_v36  ;;  %v141_v26 = vadd.f32 %v140_v24, %v441_v29  ;;  %v169_v27 = vpop.f32.mrf.mxu1 }
  0xc2   :  { %256 = vst [vmem:[%s580_s3 + $0xd0] sm:$0xff] %v197_v22  ;;  %v170_v28 = vadd.f32 %v169_v27, %v443_v30 }
  0xc3   :  { %257 = vst [vmem:[%s580_s3 + $0xd8] sm:$0xff] %v226_v25 }
  0xc4   :  { %258 = vst [vmem:[%s580_s3 + $0xe0] sm:$0xff] %v141_v26 }
  0xc5   :  { %259 = vst [vmem:[%s580_s3 + $0xe8] sm:$0xff] %v170_v28 }
  0xc7   :  { %v198_v29 = vpop.f32.mrf.mxu2 }
  0xc8   :  { %v199_v31 = vadd.f32 %v198_v29, %v453_v35  ;;  %v227_v32 = vpop.f32.mrf.mxu3 }
  0xc9   :  { %v228_v33 = vadd.f32 %v227_v32, %v455_v36 }
  0xca   :  { %260 = vst [vmem:[%s580_s3 + $0xf0] sm:$0xff] %v199_v31 }
  0xcb   :  { %261 = vst [vmem:[%s580_s3 + $0xf8] sm:$0xff] %v228_v33 }

// kernel: lstm_decoder_forward.5
= control target key start
LH: loop header
LB: loop body
LE: loop exit
PB: predicated region body
PF: predicated region fallthrough
CT: control target
= control target key end

     0   :  { %s323_s1 = inlined_call_operand.vmem [shape: bf16[128,128], index: 1, kind: input, shape index: {}]   ;;  %s324_s2 = inlined_call_operand.vmem [shape: f32[1,128], index: 2, kind: input, shape index: {}]   ;;  %s325_s0 = inlined_call_operand.vmem [shape: bf16[64,128], index: 0, kind: input, shape index: {}]   ;;  %s326_s3 = inlined_call_operand.vmem [shape: f32[64,128], index: 3, kind: output, shape index: {}]  }
   0x1   :  { %v214_v0 = vld [vmem:[%s323_s1 + $0x38] sm:$0xff]  ;;  %v213_v1 = vld [vmem:[%s323_s1 + $0x30] sm:$0xff]  ;;  %v212_v2 = vld [vmem:[%s323_s1 + $0x28] sm:$0xff] }
   0x2   :  { %114 = vmatpush.bf16.msra.mxu0 %v214_v0  ;;  %215 = vmatpush.bf16.msra.mxu1 %v214_v0  ;;  %v211_v3 = vld [vmem:[%s323_s1 + $0x20] sm:$0xff]  ;;  %v210_v4 = vld [vmem:[%s323_s1 + $0x18] sm:$0xff]  ;;  %v209_v5 = vld [vmem:[%s323_s1 + $0x10] sm:$0xff] }
   0x3   :  { %216 = vmatpush.bf16.msra.mxu2 %v214_v0  ;;  %217 = vmatpush.bf16.msra.mxu3 %v214_v0  ;;  %v208_v6 = vld [vmem:[%s323_s1 + $0x8] sm:$0xff]  ;;  %v207_v7 = vld [vmem:[%s323_s1] sm:$0xff]  ;;  %v205_v10 = vld [vmem:[%s325_s0 + $0x10] sm:$0xff] }
   0x4   :  { %v203_v8 = vld [vmem:[%s325_s0] sm:$0xff]  ;;  %v204_v9 = vld [vmem:[%s325_s0 + $0x8] sm:$0xff]  ;;  %v206_v11 = vld [vmem:[%s325_s0 + $0x18] sm:$0xff] }
   0x5   :  { %v239_v12 = vld [vmem:[%s324_s2] ss:$0 sm:$0xff] }
   0x6   :  { %115 = vmatpush.bf16.msra.mxu0 %v213_v1  ;;  %218 = vmatpush.bf16.msra.mxu1 %v213_v1 }
   0x7   :  { %219 = vmatpush.bf16.msra.mxu2 %v213_v1  ;;  %220 = vmatpush.bf16.msra.mxu3 %v213_v1 }
   0xa   :  { %116 = vmatpush.bf16.msra.mxu0 %v212_v2  ;;  %221 = vmatpush.bf16.msra.mxu1 %v212_v2 }
   0xb   :  { %222 = vmatpush.bf16.msra.mxu2 %v212_v2  ;;  %223 = vmatpush.bf16.msra.mxu3 %v212_v2 }
   0xe   :  { %117 = vmatpush.bf16.msra.mxu0 %v211_v3  ;;  %224 = vmatpush.bf16.msra.mxu1 %v211_v3 }
   0xf   :  { %225 = vmatpush.bf16.msra.mxu2 %v211_v3  ;;  %226 = vmatpush.bf16.msra.mxu3 %v211_v3 }
  0x12   :  { %118 = vmatpush.bf16.msra.mxu0 %v210_v4  ;;  %227 = vmatpush.bf16.msra.mxu1 %v210_v4 }
  0x13   :  { %228 = vmatpush.bf16.msra.mxu2 %v210_v4  ;;  %229 = vmatpush.bf16.msra.mxu3 %v210_v4 }
  0x16   :  { %119 = vmatpush.bf16.msra.mxu0 %v209_v5  ;;  %230 = vmatpush.bf16.msra.mxu1 %v209_v5 }
  0x17   :  { %231 = vmatpush.bf16.msra.mxu2 %v209_v5  ;;  %232 = vmatpush.bf16.msra.mxu3 %v209_v5 }
  0x1a   :  { %120 = vmatpush.bf16.msra.mxu0 %v208_v6  ;;  %233 = vmatpush.bf16.msra.mxu1 %v208_v6 }
  0x1b   :  { %234 = vmatpush.bf16.msra.mxu2 %v208_v6  ;;  %235 = vmatpush.bf16.msra.mxu3 %v208_v6 }
  0x1e   :  { %121 = vmatpush.bf16.msra.mxu0 %v207_v7  ;;  %236 = vmatpush.bf16.msra.mxu1 %v207_v7 }
  0x1f   :  { %237 = vmatpush.bf16.msra.mxu2 %v207_v7  ;;  %238 = vmatpush.bf16.msra.mxu3 %v207_v7 }
  0x21   :  { %122 = vmatmul.bf16.vlgmr.msra.gmra.mxu0 %v203_v8  ;;  %127 = vmatmul.bf16.vlgmr.msra.gmra.mxu1 %v204_v9 }
  0x22   :  { %132 = vmatmul.bf16.vlgmr.msra.gmra.mxu2 %v205_v10  ;;  %137 = vmatmul.bf16.vlgmr.msra.gmra.mxu3 %v206_v11 }
  0x9e   :  { %v123_v13 = vpop.f32.mrf.mxu0  ;;  %v128_v14 = vpop.f32.mrf.mxu1 }
  0x9f   :  { %v124_v15 = vadd.f32 %v239_v12, %v123_v13  ;;  %v129_v16 = vadd.f32 %v239_v12, %v128_v14 }
  0xa1   :  { %143 = vst [vmem:[%s326_s3] sm:$0xff] %v124_v15 }
  0xa2   :  { %145 = vst [vmem:[%s326_s3 + $0x10] sm:$0xff] %v129_v16 }
  0xa5   :  { %v133_v17 = vpop.f32.mrf.mxu2  ;;  %v138_v18 = vpop.f32.mrf.mxu3 }
  0xa6   :  { %v134_v19 = vadd.f32 %v239_v12, %v133_v17  ;;  %v139_v20 = vadd.f32 %v239_v12, %v138_v18  ;;  %v125_v21 = vpop.f32.mrf.mxu0  ;;  %v130_v22 = vpop.f32.mrf.mxu1 }
  0xa7   :  { %v126_v23 = vadd.f32 %v239_v12, %v125_v21  ;;  %v131_v24 = vadd.f32 %v239_v12, %v130_v22 }
  0xa8   :  { %147 = vst [vmem:[%s326_s3 + $0x20] sm:$0xff] %v134_v19 }
  0xa9   :  { %149 = vst [vmem:[%s326_s3 + $0x30] sm:$0xff] %v139_v20 }
  0xaa   :  { %144 = vst [vmem:[%s326_s3 + $0x8] sm:$0xff] %v126_v23 }
  0xab   :  { %146 = vst [vmem:[%s326_s3 + $0x18] sm:$0xff] %v131_v24 }
  0xad   :  { %v135_v25 = vpop.f32.mrf.mxu2  ;;  %v140_v26 = vpop.f32.mrf.mxu3 }
  0xae   :  { %v136_v27 = vadd.f32 %v239_v12, %v135_v25  ;;  %v141_v28 = vadd.f32 %v239_v12, %v140_v26 }
  0xb0   :  { %148 = vst [vmem:[%s326_s3 + $0x28] sm:$0xff] %v136_v27 }
  0xb1   :  { %150 = vst [vmem:[%s326_s3 + $0x38] sm:$0xff] %v141_v28 }

// kernel: lstm_decoder_forward.4
= control target key start
LH: loop header
LB: loop body
LE: loop exit
PB: predicated region body
PF: predicated region fallthrough
CT: control target
= control target key end

     0   :  { %s5744_s1 = inlined_call_operand.vmem [shape: bf16[128,512], index: 1, kind: input, shape index: {}]   ;;  %s5745_s0 = inlined_call_operand.vmem [shape: f32[8,8,512], index: 0, kind: input, shape index: {}]   ;;  %s5746_s2 = inlined_call_operand.vmem [shape: bf16[8,8,128], index: 2, kind: output, shape index: {}]  }
   0x1   :  { %v2690_v0 = vld [vmem:[%s5744_s1 + $0xe0] sm:$0xf]  ;;  %v3689_v1 = vld [vmem:[%s5744_s1 + $0xec] sm:$0xf0]  ;;  %v3687_v2 = vld [vmem:[%s5744_s1 + $0xe4] sm:$0xf] }
   0x2   :  { %v2691_v3 = vor.u32 %v3689_v1, %v2690_v0  ;;  %v2692_v4 = vld [vmem:[%s5744_s1 + $0xf0] sm:$0xf0]  ;;  %v3688_v5 = vld [vmem:[%s5744_s1 + $0xec] sm:$0xf]  ;;  %v2700_v6 = vld [vmem:[%s5744_s1 + $0xf8] sm:$0xf0] }
   0x3   :  { %v2695_v7 = vor.u32 %v3687_v2, %v2692_v4  ;;  %v2703_v8 = vor.u32 %v3688_v5, %v2700_v6  ;;  %v2674_v9 = vld [vmem:[%s5744_s1 + $0xc0] sm:$0xf]  ;;  %v3685_v10 = vld [vmem:[%s5744_s1 + $0xcc] sm:$0xf0]  ;;  %v3683_v11 = vld [vmem:[%s5744_s1 + $0xc4] sm:$0xf] }
   0x4   :  { %216 = vmatpush.bf16.msra.mxu0 %v2691_v3  ;;  %v2675_v12 = vor.u32 %v3685_v10, %v2674_v9  ;;  %v2676_v13 = vld [vmem:[%s5744_s1 + $0xd0] sm:$0xf0]  ;;  %v3684_v14 = vld [vmem:[%s5744_s1 + $0xcc] sm:$0xf]  ;;  %v2684_v15 = vld [vmem:[%s5744_s1 + $0xd8] sm:$0xf0] }
   0x5   :  { %229 = vmatpush.bf16.msra.mxu1 %v2695_v7  ;;  %255 = vmatpush.bf16.msra.mxu3 %v2703_v8  ;;  %v2679_v16 = vor.u32 %v3683_v11, %v2676_v13  ;;  %v2687_v17 = vor.u32 %v3684_v14, %v2684_v15  ;;  %v2698_v18 = vld [vmem:[%s5744_s1 + $0xe8] sm:$0xf]  ;;  %v3690_v19 = vld [vmem:[%s5744_s1 + $0xf4] sm:$0xf0]  ;;  %v2658_v20 = vld [vmem:[%s5744_s1 + $0xa0] sm:$0xf] }
   0x6   :  { %v2699_v21 = vor.u32 %v3690_v19, %v2698_v18  ;;  %v3681_v22 = vld [vmem:[%s5744_s1 + $0xac] sm:$0xf0]  ;;  %v3679_v23 = vld [vmem:[%s5744_s1 + $0xa4] sm:$0xf]  ;;  %v2660_v24 = vld [vmem:[%s5744_s1 + $0xb0] sm:$0xf0] }
   0x7   :  { %v3680_v25 = vld [vmem:[%s5744_s1 + $0xac] sm:$0xf]  ;;  %v2668_v26 = vld [vmem:[%s5744_s1 + $0xb8] sm:$0xf0]  ;;  %v2682_v27 = vld [vmem:[%s5744_s1 + $0xc8] sm:$0xf]  ;;  %v2659_v28 = vor.u32 %v3681_v22, %v2658_v20  ;;  %v2663_v32 = vor.u32 %v3679_v23, %v2660_v24 }
   0x8   :  { %217 = vmatpush.bf16.msra.mxu0 %v2675_v12  ;;  %242 = vmatpush.bf16.msra.mxu2 %v2699_v21  ;;  %v3686_v29 = vld [vmem:[%s5744_s1 + $0xd4] sm:$0xf0]  ;;  %v2642_v30 = vld [vmem:[%s5744_s1 + $0x80] sm:$0xf]  ;;  %v3677_v31 = vld [vmem:[%s5744_s1 + $0x8c] sm:$0xf0]  ;;  %v2671_v33 = vor.u32 %v3680_v25, %v2668_v26 }
   0x9   :  { %230 = vmatpush.bf16.msra.mxu1 %v2679_v16  ;;  %256 = vmatpush.bf16.msra.mxu3 %v2687_v17  ;;  %v2683_v34 = vor.u32 %v3686_v29, %v2682_v27  ;;  %v3675_v35 = vld [vmem:[%s5744_s1 + $0x84] sm:$0xf]  ;;  %v2644_v36 = vld [vmem:[%s5744_s1 + $0x90] sm:$0xf0]  ;;  %v3676_v37 = vld [vmem:[%s5744_s1 + $0x8c] sm:$0xf]  ;;  %v2643_v41 = vor.u32 %v3677_v31, %v2642_v30 }
   0xa   :  { %v2652_v38 = vld [vmem:[%s5744_s1 + $0x98] sm:$0xf0]  ;;  %v2666_v39 = vld [vmem:[%s5744_s1 + $0xa8] sm:$0xf]  ;;  %v3682_v40 = vld [vmem:[%s5744_s1 + $0xb4] sm:$0xf0]  ;;  %v2647_v45 = vor.u32 %v3675_v35, %v2644_v36 }
   0xb   :  { %v2667_v42 = vor.u32 %v3682_v40, %v2666_v39  ;;  %v2626_v43 = vld [vmem:[%s5744_s1 + $0x60] sm:$0xf]  ;;  %v3673_v44 = vld [vmem:[%s5744_s1 + $0x6c] sm:$0xf0]  ;;  %v2655_v46 = vor.u32 %v3676_v37, %v2652_v38  ;;  %v3671_v47 = vld [vmem:[%s5744_s1 + $0x64] sm:$0xf] }
   0xc   :  { %218 = vmatpush.bf16.msra.mxu0 %v2659_v28  ;;  %243 = vmatpush.bf16.msra.mxu2 %v2683_v34  ;;  %v2650_v48 = vld [vmem:[%s5744_s1 + $0x88] sm:$0xf]  ;;  %v3678_v49 = vld [vmem:[%s5744_s1 + $0x94] sm:$0xf0]  ;;  %v2628_v50 = vld [vmem:[%s5744_s1 + $0x70] sm:$0xf0]  ;;  %v2627_v53 = vor.u32 %v3673_v44, %v2626_v43 }
   0xd   :  { %231 = vmatpush.bf16.msra.mxu1 %v2663_v32  ;;  %257 = vmatpush.bf16.msra.mxu3 %v2671_v33  ;;  %v3672_v51 = vld [vmem:[%s5744_s1 + $0x6c] sm:$0xf]  ;;  %v2636_v52 = vld [vmem:[%s5744_s1 + $0x78] sm:$0xf0]  ;;  %v2651_v54 = vor.u32 %v3678_v49, %v2650_v48  ;;  %v2610_v55 = vld [vmem:[%s5744_s1 + $0x40] sm:$0xf]  ;;  %v2631_v57 = vor.u32 %v3671_v47, %v2628_v50 }
   0xe   :  { %v3669_v56 = vld [vmem:[%s5744_s1 + $0x4c] sm:$0xf0]  ;;  %v2639_v58 = vor.u32 %v3672_v51, %v2636_v52  ;;  %v3667_v59 = vld [vmem:[%s5744_s1 + $0x44] sm:$0xf]  ;;  %v2634_v60 = vld [vmem:[%s5744_s1 + $0x68] sm:$0xf] }
   0xf   :  { %v3674_v61 = vld [vmem:[%s5744_s1 + $0x74] sm:$0xf0]  ;;  %v2612_v62 = vld [vmem:[%s5744_s1 + $0x50] sm:$0xf0]  ;;  %v3668_v63 = vld [vmem:[%s5744_s1 + $0x4c] sm:$0xf]  ;;  %v2611_v1 = vor.u32 %v3669_v56, %v2610_v55 }
  0x10   :  { %219 = vmatpush.bf16.msra.mxu0 %v2643_v41  ;;  %244 = vmatpush.bf16.msra.mxu2 %v2667_v42  ;;  %v2620_v0 = vld [vmem:[%s5744_s1 + $0x58] sm:$0xf0]  ;;  %v2635_v2 = vor.u32 %v3674_v61, %v2634_v60  ;;  %v2594_v3 = vld [vmem:[%s5744_s1 + $0x20] sm:$0xf]  ;;  %v3665_v4 = vld [vmem:[%s5744_s1 + $0x2c] sm:$0xf0]  ;;  %v2615_v5 = vor.u32 %v3667_v59, %v2612_v62 }
  0x11   :  { %232 = vmatpush.bf16.msra.mxu1 %v2647_v45  ;;  %258 = vmatpush.bf16.msra.mxu3 %v2655_v46  ;;  %v2623_v6 = vor.u32 %v3668_v63, %v2620_v0  ;;  %v3663_v7 = vld [vmem:[%s5744_s1 + $0x24] sm:$0xf]  ;;  %v2618_v8 = vld [vmem:[%s5744_s1 + $0x48] sm:$0xf]  ;;  %v3670_v9 = vld [vmem:[%s5744_s1 + $0x54] sm:$0xf0]  ;;  %v2595_v13 = vor.u32 %v3665_v4, %v2594_v3 }
  0x12   :  { %v2596_v10 = vld [vmem:[%s5744_s1 + $0x30] sm:$0xf0]  ;;  %v3664_v11 = vld [vmem:[%s5744_s1 + $0x2c] sm:$0xf]  ;;  %v2604_v12 = vld [vmem:[%s5744_s1 + $0x38] sm:$0xf0]  ;;  %v2619_v14 = vor.u32 %v3670_v9, %v2618_v8 }
  0x13   :  { %v2578_v15 = vld [vmem:[%s5744_s1] sm:$0xf]  ;;  %v3661_v16 = vld [vmem:[%s5744_s1 + $0xc] sm:$0xf0]  ;;  %v2599_v17 = vor.u32 %v3663_v7, %v2596_v10  ;;  %v2607_v18 = vor.u32 %v3664_v11, %v2604_v12  ;;  %v3659_v19 = vld [vmem:[%s5744_s1 + $0x4] sm:$0xf] }
  0x14   :  { %220 = vmatpush.bf16.msra.mxu0 %v2627_v53  ;;  %245 = vmatpush.bf16.msra.mxu2 %v2651_v54  ;;  %v2602_v20 = vld [vmem:[%s5744_s1 + $0x28] sm:$0xf]  ;;  %v3666_v21 = vld [vmem:[%s5744_s1 + $0x34] sm:$0xf0]  ;;  %v2580_v22 = vld [vmem:[%s5744_s1 + $0x10] sm:$0xf0]  ;;  %v2579_v25 = vor.u32 %v3661_v16, %v2578_v15 }
  0x15   :  { %233 = vmatpush.bf16.msra.mxu1 %v2631_v57  ;;  %259 = vmatpush.bf16.msra.mxu3 %v2639_v58  ;;  %v3660_v23 = vld [vmem:[%s5744_s1 + $0xc] sm:$0xf]  ;;  %v2588_v24 = vld [vmem:[%s5744_s1 + $0x18] sm:$0xf0]  ;;  %v2603_v26 = vor.u32 %v3666_v21, %v2602_v20  ;;  %v2583_v27 = vor.u32 %v3659_v19, %v2580_v22  ;;  %v2586_v29 = vld [vmem:[%s5744_s1 + $0x8] sm:$0xf] }
  0x16   :  { %v2591_v28 = vor.u32 %v3660_v23, %v2588_v24  ;;  %v3662_v30 = vld [vmem:[%s5744_s1 + $0x14] sm:$0xf0]  ;;  %v4044_v32 = vmov 0.0|0.0   ;;  %v2825_v33 = vld [vmem:[%s5744_s1 + $0xe0] sm:$0xf] }
  0x17   :  { %v2587_v31 = vor.u32 %v3662_v30, %v2586_v29  ;;  %v3721_v34 = vld [vmem:[%s5744_s1 + $0xec] sm:$0xf0]  ;;  %v3719_v35 = vld [vmem:[%s5744_s1 + $0xe4] sm:$0xf]  ;;  %v2827_v37 = vld [vmem:[%s5744_s1 + $0xf0] sm:$0xf0] }
  0x18   :  { %221 = vmatpush.bf16.msra.mxu0 %v2611_v1  ;;  %246 = vmatpush.bf16.msra.mxu2 %v2635_v2  ;;  %v2826_v36 = vor.u32 %v3721_v34, %v2825_v33  ;;  %v2833_v38 = vld [vmem:[%s5744_s1 + $0xe8] sm:$0xf]  ;;  %v3722_v39 = vld [vmem:[%s5744_s1 + $0xf4] sm:$0xf0]  ;;  %v2830_v40 = vor.u32 %v3719_v35, %v2827_v37  ;;  %v3720_v42 = vld [vmem:[%s5744_s1 + $0xec] sm:$0xf] }
  0x19   :  { %234 = vmatpush.bf16.msra.mxu1 %v2615_v5  ;;  %260 = vmatpush.bf16.msra.mxu3 %v2623_v6  ;;  %v2834_v41 = vor.u32 %v3722_v39, %v2833_v38  ;;  %v2835_v43 = vld [vmem:[%s5744_s1 + $0xf8] sm:$0xf0]  ;;  %v2809_v45 = vld [vmem:[%s5744_s1 + $0xc0] sm:$0xf]  ;;  %v3717_v46 = vld [vmem:[%s5744_s1 + $0xcc] sm:$0xf0] }
  0x1a   :  { %v2838_v44 = vor.u32 %v3720_v42, %v2835_v43  ;;  %v3715_v47 = vld [vmem:[%s5744_s1 + $0xc4] sm:$0xf]  ;;  %v2810_v48 = vor.u32 %v3717_v46, %v2809_v45  ;;  %v2811_v49 = vld [vmem:[%s5744_s1 + $0xd0] sm:$0xf0]  ;;  %v2817_v50 = vld [vmem:[%s5744_s1 + $0xc8] sm:$0xf] }
  0x1b   :  { %v3718_v51 = vld [vmem:[%s5744_s1 + $0xd4] sm:$0xf0]  ;;  %v2814_v52 = vor.u32 %v3715_v47, %v2811_v49  ;;  %v3716_v54 = vld [vmem:[%s5744_s1 + $0xcc] sm:$0xf]  ;;  %v2819_v55 = vld [vmem:[%s5744_s1 + $0xd8] sm:$0xf0] }
  0x1c   :  { %222 = vmatpush.bf16.msra.mxu0 %v2595_v13  ;;  %247 = vmatpush.bf16.msra.mxu2 %v2619_v14  ;;  %v2818_v53 = vor.u32 %v3718_v51, %v2817_v50  ;;  %v2822_v56 = vor.u32 %v3716_v54, %v2819_v55  ;;  %v2793_v57 = vld [vmem:[%s5744_s1 + $0xa0] sm:$0xf]  ;;  %v3713_v58 = vld [vmem:[%s5744_s1 + $0xac] sm:$0xf0]  ;;  %v3711_v60 = vld [vmem:[%s5744_s1 + $0xa4] sm:$0xf] }
  0x1d   :  { %235 = vmatpush.bf16.msra.mxu1 %v2599_v17  ;;  %261 = vmatpush.bf16.msra.mxu3 %v2607_v18  ;;  %v2794_v59 = vor.u32 %v3713_v58, %v2793_v57  ;;  %v2795_v61 = vld [vmem:[%s5744_s1 + $0xb0] sm:$0xf0]  ;;  %v2801_v62 = vld [vmem:[%s5744_s1 + $0xa8] sm:$0xf]  ;;  %v3714_v0 = vld [vmem:[%s5744_s1 + $0xb4] sm:$0xf0] }
  0x1e   :  { %v2798_v63 = vor.u32 %v3711_v60, %v2795_v61  ;;  %v3712_v1 = vld [vmem:[%s5744_s1 + $0xac] sm:$0xf]  ;;  %v2803_v2 = vld [vmem:[%s5744_s1 + $0xb8] sm:$0xf0]  ;;  %v2802_v3 = vor.u32 %v3714_v0, %v2801_v62  ;;  %v2777_v5 = vld [vmem:[%s5744_s1 + $0x80] sm:$0xf] }
  0x1f   :  { %v2806_v4 = vor.u32 %v3712_v1, %v2803_v2  ;;  %v3709_v6 = vld [vmem:[%s5744_s1 + $0x8c] sm:$0xf0]  ;;  %v3707_v7 = vld [vmem:[%s5744_s1 + $0x84] sm:$0xf]  ;;  %v2779_v9 = vld [vmem:[%s5744_s1 + $0x90] sm:$0xf0] }
  0x20   :  { %223 = vmatpush.bf16.msra.mxu0 %v2579_v25  ;;  %248 = vmatpush.bf16.msra.mxu2 %v2603_v26  ;;  %v2778_v8 = vor.u32 %v3709_v6, %v2777_v5  ;;  %v2785_v10 = vld [vmem:[%s5744_s1 + $0x88] sm:$0xf]  ;;  %v3710_v11 = vld [vmem:[%s5744_s1 + $0x94] sm:$0xf0]  ;;  %v2782_v12 = vor.u32 %v3707_v7, %v2779_v9  ;;  %v3708_v14 = vld [vmem:[%s5744_s1 + $0x8c] sm:$0xf] }
  0x21   :  { %236 = vmatpush.bf16.msra.mxu1 %v2583_v27  ;;  %262 = vmatpush.bf16.msra.mxu3 %v2591_v28  ;;  %v2786_v13 = vor.u32 %v3710_v11, %v2785_v10  ;;  %v2787_v15 = vld [vmem:[%s5744_s1 + $0x98] sm:$0xf0]  ;;  %v19_v16 = vld [vmem:[%s5745_s0] sm:$0xff]  ;;  %v20_v17 = vld [vmem:[%s5745_s0 + $0x8] sm:$0xff] }
  0x22   :  { %v2790_v18 = vor.u32 %v3708_v14, %v2787_v15  ;;  %v2761_v19 = vld [vmem:[%s5744_s1 + $0x60] sm:$0xf]  ;;  %v3705_v20 = vld [vmem:[%s5744_s1 + $0x6c] sm:$0xf0]  ;;  %v3703_v21 = vld [vmem:[%s5744_s1 + $0x64] sm:$0xf] }
  0x23   :  { %224 = vmatmul.bf16.vlgmr.msra.gmra.mxu0 %v4044_v32  ;;  %v2762_v22 = vor.u32 %v3705_v20, %v2761_v19  ;;  %v2763_v23 = vld [vmem:[%s5744_s1 + $0x70] sm:$0xf0]  ;;  %v2769_v24 = vld [vmem:[%s5744_s1 + $0x68] sm:$0xf]  ;;  %v3706_v25 = vld [vmem:[%s5744_s1 + $0x74] sm:$0xf0] }
  0x24   :  { %237 = vmatmul.bf16.vlgmr.msra.gmra.mxu1 %v4044_v32  ;;  %263 = vmatmul.bf16.vlgmr.msra.gmra.mxu3 %v4044_v32  ;;  %v2766_v27 = vor.u32 %v3703_v21, %v2763_v23  ;;  %v2770_v28 = vor.u32 %v3706_v25, %v2769_v24  ;;  %v3704_v29 = vld [vmem:[%s5744_s1 + $0x6c] sm:$0xf]  ;;  %v2771_v30 = vld [vmem:[%s5744_s1 + $0x78] sm:$0xf0]  ;;  %v2745_v35 = vld [vmem:[%s5744_s1 + $0x40] sm:$0xf] }
  0x25   :  { %249 = vmatpush.bf16.msra.mxu2 %v2587_v31  ;;  %534 = vmatpush.bf16.msrb.mxu0 %v2826_v36  ;;  %v2774_v33 = vor.u32 %v3704_v29, %v2771_v30  ;;  %v3701_v36 = vld [vmem:[%s5744_s1 + $0x4c] sm:$0xf0]  ;;  %v3699_v37 = vld [vmem:[%s5744_s1 + $0x44] sm:$0xf]  ;;  %v22_v39 = vld [vmem:[%s5745_s0 + $0x18] sm:$0xff] }
  0x26   :  { %547 = vmatpush.bf16.msrb.mxu1 %v2830_v40  ;;  %573 = vmatpush.bf16.msrb.mxu3 %v2838_v44  ;;  %v2746_v40 = vor.u32 %v3701_v36, %v2745_v35  ;;  %v2753_v42 = vld [vmem:[%s5744_s1 + $0x48] sm:$0xf]  ;;  %v3702_v45 = vld [vmem:[%s5744_s1 + $0x54] sm:$0xf0]  ;;  %v3700_v46 = vld [vmem:[%s5744_s1 + $0x4c] sm:$0xf] }
  0x27   :  { %v2754_v47 = vor.u32 %v3702_v45, %v2753_v42  ;;  %v2729_v49 = vld [vmem:[%s5744_s1 + $0x20] sm:$0xf]  ;;  %v3697_v50 = vld [vmem:[%s5744_s1 + $0x2c] sm:$0xf0]  ;;  %v2731_v54 = vld [vmem:[%s5744_s1 + $0x30] sm:$0xf0] }
  0x28   :  { %250 = vmatmul.bf16.vlgmr.msra.gmra.mxu2 %v4044_v32  ;;  %v2737_v55 = vld [vmem:[%s5744_s1 + $0x28] sm:$0xf]  ;;  %v3698_v58 = vld [vmem:[%s5744_s1 + $0x34] sm:$0xf0]  ;;  %v2739_v60 = vld [vmem:[%s5744_s1 + $0x38] sm:$0xf0] }
  0x29   :  { %560 = vmatpush.bf16.msrb.mxu2 %v2834_v41  ;;  %535 = vmatpush.bf16.msrb.mxu0 %v2810_v48  ;;  %v2747_v41 = vld [vmem:[%s5744_s1 + $0x50] sm:$0xf0]  ;;  %v2755_v48 = vld [vmem:[%s5744_s1 + $0x58] sm:$0xf0]  ;;  %v2713_v1 = vld [vmem:[%s5744_s1] sm:$0xf] }
  0x2a   :  { %548 = vmatpush.bf16.msrb.mxu1 %v2814_v52  ;;  %574 = vmatpush.bf16.msrb.mxu3 %v2822_v56  ;;  %v2750_v44 = vor.u32 %v3699_v37, %v2747_v41  ;;  %v2758_v51 = vor.u32 %v3700_v46, %v2755_v48  ;;  %v2730_v52 = vor.u32 %v3697_v50, %v2729_v49  ;;  %v3693_v2 = vld [vmem:[%s5744_s1 + $0xc] sm:$0xf0]  ;;  %v2715_v6 = vld [vmem:[%s5744_s1 + $0x10] sm:$0xf0]  ;;  %v2721_v7 = vld [vmem:[%s5744_s1 + $0x8] sm:$0xf] }
  0x2b   :  { %v2714_v5 = vor.u32 %v3693_v2, %v2713_v1  ;;  %v3692_v11 = vld [vmem:[%s5744_s1 + $0xc] sm:$0xf]  ;;  %v21_v20 = vld [vmem:[%s5745_s0 + $0x10] sm:$0xff]  ;;  %v3751_v1 = vld [vmem:[%s5744_s1 + $0xe4] sm:$0xf] }
  0x2d   :  { %561 = vmatpush.bf16.msrb.mxu2 %v2818_v53  ;;  %536 = vmatpush.bf16.msrb.mxu0 %v2794_v59  ;;  %v3695_v53 = vld [vmem:[%s5744_s1 + $0x24] sm:$0xf]  ;;  %v3696_v59 = vld [vmem:[%s5744_s1 + $0x2c] sm:$0xf] }
  0x2e   :  { %549 = vmatpush.bf16.msrb.mxu1 %v2798_v63  ;;  %575 = vmatpush.bf16.msrb.mxu3 %v2806_v4  ;;  %v2734_v57 = vor.u32 %v3695_v53, %v2731_v54  ;;  %v2738_v63 = vor.u32 %v3698_v58, %v2737_v55  ;;  %v2742_v0 = vor.u32 %v3696_v59, %v2739_v60 }
  0x31   :  { %562 = vmatpush.bf16.msrb.mxu2 %v2802_v3  ;;  %537 = vmatpush.bf16.msrb.mxu0 %v2778_v8  ;;  %v3691_v3 = vld [vmem:[%s5744_s1 + $0x4] sm:$0xf]  ;;  %v3694_v8 = vld [vmem:[%s5744_s1 + $0x14] sm:$0xf0] }
  0x32   :  { %550 = vmatpush.bf16.msrb.mxu1 %v2782_v12  ;;  %576 = vmatpush.bf16.msrb.mxu3 %v2790_v18  ;;  %v2718_v10 = vor.u32 %v3691_v3, %v2715_v6  ;;  %v2723_v12 = vld [vmem:[%s5744_s1 + $0x18] sm:$0xf0]  ;;  %v2722_v15 = vor.u32 %v3694_v8, %v2721_v7  ;;  %v2963_v3 = vld [vmem:[%s5744_s1 + $0xf0] sm:$0xf0]  ;;  %v3752_v8 = vld [vmem:[%s5744_s1 + $0xec] sm:$0xf] }
  0x33   :  { %v2726_v18 = vor.u32 %v3692_v11, %v2723_v12  ;;  %v2966_v6 = vor.u32 %v3751_v1, %v2963_v3  ;;  %v2945_v11 = vld [vmem:[%s5744_s1 + $0xc0] sm:$0xf]  ;;  %v3749_v12 = vld [vmem:[%s5744_s1 + $0xcc] sm:$0xf0] }
  0x34   :  { %v3733_v3 = vld [vmem:[%s5744_s1 + $0x4c] sm:$0xf0] }
  0x35   :  { %563 = vmatpush.bf16.msrb.mxu2 %v2786_v13  ;;  %538 = vmatpush.bf16.msrb.mxu0 %v2762_v22 }
  0x36   :  { %551 = vmatpush.bf16.msrb.mxu1 %v2766_v27  ;;  %577 = vmatpush.bf16.msrb.mxu3 %v2774_v33 }
  0x39   :  { %564 = vmatpush.bf16.msrb.mxu2 %v2770_v28  ;;  %539 = vmatpush.bf16.msrb.mxu0 %v2746_v40 }
  0x3a   :  { %552 = vmatpush.bf16.msrb.mxu1 %v2750_v44  ;;  %578 = vmatpush.bf16.msrb.mxu3 %v2758_v51 }
  0x3d   :  { %565 = vmatpush.bf16.msrb.mxu2 %v2754_v47  ;;  %540 = vmatpush.bf16.msrb.mxu0 %v2730_v52 }
  0x3e   :  { %553 = vmatpush.bf16.msrb.mxu1 %v2734_v57  ;;  %579 = vmatpush.bf16.msrb.mxu3 %v2742_v0  ;;  %v3753_v0 = vld [vmem:[%s5744_s1 + $0xec] sm:$0xf0] }
  0x41   :  { %566 = vmatpush.bf16.msrb.mxu2 %v2738_v63  ;;  %541 = vmatpush.bf16.msrb.mxu0 %v2714_v5  ;;  %v2961_v63 = vld [vmem:[%s5744_s1 + $0xe0] sm:$0xf]  ;;  %v3754_v5 = vld [vmem:[%s5744_s1 + $0xf4] sm:$0xf0] }
  0x42   :  { %554 = vmatpush.bf16.msrb.mxu1 %v2718_v10  ;;  %580 = vmatpush.bf16.msrb.mxu3 %v2726_v18  ;;  %v2962_v2 = vor.u32 %v3753_v0, %v2961_v63 }
  0x45   :  { %567 = vmatpush.bf16.msrb.mxu2 %v2722_v15  ;;  %853 = vmatpush.bf16.msra.mxu0 %v2962_v2  ;;  %v2947_v15 = vld [vmem:[%s5744_s1 + $0xd0] sm:$0xf0]  ;;  %v2881_v2 = vld [vmem:[%s5744_s1 + $0x40] sm:$0xf] }
  0x46   :  { %866 = vmatpush.bf16.msra.mxu1 %v2966_v6 }
  0xa0   :  { %v225_v26 = vpop.f32.mrf.mxu0 }
  0xa1   :  { %v268_v31 = vadd.f32 %v225_v26, %v19_v16  ;;  %v238_v32 = vpop.f32.mrf.mxu1 }
  0xa2   :  { %v269_v34 = vadd.f32 %v238_v32, %v20_v17 }
  0xa3   :  { %v2704_v38 = vmul.f32 -1.442695, %v268_v31 }
  0xa4   :  { %v2705_v43 = vmul.f32 -1.442695, %v269_v34 }
  0xa5   :  { %3916 = vpow2.f32 %v2704_v38 }
  0xa6   :  { %3918 = vpow2.f32 %v2705_v43 }
  0xa7   :  { %v264_v56 = vpop.f32.mrf.mxu3 }
  0xa8   :  { %v271_v61 = vadd.f32 %v264_v56, %v22_v39  ;;  %v227_v62 = vpop.f32.mrf.mxu0 }
  0xa9   :  { %v240_v4 = vpop.f32.mrf.mxu1 }
  0xaa   :  { %v2706_v9 = vmul.f32 -1.442695, %v271_v61  ;;  %v2969_v4 = vld [vmem:[%s5744_s1 + $0xe8] sm:$0xf] }
  0xab   :  { %v3917_v13 = vpop.eup %3916  ;;  %v251_v14 = vpop.f32.mrf.mxu2  ;;  %v2970_v7 = vor.u32 %v3754_v5, %v2969_v4  ;;  %v3731_v4 = vld [vmem:[%s5744_s1 + $0x44] sm:$0xf] }
  0xac   :  { %v3919_v16 = vpop.eup %3918  ;;  %v275_v17 = vadd.f32 1.0, %v3917_v13  ;;  %3920 = vpow2.f32 %v2706_v9  ;;  %v270_v23 = vadd.f32 %v251_v14, %v21_v20  ;;  %v2971_v9 = vld [vmem:[%s5744_s1 + $0xf8] sm:$0xf0]  ;;  %v3747_v13 = vld [vmem:[%s5744_s1 + $0xc4] sm:$0xf]  ;;  %v2946_v14 = vor.u32 %v3749_v12, %v2945_v11 }
  0xad   :  { %v294_v19 = vadd.f32 1.0, %v3919_v16  ;;  %v2974_v10 = vor.u32 %v3752_v8, %v2971_v9  ;;  %879 = vmatpush.bf16.msra.mxu2 %v2970_v7  ;;  %v2953_v16 = vld [vmem:[%s5744_s1 + $0xc8] sm:$0xf]  ;;  %v2950_v18 = vor.u32 %v3747_v13, %v2947_v15  ;;  %v3748_v20 = vld [vmem:[%s5744_s1 + $0xcc] sm:$0xf]  ;;  %v2710_v7 = vld [vmem:[%s5745_s0 + $0x38] sm:$0xff]  ;;  %v2882_v8 = vor.u32 %v3733_v3, %v2881_v2 }
  0xae   :  { %3922 = vrcp.f32 %v275_v17  ;;  %v287_v32 = vand.u32 2147483648, %v275_v17  ;;  %v285_v35 = vand.u32 2147483647, %v275_v17  ;;  %vm281_vm2 = vweird.f32 %v275_v17  ;;  %854 = vmatpush.bf16.msra.mxu0 %v2946_v14  ;;  %v2883_v9 = vld [vmem:[%s5744_s1 + $0x50] sm:$0xf0] }
  0xaf   :  { %3924 = vrcp.f32 %v294_v19  ;;  %v266_v21 = vpop.f32.mrf.mxu3  ;;  %v306_v33 = vand.u32 2147483648, %v294_v19  ;;  %v304_v37 = vand.u32 2147483647, %v294_v19  ;;  %vm300_vm3 = vweird.f32 %v294_v19  ;;  %892 = vmatpush.bf16.msra.mxu3 %v2974_v10  ;;  %867 = vmatpush.bf16.msra.mxu1 %v2950_v18  ;;  %v2889_v11 = vld [vmem:[%s5744_s1 + $0x48] sm:$0xf] }
  0xb0   :  { %v288_v42 = vor.u32 1.1754944e-38, %v287_v32  ;;  %vm286_vm5 = vcmp.eq.f32.partialorder %v285_v35, 8.507059e+37  ;;  %v2955_v21 = vld [vmem:[%s5744_s1 + $0xd8] sm:$0xf0]  ;;  %v3744_v32 = vld [vmem:[%s5744_s1 + $0xac] sm:$0xf]  ;;  %v2886_v10 = vor.u32 %v3731_v4, %v2883_v9 }
  0xb1   :  { %v307_v44 = vor.u32 1.1754944e-38, %v306_v33  ;;  %vm305_vm7 = vcmp.eq.f32.partialorder %v304_v37, 8.507059e+37  ;;  %v2939_v33 = vld [vmem:[%s5744_s1 + $0xb8] sm:$0xf0]  ;;  %v2913_v35 = vld [vmem:[%s5744_s1 + $0x80] sm:$0xf] }
  0xb2   :  { %v3921_v22 = vpop.eup %3920  ;;  %v3739_v37 = vld [vmem:[%s5744_s1 + $0x84] sm:$0xf]  ;;  %v3734_v12 = vld [vmem:[%s5744_s1 + $0x54] sm:$0xf0]  ;;  %v3732_v13 = vld [vmem:[%s5744_s1 + $0x4c] sm:$0xf] }
  0xb3   :  { %v314_v24 = vadd.f32 1.0, %v3921_v22  ;;  %v253_v25 = vpop.f32.mrf.mxu2  ;;  %v2958_v22 = vor.u32 %v3748_v20, %v2955_v21  ;;  %v2890_v14 = vor.u32 %v3734_v12, %v2889_v11  ;;  %v2891_v15 = vld [vmem:[%s5744_s1 + $0x58] sm:$0xf0]  ;;  %v3727_v20 = vld [vmem:[%s5744_s1 + $0x24] sm:$0xf] }
  0xb4   :  { %v3923_v26 = vpop.eup %3922  ;;  %v3743_v25 = vld [vmem:[%s5744_s1 + $0xa4] sm:$0xf]  ;;  %v2894_v18 = vor.u32 %v3732_v13, %v2891_v15  ;;  %v2867_v21 = vld [vmem:[%s5744_s1 + $0x30] sm:$0xf0] }
  0xb5   :  { %v3925_v27 = vpop.eup %3924  ;;  %v277_v28 = vmul.f32 %v3923_v26, %v275_v17  ;;  %3926 = vrcp.f32 %v314_v24  ;;  %vm282_vm0 = vweird.f32 %v3923_v26  ;;  %v326_v55 = vand.u32 2147483648, %v314_v24  ;;  %v3750_v17 = vld [vmem:[%s5744_s1 + $0xd4] sm:$0xf0]  ;;  %893 = vmatpush.bf16.msra.mxu3 %v2958_v22  ;;  %v2873_v22 = vld [vmem:[%s5744_s1 + $0x28] sm:$0xf] }
  0xb6   :  { %v296_v29 = vmul.f32 %v3925_v27, %v294_v19  ;;  %3928 = vtanh.f32 %v270_v23  ;;  %vm301_vm1 = vweird.f32 %v3925_v27  ;;  %vm283_vm4 = vmor %vm281_vm2, %vm282_vm0  ;;  %vm320_vm9 = vweird.f32 %v314_v24  ;;  %v2929_v23 = vld [vmem:[%s5744_s1 + $0xa0] sm:$0xf] }
  0xb7   :  { %v278_v30 = vsub.f32 1.0, %v277_v28  ;;  %vm302_vm6 = vmor %vm300_vm3, %vm301_vm1  ;;  %v324_v56 = vand.u32 2147483647, %v314_v24  ;;  %v327_v58 = vor.u32 1.1754944e-38, %v326_v55  ;;  %v2954_v19 = vor.u32 %v3750_v17, %v2953_v16  ;;  %v2937_v28 = vld [vmem:[%s5744_s1 + $0xa8] sm:$0xf] }
  0xb8   :  { %v297_v31 = vsub.f32 1.0, %v296_v29  ;;  %v3746_v29 = vld [vmem:[%s5744_s1 + $0xb4] sm:$0xf0]  ;;  %v2905_v55 = vld [vmem:[%s5744_s1 + $0x68] sm:$0xf] }
  0xb9   :  { %v279_v34 = vmul.f32 %v3923_v26, %v278_v30  ;;  %vm325_vm11 = vcmp.eq.f32.partialorder %v324_v56, 8.507059e+37  ;;  %880 = vmatpush.bf16.msra.mxu2 %v2954_v19  ;;  %v3738_v56 = vld [vmem:[%s5744_s1 + $0x74] sm:$0xf0]  ;;  %v2865_v16 = vld [vmem:[%s5744_s1 + $0x20] sm:$0xf] }
  0xba   :  { %v298_v36 = vmul.f32 %v3925_v27, %v297_v31  ;;  %v2938_v31 = vor.u32 %v3746_v29, %v2937_v28  ;;  %v3729_v17 = vld [vmem:[%s5744_s1 + $0x2c] sm:$0xf0]  ;;  %v2875_v28 = vld [vmem:[%s5744_s1 + $0x38] sm:$0xf0] }
  0xbb   :  { %v3927_v38 = vpop.eup %3926  ;;  %v280_v39 = vadd.f32 %v3923_v26, %v279_v34  ;;  %v2942_v34 = vor.u32 %v3744_v32, %v2939_v33  ;;  %v2866_v19 = vor.u32 %v3729_v17, %v2865_v16 }
  0xbc   :  { %v3929_v40 = vpop.eup %3928  ;;  %v316_v41 = vmul.f32 %v3927_v38, %v314_v24  ;;  %v299_v43 = vadd.f32 %v3925_v27, %v298_v36  ;;  %vm321_vm8 = vweird.f32 %v3927_v38  ;;  %v3745_v24 = vld [vmem:[%s5744_s1 + $0xac] sm:$0xf0] }
  0xbd   :  { %v284_v45 = vsel %vm283_vm4, %v3923_v26, %v280_v39  ;;  %vm322_vm10 = vmor %vm320_vm9, %vm321_vm8  ;;  %v2930_v26 = vor.u32 %v3745_v24, %v2929_v23  ;;  %881 = vmatpush.bf16.msra.mxu2 %v2938_v31  ;;  %v3741_v36 = vld [vmem:[%s5744_s1 + $0x8c] sm:$0xf0]  ;;  %894 = vmatpush.bf16.msra.mxu3 %v2942_v34  ;;  %v2915_v39 = vld [vmem:[%s5744_s1 + $0x90] sm:$0xf0] }
  0xbe   :  { %v317_v46 = vsub.f32 1.0, %v316_v41  ;;  %v289_v47 = vsel %vm286_vm5, %v288_v42, %v284_v45  ;;  %v303_v48 = vsel %vm302_vm6, %v3925_v27, %v299_v43  ;;  %v2931_v27 = vld [vmem:[%s5744_s1 + $0xb0] sm:$0xf0]  ;;  %v3742_v41 = vld [vmem:[%s5744_s1 + $0x94] sm:$0xf0]  ;;  %v2918_v42 = vor.u32 %v3739_v37, %v2915_v39 }
  0xbf   :  { %v308_v49 = vsel %vm305_vm7, %v307_v44, %v303_v48  ;;  %v331_v50 = vmul.f32 %v3929_v40, %v289_v47  ;;  %v2934_v30 = vor.u32 %v3743_v25, %v2931_v27  ;;  %855 = vmatpush.bf16.msra.mxu0 %v2930_v26  ;;  %v2921_v40 = vld [vmem:[%s5744_s1 + $0x88] sm:$0xf]  ;;  %v3740_v44 = vld [vmem:[%s5744_s1 + $0x8c] sm:$0xf]  ;;  %v2923_v45 = vld [vmem:[%s5744_s1 + $0x98] sm:$0xf0]  ;;  %v2870_v25 = vor.u32 %v3727_v20, %v2867_v21 }
  0xc0   :  { %v318_v51 = vmul.f32 %v3927_v38, %v317_v46  ;;  %v330_v52 = vmul.f32 0.0, %v308_v49  ;;  %v2922_v43 = vor.u32 %v3742_v41, %v2921_v40  ;;  %v2707_v46 = vld [vmem:[%s5745_s0 + $0x20] sm:$0xff]  ;;  %v2708_v47 = vld [vmem:[%s5745_s0 + $0x28] sm:$0xff]  ;;  %v2926_v48 = vor.u32 %v3740_v44, %v2923_v45  ;;  %v3730_v26 = vld [vmem:[%s5744_s1 + $0x34] sm:$0xf0] }
  0xc1   :  { %868 = vmatpush.bf16.msra.mxu1 %v2934_v30  ;;  %v2897_v49 = vld [vmem:[%s5744_s1 + $0x60] sm:$0xf]  ;;  %v3728_v27 = vld [vmem:[%s5744_s1 + $0x2c] sm:$0xf]  ;;  %v2874_v32 = vor.u32 %v3730_v26, %v2873_v22  ;;  %v2857_v39 = vld [vmem:[%s5744_s1 + $0x8] sm:$0xf] }
  0xc2   :  { %v4456_v53 = vadd.f32 %v331_v50, %v330_v52  ;;  %v319_v54 = vadd.f32 %v3927_v38, %v318_v51  ;;  %882 = vmatpush.bf16.msra.mxu2 %v2922_v43  ;;  %v3737_v50 = vld [vmem:[%s5744_s1 + $0x6c] sm:$0xf0]  ;;  %v3735_v51 = vld [vmem:[%s5744_s1 + $0x64] sm:$0xf]  ;;  %895 = vmatpush.bf16.msra.mxu3 %v2926_v48  ;;  %v2878_v33 = vor.u32 %v3728_v27, %v2875_v28  ;;  %v2849_v34 = vld [vmem:[%s5744_s1] sm:$0xf] }
  0xc3   :  { %v2898_v52 = vor.u32 %v3737_v50, %v2897_v49  ;;  %v3726_v40 = vld [vmem:[%s5744_s1 + $0x14] sm:$0xf0]  ;;  %v3724_v43 = vld [vmem:[%s5744_s1 + $0xc] sm:$0xf]  ;;  %v2859_v44 = vld [vmem:[%s5744_s1 + $0x18] sm:$0xf0] }
  0xc4   :  { %3930 = vtanh.f32 %v4456_v53  ;;  %v323_v57 = vsel %vm322_vm10, %v3927_v38, %v319_v54  ;;  %v2914_v38 = vor.u32 %v3741_v36, %v2913_v35  ;;  %v2899_v54 = vld [vmem:[%s5744_s1 + $0x70] sm:$0xf0]  ;;  %v3725_v35 = vld [vmem:[%s5744_s1 + $0xc] sm:$0xf0]  ;;  %v3723_v36 = vld [vmem:[%s5744_s1 + $0x4] sm:$0xf]  ;;  %v2862_v49 = vor.u32 %v3724_v43, %v2859_v44 }
  0xc5   :  { %v328_v60 = vsel %vm325_vm11, %v327_v58, %v323_v57  ;;  %869 = vmatpush.bf16.msra.mxu1 %v2918_v42  ;;  %v2850_v37 = vor.u32 %v3725_v35, %v2849_v34  ;;  %v3099_v34 = vld [vmem:[%s5744_s1 + $0xf0] sm:$0xf0]  ;;  %v3105_v35 = vld [vmem:[%s5744_s1 + $0xe8] sm:$0xf]  ;;  %v3781_v43 = vld [vmem:[%s5744_s1 + $0xcc] sm:$0xf0] }
  0xc6   :  { %856 = vmatpush.bf16.msra.mxu0 %v2914_v38  ;;  %v2851_v38 = vld [vmem:[%s5744_s1 + $0x10] sm:$0xf0]  ;;  %v3779_v44 = vld [vmem:[%s5744_s1 + $0xc4] sm:$0xf] }
  0xc7   :  { %v2854_v42 = vor.u32 %v3723_v36, %v2851_v38  ;;  %v3786_v36 = vld [vmem:[%s5744_s1 + $0xf4] sm:$0xf0] }
  0xc8   :  { %v3106_v38 = vor.u32 %v3786_v36, %v3105_v35  ;;  %v3763_v35 = vld [vmem:[%s5744_s1 + $0x44] sm:$0xf] }
  0xca   :  { %v3931_v59 = vpop.eup %3930  ;;  %857 = vmatpush.bf16.msra.mxu0 %v2898_v52 }
  0xcb   :  { %v334_v61 = vmul.f32 %v3931_v59, %v328_v60  ;;  %v2902_v59 = vor.u32 %v3735_v51, %v2899_v54  ;;  %v2906_v60 = vor.u32 %v3738_v56, %v2905_v55  ;;  %v2709_v54 = vld [vmem:[%s5745_s0 + $0x30] sm:$0xff] }
  0xcd   :  { %v335_v62 = vpack.c.bf16 %v334_v61, %v334_v61  ;;  %v3736_v61 = vld [vmem:[%s5744_s1 + $0x6c] sm:$0xf]  ;;  %870 = vmatpush.bf16.msra.mxu1 %v2902_v59  ;;  %883 = vmatpush.bf16.msra.mxu2 %v2906_v60 }
  0xce   :  { %858 = vmatpush.bf16.msra.mxu0 %v2882_v8 }
  0xcf   :  { %336 = vst [vmem:[%s5746_s2] sm:$0xf] %v335_v62  ;;  %542 = vmatmul.bf16.vlgmr.msrb.gmra.mxu0 %v335_v62  ;;  %555 = vmatmul.bf16.vlgmr.msrb.gmra.mxu1 %v335_v62 }
  0xd0   :  { %568 = vmatmul.bf16.vlgmr.msrb.gmra.mxu2 %v335_v62  ;;  %581 = vmatmul.bf16.vlgmr.msrb.gmra.mxu3 %v335_v62  ;;  %v2907_v62 = vld [vmem:[%s5744_s1 + $0x78] sm:$0xf0] }
  0xd1   :  { %v2910_v1 = vor.u32 %v3736_v61, %v2907_v62  ;;  %871 = vmatpush.bf16.msra.mxu1 %v2886_v10  ;;  %884 = vmatpush.bf16.msra.mxu2 %v2890_v14 }
  0xd2   :  { %859 = vmatpush.bf16.msra.mxu0 %v2866_v19 }
  0xd3   :  { %896 = vmatpush.bf16.msra.mxu3 %v2910_v1 }
  0xd5   :  { %872 = vmatpush.bf16.msra.mxu1 %v2870_v25  ;;  %885 = vmatpush.bf16.msra.mxu2 %v2874_v32  ;;  %v3783_v32 = vld [vmem:[%s5744_s1 + $0xe4] sm:$0xf] }
  0xd6   :  { %860 = vmatpush.bf16.msra.mxu0 %v2850_v37  ;;  %v3102_v37 = vor.u32 %v3783_v32, %v3099_v34  ;;  %v3765_v34 = vld [vmem:[%s5744_s1 + $0x4c] sm:$0xf0] }
  0xd7   :  { %897 = vmatpush.bf16.msra.mxu3 %v2894_v18 }
  0xd9   :  { %873 = vmatpush.bf16.msra.mxu1 %v2854_v42  ;;  %v3081_v42 = vld [vmem:[%s5744_s1 + $0xc0] sm:$0xf] }
  0xdb   :  { %898 = vmatpush.bf16.msra.mxu3 %v2878_v33 }
  0xdd   :  { %1185 = vmatpush.bf16.msrb.mxu1 %v3102_v37 }
  0xdf   :  { %899 = vmatpush.bf16.msra.mxu3 %v2862_v49 }
 0x14c   :  { %v543_v57 = vpop.f32.mrf.mxu0  ;;  %v556_v58 = vpop.f32.mrf.mxu1 }
 0x14d   :  { %v586_v63 = vadd.f32 %v2707_v46, %v543_v57  ;;  %v587_v0 = vadd.f32 %v2708_v47, %v556_v58  ;;  %v2858_v46 = vor.u32 %v3726_v40, %v2857_v39  ;;  %v3784_v39 = vld [vmem:[%s5744_s1 + $0xec] sm:$0xf]  ;;  %v3107_v40 = vld [vmem:[%s5744_s1 + $0xf8] sm:$0xf0] }
 0x14f   :  { %v2839_v5 = vmul.f32 -1.442695, %v586_v63  ;;  %v2840_v6 = vmul.f32 -1.442695, %v587_v0  ;;  %886 = vmatpush.bf16.msra.mxu2 %v2858_v46  ;;  %v3083_v46 = vld [vmem:[%s5744_s1 + $0xd0] sm:$0xf0] }
 0x150   :  { %v3086_v49 = vor.u32 %v3779_v44, %v3083_v46  ;;  %v3764_v44 = vld [vmem:[%s5744_s1 + $0x4c] sm:$0xf]  ;;  %v3027_v46 = vld [vmem:[%s5744_s1 + $0x58] sm:$0xf0] }
 0x151   :  { %3932 = vpow2.f32 %v2839_v5 }
 0x152   :  { %3934 = vpow2.f32 %v2840_v6  ;;  %1186 = vmatpush.bf16.msrb.mxu1 %v3086_v49  ;;  %v3030_v49 = vor.u32 %v3764_v44, %v3027_v46 }
 0x153   :  { %v569_v23 = vpop.f32.mrf.mxu2  ;;  %v582_v24 = vpop.f32.mrf.mxu3  ;;  %1198 = vmatpush.bf16.msrb.mxu2 %v3106_v38  ;;  %v2846_v38 = vld [vmem:[%s5745_s0 + $0x58] sm:$0xff] }
 0x154   :  { %v589_v29 = vadd.f32 %v2710_v7, %v582_v24  ;;  %v545_v30 = vpop.f32.mrf.mxu0  ;;  %v558_v31 = vpop.f32.mrf.mxu1  ;;  %v588_v58 = vadd.f32 %v2709_v54, %v569_v23 }
 0x155   :  { %v3785_v31 = vld [vmem:[%s5744_s1 + $0xec] sm:$0xf0] }
 0x156   :  { %v2841_v41 = vmul.f32 -1.442695, %v589_v29 }
 0x157   :  { %v3933_v45 = vpop.eup %3932 }
 0x158   :  { %v3935_v47 = vpop.eup %3934  ;;  %v593_v48 = vadd.f32 1.0, %v3933_v45  ;;  %3936 = vpow2.f32 %v2841_v41  ;;  %v3110_v41 = vor.u32 %v3784_v39, %v3107_v40  ;;  %v3082_v45 = vor.u32 %v3781_v43, %v3081_v42  ;;  %v3019_v40 = vld [vmem:[%s5744_s1 + $0x50] sm:$0xf0]  ;;  %v3025_v42 = vld [vmem:[%s5744_s1 + $0x48] sm:$0xf] }
 0x159   :  { %v612_v50 = vadd.f32 1.0, %v3935_v47  ;;  %v3089_v47 = vld [vmem:[%s5744_s1 + $0xc8] sm:$0xf]  ;;  %v3766_v43 = vld [vmem:[%s5744_s1 + $0x54] sm:$0xf0] }
 0x15a   :  { %3938 = vrcp.f32 %v593_v48  ;;  %v605_v0 = vand.u32 2147483648, %v593_v48  ;;  %v603_v3 = vand.u32 2147483647, %v593_v48  ;;  %vm599_vm14 = vweird.f32 %v593_v48  ;;  %1211 = vmatpush.bf16.msrb.mxu3 %v3110_v41 }
 0x15b   :  { %3940 = vrcp.f32 %v612_v50  ;;  %v571_v51 = vpop.f32.mrf.mxu2  ;;  %v584_v52 = vpop.f32.mrf.mxu3  ;;  %v624_v1 = vand.u32 2147483648, %v612_v50  ;;  %v622_v5 = vand.u32 2147483647, %v612_v50  ;;  %vm618_vm15 = vweird.f32 %v612_v50 }
 0x15c   :  { %v606_v8 = vor.u32 1.1754944e-38, %v605_v0  ;;  %vm604_vm2 = vcmp.eq.f32.partialorder %v603_v3, 8.507059e+37  ;;  %v3780_v51 = vld [vmem:[%s5744_s1 + $0xcc] sm:$0xf]  ;;  %v3091_v52 = vld [vmem:[%s5744_s1 + $0xd8] sm:$0xf0]  ;;  %v3022_v41 = vor.u32 %v3763_v35, %v3019_v40 }
 0x15d   :  { %v625_v11 = vor.u32 1.1754944e-38, %v624_v1  ;;  %vm623_vm3 = vcmp.eq.f32.partialorder %v622_v5, 8.507059e+37  ;;  %v3094_v54 = vor.u32 %v3780_v51, %v3091_v52  ;;  %v3776_v0 = vld [vmem:[%s5744_s1 + $0xac] sm:$0xf]  ;;  %v3075_v1 = vld [vmem:[%s5744_s1 + $0xb8] sm:$0xf0] }
 0x15e   :  { %v3937_v55 = vpop.eup %3936  ;;  %v3049_v3 = vld [vmem:[%s5744_s1 + $0x80] sm:$0xf]  ;;  %v3771_v5 = vld [vmem:[%s5744_s1 + $0x84] sm:$0xf]  ;;  %v3003_v52 = vld [vmem:[%s5744_s1 + $0x30] sm:$0xf0] }
 0x15f   :  { %v632_v56 = vadd.f32 1.0, %v3937_v55  ;;  %v3065_v55 = vld [vmem:[%s5744_s1 + $0xa0] sm:$0xf]  ;;  %1212 = vmatpush.bf16.msrb.mxu3 %v3094_v54  ;;  %v3759_v51 = vld [vmem:[%s5744_s1 + $0x24] sm:$0xf] }
 0x160   :  { %v3939_v57 = vpop.eup %3938  ;;  %v3009_v54 = vld [vmem:[%s5744_s1 + $0x28] sm:$0xf] }
 0x161   :  { %v3941_v59 = vpop.eup %3940  ;;  %v595_v60 = vmul.f32 %v3939_v57, %v593_v48  ;;  %3942 = vrcp.f32 %v632_v56  ;;  %vm600_vm12 = vweird.f32 %v3939_v57  ;;  %v644_v23 = vand.u32 2147483648, %v632_v56  ;;  %v3782_v48 = vld [vmem:[%s5744_s1 + $0xd4] sm:$0xf0] }
 0x162   :  { %v614_v61 = vmul.f32 %v3941_v59, %v612_v50  ;;  %3944 = vtanh.f32 %v588_v58  ;;  %vm619_vm13 = vweird.f32 %v3941_v59  ;;  %vm601_vm0 = vmor %vm599_vm14, %vm600_vm12  ;;  %vm638_vm5 = vweird.f32 %v632_v56 }
 0x163   :  { %v596_v62 = vsub.f32 1.0, %v595_v60  ;;  %vm620_vm1 = vmor %vm618_vm15, %vm619_vm13  ;;  %v642_v24 = vand.u32 2147483647, %v632_v56  ;;  %v645_v26 = vor.u32 1.1754944e-38, %v644_v23  ;;  %v3090_v50 = vor.u32 %v3782_v48, %v3089_v47  ;;  %v3073_v60 = vld [vmem:[%s5744_s1 + $0xa8] sm:$0xf] }
 0x164   :  { %v615_v63 = vsub.f32 1.0, %v614_v61  ;;  %v3778_v61 = vld [vmem:[%s5744_s1 + $0xb4] sm:$0xf0]  ;;  %v3041_v23 = vld [vmem:[%s5744_s1 + $0x68] sm:$0xf] }
 0x165   :  { %v597_v2 = vmul.f32 %v3939_v57, %v596_v62  ;;  %vm643_vm7 = vcmp.eq.f32.partialorder %v642_v24, 8.507059e+37  ;;  %1199 = vmatpush.bf16.msrb.mxu2 %v3090_v50  ;;  %v3770_v24 = vld [vmem:[%s5744_s1 + $0x74] sm:$0xf0]  ;;  %v3001_v47 = vld [vmem:[%s5744_s1 + $0x20] sm:$0xf] }
 0x166   :  { %v616_v4 = vmul.f32 %v3941_v59, %v615_v63  ;;  %v3074_v63 = vor.u32 %v3778_v61, %v3073_v60  ;;  %v3761_v48 = vld [vmem:[%s5744_s1 + $0x2c] sm:$0xf0]  ;;  %v3011_v60 = vld [vmem:[%s5744_s1 + $0x38] sm:$0xf0] }
 0x167   :  { %v3943_v6 = vpop.eup %3942  ;;  %v598_v7 = vadd.f32 %v3939_v57, %v597_v2  ;;  %v3078_v2 = vor.u32 %v3776_v0, %v3075_v1  ;;  %v3002_v50 = vor.u32 %v3761_v48, %v3001_v47 }
 0x168   :  { %v617_v9 = vadd.f32 %v3941_v59, %v616_v4  ;;  %v634_v10 = vmul.f32 %v3943_v6, %v632_v56  ;;  %v3945_v13 = vpop.eup %3944  ;;  %vm639_vm4 = vweird.f32 %v3943_v6  ;;  %v3777_v56 = vld [vmem:[%s5744_s1 + $0xac] sm:$0xf0] }
 0x169   :  { %v602_v12 = vsel %vm601_vm0, %v3939_v57, %v598_v7  ;;  %vm640_vm6 = vmor %vm638_vm5, %vm639_vm4  ;;  %v3775_v57 = vld [vmem:[%s5744_s1 + $0xa4] sm:$0xf]  ;;  %v3066_v58 = vor.u32 %v3777_v56, %v3065_v55  ;;  %1200 = vmatpush.bf16.msrb.mxu2 %v3074_v63  ;;  %v3773_v4 = vld [vmem:[%s5744_s1 + $0x8c] sm:$0xf0]  ;;  %1213 = vmatpush.bf16.msrb.mxu3 %v3078_v2 }
 0x16a   :  { %v607_v14 = vsel %vm604_vm2, %v606_v8, %v602_v12  ;;  %v621_v15 = vsel %vm620_vm1, %v3941_v59, %v617_v9  ;;  %v635_v16 = vsub.f32 1.0, %v634_v10  ;;  %v3067_v59 = vld [vmem:[%s5744_s1 + $0xb0] sm:$0xf0]  ;;  %v3057_v8 = vld [vmem:[%s5744_s1 + $0x88] sm:$0xf] }
 0x16b   :  { %v626_v17 = vsel %vm623_vm3, %v625_v11, %v621_v15  ;;  %v649_v18 = vmul.f32 %v3945_v13, %v607_v14  ;;  %v3070_v62 = vor.u32 %v3775_v57, %v3067_v59  ;;  %v3051_v7 = vld [vmem:[%s5744_s1 + $0x90] sm:$0xf0]  ;;  %v3774_v9 = vld [vmem:[%s5744_s1 + $0x94] sm:$0xf0]  ;;  %v3772_v12 = vld [vmem:[%s5744_s1 + $0x8c] sm:$0xf]  ;;  %v3006_v57 = vor.u32 %v3759_v51, %v3003_v52 }
 0x16c   :  { %v648_v19 = vmul.f32 %v626_v17, %v4456_v53  ;;  %v636_v20 = vmul.f32 %v3943_v6, %v635_v16  ;;  %v3097_v53 = vld [vmem:[%s5744_s1 + $0xe0] sm:$0xf]  ;;  %v3054_v10 = vor.u32 %v3771_v5, %v3051_v7  ;;  %v3058_v11 = vor.u32 %v3774_v9, %v3057_v8  ;;  %v3059_v13 = vld [vmem:[%s5744_s1 + $0x98] sm:$0xf0]  ;;  %v2844_v15 = vld [vmem:[%s5745_s0 + $0x48] sm:$0xff] }
 0x16d   :  { %v3098_v33 = vor.u32 %v3785_v31, %v3097_v53  ;;  %1187 = vmatpush.bf16.msrb.mxu1 %v3070_v62  ;;  %v2843_v14 = vld [vmem:[%s5745_s0 + $0x40] sm:$0xff]  ;;  %v3062_v16 = vor.u32 %v3772_v12, %v3059_v13  ;;  %v3760_v59 = vld [vmem:[%s5744_s1 + $0x2c] sm:$0xf]  ;;  %v2993_v7 = vld [vmem:[%s5744_s1 + $0x8] sm:$0xf] }
 0x16e   :  { %v4667_v21 = vadd.f32 %v649_v18, %v648_v19  ;;  %v637_v22 = vadd.f32 %v3943_v6, %v636_v20  ;;  %1201 = vmatpush.bf16.msrb.mxu2 %v3058_v11  ;;  %v3033_v17 = vld [vmem:[%s5744_s1 + $0x60] sm:$0xf]  ;;  %v3769_v18 = vld [vmem:[%s5744_s1 + $0x6c] sm:$0xf0]  ;;  %v3767_v19 = vld [vmem:[%s5744_s1 + $0x64] sm:$0xf]  ;;  %v3014_v1 = vor.u32 %v3760_v59, %v3011_v60 }
 0x16f   :  { %1172 = vmatpush.bf16.msrb.mxu0 %v3098_v33  ;;  %1214 = vmatpush.bf16.msrb.mxu3 %v3062_v16  ;;  %v3034_v20 = vor.u32 %v3769_v18, %v3033_v17  ;;  %v3017_v33 = vld [vmem:[%s5744_s1 + $0x40] sm:$0xf]  ;;  %v3758_v8 = vld [vmem:[%s5744_s1 + $0x14] sm:$0xf0]  ;;  %v3756_v11 = vld [vmem:[%s5744_s1 + $0xc] sm:$0xf] }
 0x170   :  { %3946 = vtanh.f32 %v4667_v21  ;;  %v641_v25 = vsel %vm640_vm6, %v3943_v6, %v637_v22  ;;  %v3050_v6 = vor.u32 %v3773_v4, %v3049_v3  ;;  %v3035_v22 = vld [vmem:[%s5744_s1 + $0x70] sm:$0xf0]  ;;  %v3018_v39 = vor.u32 %v3765_v34, %v3017_v33  ;;  %v2985_v2 = vld [vmem:[%s5744_s1] sm:$0xf]  ;;  %v3757_v3 = vld [vmem:[%s5744_s1 + $0xc] sm:$0xf0] }
 0x171   :  { %v646_v28 = vsel %vm643_vm7, %v645_v26, %v641_v25  ;;  %1188 = vmatpush.bf16.msrb.mxu1 %v3054_v10  ;;  %v3755_v4 = vld [vmem:[%s5744_s1 + $0x4] sm:$0xf]  ;;  %v2986_v5 = vor.u32 %v3757_v3, %v2985_v2  ;;  %v2995_v12 = vld [vmem:[%s5744_s1 + $0x18] sm:$0xf0]  ;;  %v3235_v2 = vld [vmem:[%s5744_s1 + $0xf0] sm:$0xf0] }
 0x172   :  { %v2998_v17 = vor.u32 %v3756_v11, %v2995_v12  ;;  %v3241_v3 = vld [vmem:[%s5744_s1 + $0xe8] sm:$0xf]  ;;  %v3813_v11 = vld [vmem:[%s5744_s1 + $0xcc] sm:$0xf0]  ;;  %v3811_v12 = vld [vmem:[%s5744_s1 + $0xc4] sm:$0xf] }
 0x173   :  { %1173 = vmatpush.bf16.msrb.mxu0 %v3082_v45  ;;  %v3026_v45 = vor.u32 %v3766_v43, %v3025_v42 }
 0x176   :  { %v3947_v27 = vpop.eup %3946 }
 0x177   :  { %v652_v29 = vmul.f32 %v3947_v27, %v646_v28  ;;  %1174 = vmatpush.bf16.msrb.mxu0 %v3066_v58  ;;  %v3038_v27 = vor.u32 %v3767_v19, %v3035_v22  ;;  %v3042_v28 = vor.u32 %v3770_v24, %v3041_v23  ;;  %v3762_v58 = vld [vmem:[%s5744_s1 + $0x34] sm:$0xf0]  ;;  %v2845_v22 = vld [vmem:[%s5745_s0 + $0x50] sm:$0xff] }
 0x178   :  { %v3010_v0 = vor.u32 %v3762_v58, %v3009_v54 }
 0x179   :  { %v653_v30 = vpack.c.bf16 %v652_v29, %v652_v29  ;;  %v3768_v29 = vld [vmem:[%s5744_s1 + $0x6c] sm:$0xf]  ;;  %1189 = vmatpush.bf16.msrb.mxu1 %v3038_v27  ;;  %1202 = vmatpush.bf16.msrb.mxu2 %v3042_v28 }
 0x17b   :  { %2842 = vst [vmem:[%s5746_s2 + $0x4] sm:$0xf] %v653_v30  ;;  %861 = vmatmul.bf16.vlgmr.msra.gmra.mxu0 %v653_v30  ;;  %874 = vmatmul.bf16.vlgmr.msra.gmra.mxu1 %v653_v30 }
 0x17c   :  { %887 = vmatmul.bf16.vlgmr.msra.gmra.mxu2 %v653_v30  ;;  %900 = vmatmul.bf16.vlgmr.msra.gmra.mxu3 %v653_v30  ;;  %v3043_v30 = vld [vmem:[%s5744_s1 + $0x78] sm:$0xf0] }
 0x17d   :  { %1175 = vmatpush.bf16.msrb.mxu0 %v3050_v6  ;;  %v3046_v32 = vor.u32 %v3768_v29, %v3043_v30  ;;  %1190 = vmatpush.bf16.msrb.mxu1 %v3022_v41  ;;  %v2987_v6 = vld [vmem:[%s5744_s1 + $0x10] sm:$0xf0] }
 0x17e   :  { %1203 = vmatpush.bf16.msrb.mxu2 %v3026_v45  ;;  %v2990_v10 = vor.u32 %v3755_v4, %v2987_v6  ;;  %v3818_v4 = vld [vmem:[%s5744_s1 + $0xf4] sm:$0xf0] }
 0x17f   :  { %1215 = vmatpush.bf16.msrb.mxu3 %v3046_v32  ;;  %v3242_v6 = vor.u32 %v3818_v4, %v3241_v3  ;;  %v3795_v3 = vld [vmem:[%s5744_s1 + $0x44] sm:$0xf] }
 0x181   :  { %1176 = vmatpush.bf16.msrb.mxu0 %v3034_v20  ;;  %1191 = vmatpush.bf16.msrb.mxu1 %v3006_v57 }
 0x182   :  { %1204 = vmatpush.bf16.msrb.mxu2 %v3010_v0  ;;  %v3815_v0 = vld [vmem:[%s5744_s1 + $0xe4] sm:$0xf] }
 0x183   :  { %1216 = vmatpush.bf16.msrb.mxu3 %v3030_v49 }
 0x185   :  { %1177 = vmatpush.bf16.msrb.mxu0 %v3018_v39  ;;  %1192 = vmatpush.bf16.msrb.mxu1 %v2990_v10  ;;  %v3217_v10 = vld [vmem:[%s5744_s1 + $0xc0] sm:$0xf] }
 0x187   :  { %1217 = vmatpush.bf16.msrb.mxu3 %v3014_v1 }
 0x189   :  { %1178 = vmatpush.bf16.msrb.mxu0 %v3002_v50 }
 0x18b   :  { %1218 = vmatpush.bf16.msrb.mxu3 %v2998_v17 }
 0x18d   :  { %1179 = vmatpush.bf16.msrb.mxu0 %v2986_v5  ;;  %v3238_v5 = vor.u32 %v3815_v0, %v3235_v2  ;;  %v3797_v2 = vld [vmem:[%s5744_s1 + $0x4c] sm:$0xf0] }
 0x18f   :  { %1504 = vmatpush.bf16.msra.mxu1 %v3238_v5 }
 0x1f8   :  { %v862_v25 = vpop.f32.mrf.mxu0  ;;  %v875_v26 = vpop.f32.mrf.mxu1 }
 0x1f9   :  { %v905_v53 = vadd.f32 %v2843_v14, %v862_v25  ;;  %v906_v31 = vadd.f32 %v2844_v15, %v875_v26  ;;  %v2994_v14 = vor.u32 %v3758_v8, %v2993_v7  ;;  %v3816_v7 = vld [vmem:[%s5744_s1 + $0xec] sm:$0xf]  ;;  %v3243_v8 = vld [vmem:[%s5744_s1 + $0xf8] sm:$0xf0] }
 0x1fb   :  { %v2975_v36 = vmul.f32 -1.442695, %v905_v53  ;;  %v2976_v37 = vmul.f32 -1.442695, %v906_v31  ;;  %1205 = vmatpush.bf16.msrb.mxu2 %v2994_v14  ;;  %v3219_v14 = vld [vmem:[%s5744_s1 + $0xd0] sm:$0xf0] }
 0x1fc   :  { %v3222_v17 = vor.u32 %v3811_v12, %v3219_v14  ;;  %v3796_v12 = vld [vmem:[%s5744_s1 + $0x4c] sm:$0xf]  ;;  %v3163_v14 = vld [vmem:[%s5744_s1 + $0x58] sm:$0xf0] }
 0x1fd   :  { %3948 = vpow2.f32 %v2975_v36 }
 0x1fe   :  { %3950 = vpow2.f32 %v2976_v37  ;;  %1505 = vmatpush.bf16.msra.mxu1 %v3222_v17  ;;  %v3166_v17 = vor.u32 %v3796_v12, %v3163_v14 }
 0x1ff   :  { %v888_v55 = vpop.f32.mrf.mxu2  ;;  %v901_v56 = vpop.f32.mrf.mxu3  ;;  %1517 = vmatpush.bf16.msra.mxu2 %v3242_v6  ;;  %v2982_v6 = vld [vmem:[%s5745_s0 + $0x78] sm:$0xff] }
 0x200   :  { %v908_v61 = vadd.f32 %v2846_v38, %v901_v56  ;;  %v864_v62 = vpop.f32.mrf.mxu0  ;;  %v877_v63 = vpop.f32.mrf.mxu1  ;;  %v907_v26 = vadd.f32 %v2845_v22, %v888_v55 }
 0x201   :  { %v3817_v63 = vld [vmem:[%s5744_s1 + $0xec] sm:$0xf0] }
 0x202   :  { %v2977_v9 = vmul.f32 -1.442695, %v908_v61 }
 0x203   :  { %v3949_v13 = vpop.eup %3948 }
 0x204   :  { %v3951_v15 = vpop.eup %3950  ;;  %v912_v16 = vadd.f32 1.0, %v3949_v13  ;;  %3952 = vpow2.f32 %v2977_v9  ;;  %v3246_v9 = vor.u32 %v3816_v7, %v3243_v8  ;;  %v3218_v13 = vor.u32 %v3813_v11, %v3217_v10  ;;  %v3155_v8 = vld [vmem:[%s5744_s1 + $0x50] sm:$0xf0]  ;;  %v3161_v10 = vld [vmem:[%s5744_s1 + $0x48] sm:$0xf] }
 0x205   :  { %v931_v18 = vadd.f32 1.0, %v3951_v15  ;;  %v3225_v15 = vld [vmem:[%s5744_s1 + $0xc8] sm:$0xf]  ;;  %v3798_v11 = vld [vmem:[%s5744_s1 + $0x54] sm:$0xf0] }
 0x206   :  { %3954 = vrcp.f32 %v912_v16  ;;  %v924_v31 = vand.u32 2147483648, %v912_v16  ;;  %v922_v34 = vand.u32 2147483647, %v912_v16  ;;  %vm918_vm10 = vweird.f32 %v912_v16  ;;  %1530 = vmatpush.bf16.msra.mxu3 %v3246_v9 }
 0x207   :  { %3956 = vrcp.f32 %v931_v18  ;;  %v890_v19 = vpop.f32.mrf.mxu2  ;;  %v903_v20 = vpop.f32.mrf.mxu3  ;;  %v943_v32 = vand.u32 2147483648, %v931_v18  ;;  %v941_v36 = vand.u32 2147483647, %v931_v18  ;;  %vm937_vm11 = vweird.f32 %v931_v18 }
 0x208   :  { %v925_v39 = vor.u32 1.1754944e-38, %v924_v31  ;;  %vm923_vm14 = vcmp.eq.f32.partialorder %v922_v34, 8.507059e+37  ;;  %v3812_v19 = vld [vmem:[%s5744_s1 + $0xcc] sm:$0xf]  ;;  %v3227_v20 = vld [vmem:[%s5744_s1 + $0xd8] sm:$0xf0]  ;;  %v3158_v9 = vor.u32 %v3795_v3, %v3155_v8 }
 0x209   :  { %v944_v42 = vor.u32 1.1754944e-38, %v943_v32  ;;  %vm942_vm15 = vcmp.eq.f32.partialorder %v941_v36, 8.507059e+37  ;;  %v3230_v22 = vor.u32 %v3812_v19, %v3227_v20  ;;  %v3808_v31 = vld [vmem:[%s5744_s1 + $0xac] sm:$0xf]  ;;  %v3211_v32 = vld [vmem:[%s5744_s1 + $0xb8] sm:$0xf0] }
 0x20a   :  { %v3953_v23 = vpop.eup %3952  ;;  %v3185_v34 = vld [vmem:[%s5744_s1 + $0x80] sm:$0xf]  ;;  %v3803_v36 = vld [vmem:[%s5744_s1 + $0x84] sm:$0xf]  ;;  %v3139_v20 = vld [vmem:[%s5744_s1 + $0x30] sm:$0xf0] }
 0x20b   :  { %v951_v24 = vadd.f32 1.0, %v3953_v23  ;;  %v3201_v23 = vld [vmem:[%s5744_s1 + $0xa0] sm:$0xf]  ;;  %1531 = vmatpush.bf16.msra.mxu3 %v3230_v22  ;;  %v3791_v19 = vld [vmem:[%s5744_s1 + $0x24] sm:$0xf] }
 0x20c   :  { %v3955_v25 = vpop.eup %3954  ;;  %v3145_v22 = vld [vmem:[%s5744_s1 + $0x28] sm:$0xf] }
 0x20d   :  { %v3957_v27 = vpop.eup %3956  ;;  %v914_v28 = vmul.f32 %v3955_v25, %v912_v16  ;;  %3958 = vrcp.f32 %v951_v24  ;;  %vm919_vm8 = vweird.f32 %v3955_v25  ;;  %v963_v55 = vand.u32 2147483648, %v951_v24  ;;  %v3814_v16 = vld [vmem:[%s5744_s1 + $0xd4] sm:$0xf0] }
 0x20e   :  { %v933_v29 = vmul.f32 %v3957_v27, %v931_v18  ;;  %3960 = vtanh.f32 %v907_v26  ;;  %vm938_vm9 = vweird.f32 %v3957_v27  ;;  %vm920_vm12 = vmor %vm918_vm10, %vm919_vm8  ;;  %vm957_vm1 = vweird.f32 %v951_v24 }
 0x20f   :  { %v915_v30 = vsub.f32 1.0, %v914_v28  ;;  %vm939_vm13 = vmor %vm937_vm11, %vm938_vm9  ;;  %v961_v56 = vand.u32 2147483647, %v951_v24  ;;  %v964_v58 = vor.u32 1.1754944e-38, %v963_v55  ;;  %v3226_v18 = vor.u32 %v3814_v16, %v3225_v15  ;;  %v3209_v28 = vld [vmem:[%s5744_s1 + $0xa8] sm:$0xf] }
 0x210   :  { %v934_v53 = vsub.f32 1.0, %v933_v29  ;;  %v3810_v29 = vld [vmem:[%s5744_s1 + $0xb4] sm:$0xf0]  ;;  %v3177_v55 = vld [vmem:[%s5744_s1 + $0x68] sm:$0xf] }
 0x211   :  { %v916_v33 = vmul.f32 %v3955_v25, %v915_v30  ;;  %vm962_vm3 = vcmp.eq.f32.partialorder %v961_v56, 8.507059e+37  ;;  %1518 = vmatpush.bf16.msra.mxu2 %v3226_v18  ;;  %v3802_v56 = vld [vmem:[%s5744_s1 + $0x74] sm:$0xf0]  ;;  %v3137_v15 = vld [vmem:[%s5744_s1 + $0x20] sm:$0xf] }
 0x212   :  { %v935_v35 = vmul.f32 %v3957_v27, %v934_v53  ;;  %v3210_v53 = vor.u32 %v3810_v29, %v3209_v28  ;;  %v3793_v16 = vld [vmem:[%s5744_s1 + $0x2c] sm:$0xf0]  ;;  %v3147_v28 = vld [vmem:[%s5744_s1 + $0x38] sm:$0xf0] }
 0x213   :  { %v3959_v37 = vpop.eup %3958  ;;  %v917_v38 = vadd.f32 %v3955_v25, %v916_v33  ;;  %v3214_v33 = vor.u32 %v3808_v31, %v3211_v32  ;;  %v3138_v18 = vor.u32 %v3793_v16, %v3137_v15 }
 0x214   :  { %v936_v40 = vadd.f32 %v3957_v27, %v935_v35  ;;  %v953_v41 = vmul.f32 %v3959_v37, %v951_v24  ;;  %v3961_v44 = vpop.eup %3960  ;;  %vm958_vm0 = vweird.f32 %v3959_v37  ;;  %v3809_v24 = vld [vmem:[%s5744_s1 + $0xac] sm:$0xf0] }
 0x215   :  { %v921_v43 = vsel %vm920_vm12, %v3955_v25, %v917_v38  ;;  %vm959_vm2 = vmor %vm957_vm1, %vm958_vm0  ;;  %v3807_v25 = vld [vmem:[%s5744_s1 + $0xa4] sm:$0xf]  ;;  %v3202_v26 = vor.u32 %v3809_v24, %v3201_v23  ;;  %1519 = vmatpush.bf16.msra.mxu2 %v3210_v53  ;;  %v3805_v35 = vld [vmem:[%s5744_s1 + $0x8c] sm:$0xf0]  ;;  %1532 = vmatpush.bf16.msra.mxu3 %v3214_v33 }
 0x216   :  { %v926_v45 = vsel %vm923_vm14, %v925_v39, %v921_v43  ;;  %v940_v46 = vsel %vm939_vm13, %v3957_v27, %v936_v40  ;;  %v954_v47 = vsub.f32 1.0, %v953_v41  ;;  %v3203_v27 = vld [vmem:[%s5744_s1 + $0xb0] sm:$0xf0]  ;;  %v3193_v39 = vld [vmem:[%s5744_s1 + $0x88] sm:$0xf] }
 0x217   :  { %v945_v48 = vsel %vm942_vm15, %v944_v42, %v940_v46  ;;  %v968_v49 = vmul.f32 %v3961_v44, %v926_v45  ;;  %v3206_v30 = vor.u32 %v3807_v25, %v3203_v27  ;;  %v3187_v38 = vld [vmem:[%s5744_s1 + $0x90] sm:$0xf0]  ;;  %v3806_v40 = vld [vmem:[%s5744_s1 + $0x94] sm:$0xf0]  ;;  %v3804_v43 = vld [vmem:[%s5744_s1 + $0x8c] sm:$0xf]  ;;  %v3142_v25 = vor.u32 %v3791_v19, %v3139_v20 }
 0x218   :  { %v967_v50 = vmul.f32 %v945_v48, %v4667_v21  ;;  %v955_v51 = vmul.f32 %v3959_v37, %v954_v47  ;;  %v3233_v21 = vld [vmem:[%s5744_s1 + $0xe0] sm:$0xf]  ;;  %v3190_v41 = vor.u32 %v3803_v36, %v3187_v38  ;;  %v3194_v42 = vor.u32 %v3806_v40, %v3193_v39  ;;  %v3195_v44 = vld [vmem:[%s5744_s1 + $0x98] sm:$0xf0]  ;;  %v2980_v46 = vld [vmem:[%s5745_s0 + $0x68] sm:$0xff] }
 0x219   :  { %v3234_v1 = vor.u32 %v3817_v63, %v3233_v21  ;;  %1506 = vmatpush.bf16.msra.mxu1 %v3206_v30  ;;  %v2979_v45 = vld [vmem:[%s5745_s0 + $0x60] sm:$0xff]  ;;  %v3198_v47 = vor.u32 %v3804_v43, %v3195_v44  ;;  %v3792_v27 = vld [vmem:[%s5744_s1 + $0x2c] sm:$0xf]  ;;  %v3129_v38 = vld [vmem:[%s5744_s1 + $0x8] sm:$0xf] }
 0x21a   :  { %v4878_v52 = vadd.f32 %v968_v49, %v967_v50  ;;  %v956_v54 = vadd.f32 %v3959_v37, %v955_v51  ;;  %1520 = vmatpush.bf16.msra.mxu2 %v3194_v42  ;;  %v3169_v48 = vld [vmem:[%s5744_s1 + $0x60] sm:$0xf]  ;;  %v3801_v49 = vld [vmem:[%s5744_s1 + $0x6c] sm:$0xf0]  ;;  %v3799_v50 = vld [vmem:[%s5744_s1 + $0x64] sm:$0xf]  ;;  %v3150_v32 = vor.u32 %v3792_v27, %v3147_v28 }
 0x21b   :  { %1491 = vmatpush.bf16.msra.mxu0 %v3234_v1  ;;  %1533 = vmatpush.bf16.msra.mxu3 %v3198_v47  ;;  %v3170_v51 = vor.u32 %v3801_v49, %v3169_v48  ;;  %v3153_v1 = vld [vmem:[%s5744_s1 + $0x40] sm:$0xf]  ;;  %v3790_v39 = vld [vmem:[%s5744_s1 + $0x14] sm:$0xf0]  ;;  %v3788_v42 = vld [vmem:[%s5744_s1 + $0xc] sm:$0xf] }
 0x21c   :  { %3962 = vtanh.f32 %v4878_v52  ;;  %v960_v57 = vsel %vm959_vm2, %v3959_v37, %v956_v54  ;;  %v3186_v37 = vor.u32 %v3805_v35, %v3185_v34  ;;  %v3171_v54 = vld [vmem:[%s5744_s1 + $0x70] sm:$0xf0]  ;;  %v3154_v7 = vor.u32 %v3797_v2, %v3153_v1  ;;  %v3121_v33 = vld [vmem:[%s5744_s1] sm:$0xf]  ;;  %v3789_v34 = vld [vmem:[%s5744_s1 + $0xc] sm:$0xf0] }
 0x21d   :  { %v965_v60 = vsel %vm962_vm3, %v964_v58, %v960_v57  ;;  %1507 = vmatpush.bf16.msra.mxu1 %v3190_v41  ;;  %v3787_v35 = vld [vmem:[%s5744_s1 + $0x4] sm:$0xf]  ;;  %v3122_v36 = vor.u32 %v3789_v34, %v3121_v33  ;;  %v3131_v43 = vld [vmem:[%s5744_s1 + $0x18] sm:$0xf0]  ;;  %v3371_v33 = vld [vmem:[%s5744_s1 + $0xf0] sm:$0xf0] }
 0x21e   :  { %v3134_v48 = vor.u32 %v3788_v42, %v3131_v43  ;;  %v3377_v34 = vld [vmem:[%s5744_s1 + $0xe8] sm:$0xf]  ;;  %v3845_v42 = vld [vmem:[%s5744_s1 + $0xcc] sm:$0xf0]  ;;  %v3843_v43 = vld [vmem:[%s5744_s1 + $0xc4] sm:$0xf] }
 0x21f   :  { %1492 = vmatpush.bf16.msra.mxu0 %v3218_v13  ;;  %v3162_v13 = vor.u32 %v3798_v11, %v3161_v10 }
 0x222   :  { %v3963_v59 = vpop.eup %3962 }
 0x223   :  { %v971_v61 = vmul.f32 %v3963_v59, %v965_v60  ;;  %1493 = vmatpush.bf16.msra.mxu0 %v3202_v26  ;;  %v3174_v59 = vor.u32 %v3799_v50, %v3171_v54  ;;  %v3178_v60 = vor.u32 %v3802_v56, %v3177_v55  ;;  %v3794_v26 = vld [vmem:[%s5744_s1 + $0x34] sm:$0xf0]  ;;  %v2981_v54 = vld [vmem:[%s5745_s0 + $0x70] sm:$0xff] }
 0x224   :  { %v3146_v31 = vor.u32 %v3794_v26, %v3145_v22 }
 0x225   :  { %v972_v62 = vpack.c.bf16 %v971_v61, %v971_v61  ;;  %v3800_v61 = vld [vmem:[%s5744_s1 + $0x6c] sm:$0xf]  ;;  %1508 = vmatpush.bf16.msra.mxu1 %v3174_v59  ;;  %1521 = vmatpush.bf16.msra.mxu2 %v3178_v60 }
 0x227   :  { %2978 = vst [vmem:[%s5746_s2 + $0x8] sm:$0xf] %v972_v62  ;;  %1180 = vmatmul.bf16.vlgmr.msrb.gmra.mxu0 %v972_v62  ;;  %1193 = vmatmul.bf16.vlgmr.msrb.gmra.mxu1 %v972_v62 }
 0x228   :  { %1206 = vmatmul.bf16.vlgmr.msrb.gmra.mxu2 %v972_v62  ;;  %1219 = vmatmul.bf16.vlgmr.msrb.gmra.mxu3 %v972_v62  ;;  %v3179_v62 = vld [vmem:[%s5744_s1 + $0x78] sm:$0xf0] }
 0x229   :  { %1494 = vmatpush.bf16.msra.mxu0 %v3186_v37  ;;  %v3182_v0 = vor.u32 %v3800_v61, %v3179_v62  ;;  %1509 = vmatpush.bf16.msra.mxu1 %v3158_v9  ;;  %v3123_v37 = vld [vmem:[%s5744_s1 + $0x10] sm:$0xf0] }
 0x22a   :  { %1522 = vmatpush.bf16.msra.mxu2 %v3162_v13  ;;  %v3126_v41 = vor.u32 %v3787_v35, %v3123_v37  ;;  %v3850_v35 = vld [vmem:[%s5744_s1 + $0xf4] sm:$0xf0] }
 0x22b   :  { %1534 = vmatpush.bf16.msra.mxu3 %v3182_v0  ;;  %v3378_v37 = vor.u32 %v3850_v35, %v3377_v34  ;;  %v3827_v34 = vld [vmem:[%s5744_s1 + $0x44] sm:$0xf] }
 0x22d   :  { %1495 = vmatpush.bf16.msra.mxu0 %v3170_v51  ;;  %1510 = vmatpush.bf16.msra.mxu1 %v3142_v25 }
 0x22e   :  { %1523 = vmatpush.bf16.msra.mxu2 %v3146_v31  ;;  %v3847_v31 = vld [vmem:[%s5744_s1 + $0xe4] sm:$0xf] }
 0x22f   :  { %1535 = vmatpush.bf16.msra.mxu3 %v3166_v17 }
 0x231   :  { %1496 = vmatpush.bf16.msra.mxu0 %v3154_v7  ;;  %1511 = vmatpush.bf16.msra.mxu1 %v3126_v41  ;;  %v3353_v41 = vld [vmem:[%s5744_s1 + $0xc0] sm:$0xf] }
 0x233   :  { %1536 = vmatpush.bf16.msra.mxu3 %v3150_v32 }
 0x235   :  { %1497 = vmatpush.bf16.msra.mxu0 %v3138_v18 }
 0x237   :  { %1537 = vmatpush.bf16.msra.mxu3 %v3134_v48 }
 0x239   :  { %1498 = vmatpush.bf16.msra.mxu0 %v3122_v36  ;;  %v3374_v36 = vor.u32 %v3847_v31, %v3371_v33  ;;  %v3829_v33 = vld [vmem:[%s5744_s1 + $0x4c] sm:$0xf0] }
 0x23b   :  { %1823 = vmatpush.bf16.msrb.mxu1 %v3374_v36 }
 0x2a4   :  { %v1181_v57 = vpop.f32.mrf.mxu0  ;;  %v1194_v58 = vpop.f32.mrf.mxu1 }
 0x2a5   :  { %v1224_v21 = vadd.f32 %v2979_v45, %v1181_v57  ;;  %v1225_v63 = vadd.f32 %v2980_v46, %v1194_v58  ;;  %v3130_v45 = vor.u32 %v3790_v39, %v3129_v38  ;;  %v3848_v38 = vld [vmem:[%s5744_s1 + $0xec] sm:$0xf]  ;;  %v3379_v39 = vld [vmem:[%s5744_s1 + $0xf8] sm:$0xf0] }
 0x2a7   :  { %v3111_v4 = vmul.f32 -1.442695, %v1224_v21  ;;  %v3112_v5 = vmul.f32 -1.442695, %v1225_v63  ;;  %1524 = vmatpush.bf16.msra.mxu2 %v3130_v45  ;;  %v3355_v45 = vld [vmem:[%s5744_s1 + $0xd0] sm:$0xf0] }
 0x2a8   :  { %v3358_v48 = vor.u32 %v3843_v43, %v3355_v45  ;;  %v3828_v43 = vld [vmem:[%s5744_s1 + $0x4c] sm:$0xf]  ;;  %v3299_v45 = vld [vmem:[%s5744_s1 + $0x58] sm:$0xf0] }
 0x2a9   :  { %3964 = vpow2.f32 %v3111_v4 }
 0x2aa   :  { %3966 = vpow2.f32 %v3112_v5  ;;  %1824 = vmatpush.bf16.msrb.mxu1 %v3358_v48  ;;  %v3302_v48 = vor.u32 %v3828_v43, %v3299_v45 }
 0x2ab   :  { %v1207_v23 = vpop.f32.mrf.mxu2  ;;  %v1220_v24 = vpop.f32.mrf.mxu3  ;;  %1836 = vmatpush.bf16.msrb.mxu2 %v3378_v37  ;;  %v3118_v37 = vld [vmem:[%s5745_s0 + $0x98] sm:$0xff] }
 0x2ac   :  { %v1227_v29 = vadd.f32 %v2982_v6, %v1220_v24  ;;  %v1183_v30 = vpop.f32.mrf.mxu0  ;;  %v1196_v53 = vpop.f32.mrf.mxu1  ;;  %v1226_v58 = vadd.f32 %v2981_v54, %v1207_v23 }
 0x2ad   :  { %v3849_v53 = vld [vmem:[%s5744_s1 + $0xec] sm:$0xf0] }
 0x2ae   :  { %v3113_v40 = vmul.f32 -1.442695, %v1227_v29 }
 0x2af   :  { %v3965_v44 = vpop.eup %3964 }
 0x2b0   :  { %v3967_v46 = vpop.eup %3966  ;;  %v1231_v47 = vadd.f32 1.0, %v3965_v44  ;;  %3968 = vpow2.f32 %v3113_v40  ;;  %v3382_v40 = vor.u32 %v3848_v38, %v3379_v39  ;;  %v3354_v44 = vor.u32 %v3845_v42, %v3353_v41  ;;  %v3291_v39 = vld [vmem:[%s5744_s1 + $0x50] sm:$0xf0]  ;;  %v3297_v41 = vld [vmem:[%s5744_s1 + $0x48] sm:$0xf] }
 0x2b1   :  { %v1250_v49 = vadd.f32 1.0, %v3967_v46  ;;  %v3361_v46 = vld [vmem:[%s5744_s1 + $0xc8] sm:$0xf]  ;;  %v3830_v42 = vld [vmem:[%s5744_s1 + $0x54] sm:$0xf0] }
 0x2b2   :  { %3970 = vrcp.f32 %v1231_v47  ;;  %v1243_v63 = vand.u32 2147483648, %v1231_v47  ;;  %v1241_v2 = vand.u32 2147483647, %v1231_v47  ;;  %vm1237_vm6 = vweird.f32 %v1231_v47  ;;  %1849 = vmatpush.bf16.msrb.mxu3 %v3382_v40 }
 0x2b3   :  { %3972 = vrcp.f32 %v1250_v49  ;;  %v1209_v50 = vpop.f32.mrf.mxu2  ;;  %v1222_v51 = vpop.f32.mrf.mxu3  ;;  %v1262_v0 = vand.u32 2147483648, %v1250_v49  ;;  %v1260_v4 = vand.u32 2147483647, %v1250_v49  ;;  %vm1256_vm7 = vweird.f32 %v1250_v49 }
 0x2b4   :  { %v1244_v7 = vor.u32 1.1754944e-38, %v1243_v63  ;;  %vm1242_vm10 = vcmp.eq.f32.partialorder %v1241_v2, 8.507059e+37  ;;  %v3844_v50 = vld [vmem:[%s5744_s1 + $0xcc] sm:$0xf]  ;;  %v3363_v51 = vld [vmem:[%s5744_s1 + $0xd8] sm:$0xf0]  ;;  %v3294_v40 = vor.u32 %v3827_v34, %v3291_v39 }
 0x2b5   :  { %v1263_v10 = vor.u32 1.1754944e-38, %v1262_v0  ;;  %vm1261_vm11 = vcmp.eq.f32.partialorder %v1260_v4, 8.507059e+37  ;;  %v3366_v54 = vor.u32 %v3844_v50, %v3363_v51  ;;  %v3840_v63 = vld [vmem:[%s5744_s1 + $0xac] sm:$0xf]  ;;  %v3347_v0 = vld [vmem:[%s5744_s1 + $0xb8] sm:$0xf0] }
 0x2b6   :  { %v3969_v55 = vpop.eup %3968  ;;  %v3321_v2 = vld [vmem:[%s5744_s1 + $0x80] sm:$0xf]  ;;  %v3835_v4 = vld [vmem:[%s5744_s1 + $0x84] sm:$0xf]  ;;  %v3275_v51 = vld [vmem:[%s5744_s1 + $0x30] sm:$0xf0] }
 0x2b7   :  { %v1270_v56 = vadd.f32 1.0, %v3969_v55  ;;  %v3337_v55 = vld [vmem:[%s5744_s1 + $0xa0] sm:$0xf]  ;;  %1850 = vmatpush.bf16.msrb.mxu3 %v3366_v54  ;;  %v3823_v50 = vld [vmem:[%s5744_s1 + $0x24] sm:$0xf] }
 0x2b8   :  { %v3971_v57 = vpop.eup %3970  ;;  %v3281_v54 = vld [vmem:[%s5744_s1 + $0x28] sm:$0xf] }
 0x2b9   :  { %v3973_v59 = vpop.eup %3972  ;;  %v1233_v60 = vmul.f32 %v3971_v57, %v1231_v47  ;;  %3974 = vrcp.f32 %v1270_v56  ;;  %vm1238_vm4 = vweird.f32 %v3971_v57  ;;  %v1282_v23 = vand.u32 2147483648, %v1270_v56  ;;  %v3846_v47 = vld [vmem:[%s5744_s1 + $0xd4] sm:$0xf0] }
 0x2ba   :  { %v1252_v61 = vmul.f32 %v3973_v59, %v1250_v49  ;;  %3976 = vtanh.f32 %v1226_v58  ;;  %vm1257_vm5 = vweird.f32 %v3973_v59  ;;  %vm1239_vm8 = vmor %vm1237_vm6, %vm1238_vm4  ;;  %vm1276_vm13 = vweird.f32 %v1270_v56 }
 0x2bb   :  { %v1234_v62 = vsub.f32 1.0, %v1233_v60  ;;  %vm1258_vm9 = vmor %vm1256_vm7, %vm1257_vm5  ;;  %v1280_v24 = vand.u32 2147483647, %v1270_v56  ;;  %v1283_v26 = vor.u32 1.1754944e-38, %v1282_v23  ;;  %v3362_v49 = vor.u32 %v3846_v47, %v3361_v46  ;;  %v3345_v60 = vld [vmem:[%s5744_s1 + $0xa8] sm:$0xf] }
 0x2bc   :  { %v1253_v21 = vsub.f32 1.0, %v1252_v61  ;;  %v3842_v61 = vld [vmem:[%s5744_s1 + $0xb4] sm:$0xf0]  ;;  %v3313_v23 = vld [vmem:[%s5744_s1 + $0x68] sm:$0xf] }
 0x2bd   :  { %v1235_v1 = vmul.f32 %v3971_v57, %v1234_v62  ;;  %vm1281_vm15 = vcmp.eq.f32.partialorder %v1280_v24, 8.507059e+37  ;;  %1837 = vmatpush.bf16.msrb.mxu2 %v3362_v49  ;;  %v3834_v24 = vld [vmem:[%s5744_s1 + $0x74] sm:$0xf0]  ;;  %v3273_v46 = vld [vmem:[%s5744_s1 + $0x20] sm:$0xf] }
 0x2be   :  { %v1254_v3 = vmul.f32 %v3973_v59, %v1253_v21  ;;  %v3346_v21 = vor.u32 %v3842_v61, %v3345_v60  ;;  %v3825_v47 = vld [vmem:[%s5744_s1 + $0x2c] sm:$0xf0]  ;;  %v3283_v60 = vld [vmem:[%s5744_s1 + $0x38] sm:$0xf0] }
 0x2bf   :  { %v3975_v5 = vpop.eup %3974  ;;  %v1236_v6 = vadd.f32 %v3971_v57, %v1235_v1  ;;  %v3350_v1 = vor.u32 %v3840_v63, %v3347_v0  ;;  %v3274_v49 = vor.u32 %v3825_v47, %v3273_v46 }
 0x2c0   :  { %v1255_v8 = vadd.f32 %v3973_v59, %v1254_v3  ;;  %v1272_v9 = vmul.f32 %v3975_v5, %v1270_v56  ;;  %v3977_v12 = vpop.eup %3976  ;;  %vm1277_vm12 = vweird.f32 %v3975_v5  ;;  %v3841_v56 = vld [vmem:[%s5744_s1 + $0xac] sm:$0xf0] }
 0x2c1   :  { %v1240_v11 = vsel %vm1239_vm8, %v3971_v57, %v1236_v6  ;;  %vm1278_vm14 = vmor %vm1276_vm13, %vm1277_vm12  ;;  %v3839_v57 = vld [vmem:[%s5744_s1 + $0xa4] sm:$0xf]  ;;  %v3338_v58 = vor.u32 %v3841_v56, %v3337_v55  ;;  %1838 = vmatpush.bf16.msrb.mxu2 %v3346_v21  ;;  %v3837_v3 = vld [vmem:[%s5744_s1 + $0x8c] sm:$0xf0]  ;;  %1851 = vmatpush.bf16.msrb.mxu3 %v3350_v1 }
 0x2c2   :  { %v1245_v13 = vsel %vm1242_vm10, %v1244_v7, %v1240_v11  ;;  %v1259_v14 = vsel %vm1258_vm9, %v3973_v59, %v1255_v8  ;;  %v1273_v15 = vsub.f32 1.0, %v1272_v9  ;;  %v3339_v59 = vld [vmem:[%s5744_s1 + $0xb0] sm:$0xf0]  ;;  %v3329_v7 = vld [vmem:[%s5744_s1 + $0x88] sm:$0xf] }
 0x2c3   :  { %v1264_v16 = vsel %vm1261_vm11, %v1263_v10, %v1259_v14  ;;  %v1287_v17 = vmul.f32 %v3977_v12, %v1245_v13  ;;  %v3342_v62 = vor.u32 %v3839_v57, %v3339_v59  ;;  %v3323_v6 = vld [vmem:[%s5744_s1 + $0x90] sm:$0xf0]  ;;  %v3838_v8 = vld [vmem:[%s5744_s1 + $0x94] sm:$0xf0]  ;;  %v3836_v11 = vld [vmem:[%s5744_s1 + $0x8c] sm:$0xf]  ;;  %v3278_v57 = vor.u32 %v3823_v50, %v3275_v51 }
 0x2c4   :  { %v1286_v18 = vmul.f32 %v1264_v16, %v4878_v52  ;;  %v1274_v19 = vmul.f32 %v3975_v5, %v1273_v15  ;;  %v3369_v52 = vld [vmem:[%s5744_s1 + $0xe0] sm:$0xf]  ;;  %v3326_v9 = vor.u32 %v3835_v4, %v3323_v6  ;;  %v3330_v10 = vor.u32 %v3838_v8, %v3329_v7  ;;  %v3331_v12 = vld [vmem:[%s5744_s1 + $0x98] sm:$0xf0]  ;;  %v3116_v14 = vld [vmem:[%s5745_s0 + $0x88] sm:$0xff] }
 0x2c5   :  { %v3370_v32 = vor.u32 %v3849_v53, %v3369_v52  ;;  %1825 = vmatpush.bf16.msrb.mxu1 %v3342_v62  ;;  %v3115_v13 = vld [vmem:[%s5745_s0 + $0x80] sm:$0xff]  ;;  %v3334_v15 = vor.u32 %v3836_v11, %v3331_v12  ;;  %v3824_v59 = vld [vmem:[%s5744_s1 + $0x2c] sm:$0xf]  ;;  %v3265_v6 = vld [vmem:[%s5744_s1 + $0x8] sm:$0xf] }
 0x2c6   :  { %v5089_v20 = vadd.f32 %v1287_v17, %v1286_v18  ;;  %v1275_v22 = vadd.f32 %v3975_v5, %v1274_v19  ;;  %1839 = vmatpush.bf16.msrb.mxu2 %v3330_v10  ;;  %v3305_v16 = vld [vmem:[%s5744_s1 + $0x60] sm:$0xf]  ;;  %v3833_v17 = vld [vmem:[%s5744_s1 + $0x6c] sm:$0xf0]  ;;  %v3831_v18 = vld [vmem:[%s5744_s1 + $0x64] sm:$0xf]  ;;  %v3286_v0 = vor.u32 %v3824_v59, %v3283_v60 }
 0x2c7   :  { %1810 = vmatpush.bf16.msrb.mxu0 %v3370_v32  ;;  %1852 = vmatpush.bf16.msrb.mxu3 %v3334_v15  ;;  %v3306_v19 = vor.u32 %v3833_v17, %v3305_v16  ;;  %v3289_v32 = vld [vmem:[%s5744_s1 + $0x40] sm:$0xf]  ;;  %v3822_v7 = vld [vmem:[%s5744_s1 + $0x14] sm:$0xf0]  ;;  %v3820_v10 = vld [vmem:[%s5744_s1 + $0xc] sm:$0xf] }
 0x2c8   :  { %3978 = vtanh.f32 %v5089_v20  ;;  %v1279_v25 = vsel %vm1278_vm14, %v3975_v5, %v1275_v22  ;;  %v3322_v5 = vor.u32 %v3837_v3, %v3321_v2  ;;  %v3307_v22 = vld [vmem:[%s5744_s1 + $0x70] sm:$0xf0]  ;;  %v3290_v38 = vor.u32 %v3829_v33, %v3289_v32  ;;  %v3257_v1 = vld [vmem:[%s5744_s1] sm:$0xf]  ;;  %v3821_v2 = vld [vmem:[%s5744_s1 + $0xc] sm:$0xf0] }
 0x2c9   :  { %v1284_v28 = vsel %vm1281_vm15, %v1283_v26, %v1279_v25  ;;  %1826 = vmatpush.bf16.msrb.mxu1 %v3326_v9  ;;  %v3819_v3 = vld [vmem:[%s5744_s1 + $0x4] sm:$0xf]  ;;  %v3258_v4 = vor.u32 %v3821_v2, %v3257_v1  ;;  %v3267_v11 = vld [vmem:[%s5744_s1 + $0x18] sm:$0xf0]  ;;  %v3507_v1 = vld [vmem:[%s5744_s1 + $0xf0] sm:$0xf0] }
 0x2ca   :  { %v3270_v16 = vor.u32 %v3820_v10, %v3267_v11  ;;  %v3513_v2 = vld [vmem:[%s5744_s1 + $0xe8] sm:$0xf]  ;;  %v3877_v10 = vld [vmem:[%s5744_s1 + $0xcc] sm:$0xf0]  ;;  %v3875_v11 = vld [vmem:[%s5744_s1 + $0xc4] sm:$0xf] }
 0x2cb   :  { %1811 = vmatpush.bf16.msrb.mxu0 %v3354_v44  ;;  %v3298_v44 = vor.u32 %v3830_v42, %v3297_v41 }
 0x2ce   :  { %v3979_v27 = vpop.eup %3978 }
 0x2cf   :  { %v1290_v29 = vmul.f32 %v3979_v27, %v1284_v28  ;;  %1812 = vmatpush.bf16.msrb.mxu0 %v3338_v58  ;;  %v3310_v27 = vor.u32 %v3831_v18, %v3307_v22  ;;  %v3314_v28 = vor.u32 %v3834_v24, %v3313_v23  ;;  %v3826_v58 = vld [vmem:[%s5744_s1 + $0x34] sm:$0xf0]  ;;  %v3117_v22 = vld [vmem:[%s5745_s0 + $0x90] sm:$0xff] }
 0x2d0   :  { %v3282_v63 = vor.u32 %v3826_v58, %v3281_v54 }
 0x2d1   :  { %v1291_v30 = vpack.c.bf16 %v1290_v29, %v1290_v29  ;;  %v3832_v29 = vld [vmem:[%s5744_s1 + $0x6c] sm:$0xf]  ;;  %1827 = vmatpush.bf16.msrb.mxu1 %v3310_v27  ;;  %1840 = vmatpush.bf16.msrb.mxu2 %v3314_v28 }
 0x2d3   :  { %3114 = vst [vmem:[%s5746_s2 + $0xc] sm:$0xf] %v1291_v30  ;;  %1499 = vmatmul.bf16.vlgmr.msra.gmra.mxu0 %v1291_v30  ;;  %1512 = vmatmul.bf16.vlgmr.msra.gmra.mxu1 %v1291_v30 }
 0x2d4   :  { %1525 = vmatmul.bf16.vlgmr.msra.gmra.mxu2 %v1291_v30  ;;  %1538 = vmatmul.bf16.vlgmr.msra.gmra.mxu3 %v1291_v30  ;;  %v3315_v30 = vld [vmem:[%s5744_s1 + $0x78] sm:$0xf0] }
 0x2d5   :  { %1813 = vmatpush.bf16.msrb.mxu0 %v3322_v5  ;;  %v3318_v31 = vor.u32 %v3832_v29, %v3315_v30  ;;  %1828 = vmatpush.bf16.msrb.mxu1 %v3294_v40  ;;  %v3259_v5 = vld [vmem:[%s5744_s1 + $0x10] sm:$0xf0] }
 0x2d6   :  { %1841 = vmatpush.bf16.msrb.mxu2 %v3298_v44  ;;  %v3262_v9 = vor.u32 %v3819_v3, %v3259_v5  ;;  %v3882_v3 = vld [vmem:[%s5744_s1 + $0xf4] sm:$0xf0] }
 0x2d7   :  { %1853 = vmatpush.bf16.msrb.mxu3 %v3318_v31  ;;  %v3514_v5 = vor.u32 %v3882_v3, %v3513_v2  ;;  %v3859_v2 = vld [vmem:[%s5744_s1 + $0x44] sm:$0xf] }
 0x2d9   :  { %1814 = vmatpush.bf16.msrb.mxu0 %v3306_v19  ;;  %1829 = vmatpush.bf16.msrb.mxu1 %v3278_v57 }
 0x2da   :  { %1842 = vmatpush.bf16.msrb.mxu2 %v3282_v63  ;;  %v3879_v63 = vld [vmem:[%s5744_s1 + $0xe4] sm:$0xf] }
 0x2db   :  { %1854 = vmatpush.bf16.msrb.mxu3 %v3302_v48 }
 0x2dd   :  { %1815 = vmatpush.bf16.msrb.mxu0 %v3290_v38  ;;  %1830 = vmatpush.bf16.msrb.mxu1 %v3262_v9  ;;  %v3489_v9 = vld [vmem:[%s5744_s1 + $0xc0] sm:$0xf] }
 0x2df   :  { %1855 = vmatpush.bf16.msrb.mxu3 %v3286_v0 }
 0x2e1   :  { %1816 = vmatpush.bf16.msrb.mxu0 %v3274_v49 }
 0x2e3   :  { %1856 = vmatpush.bf16.msrb.mxu3 %v3270_v16 }
 0x2e5   :  { %1817 = vmatpush.bf16.msrb.mxu0 %v3258_v4  ;;  %v3510_v4 = vor.u32 %v3879_v63, %v3507_v1  ;;  %v3861_v1 = vld [vmem:[%s5744_s1 + $0x4c] sm:$0xf0] }
 0x2e7   :  { %2142 = vmatpush.bf16.msra.mxu1 %v3510_v4 }
 0x350   :  { %v1500_v25 = vpop.f32.mrf.mxu0  ;;  %v1513_v26 = vpop.f32.mrf.mxu1 }
 0x351   :  { %v1543_v52 = vadd.f32 %v3115_v13, %v1500_v25  ;;  %v1544_v53 = vadd.f32 %v3116_v14, %v1513_v26  ;;  %v3266_v13 = vor.u32 %v3822_v7, %v3265_v6  ;;  %v3880_v6 = vld [vmem:[%s5744_s1 + $0xec] sm:$0xf]  ;;  %v3515_v7 = vld [vmem:[%s5744_s1 + $0xf8] sm:$0xf0] }
 0x353   :  { %v3247_v35 = vmul.f32 -1.442695, %v1543_v52  ;;  %v3248_v36 = vmul.f32 -1.442695, %v1544_v53  ;;  %1843 = vmatpush.bf16.msrb.mxu2 %v3266_v13  ;;  %v3491_v13 = vld [vmem:[%s5744_s1 + $0xd0] sm:$0xf0] }
 0x354   :  { %v3494_v16 = vor.u32 %v3875_v11, %v3491_v13  ;;  %v3860_v11 = vld [vmem:[%s5744_s1 + $0x4c] sm:$0xf]  ;;  %v3435_v13 = vld [vmem:[%s5744_s1 + $0x58] sm:$0xf0] }
 0x355   :  { %3980 = vpow2.f32 %v3247_v35 }
 0x356   :  { %3982 = vpow2.f32 %v3248_v36  ;;  %2143 = vmatpush.bf16.msra.mxu1 %v3494_v16  ;;  %v3438_v16 = vor.u32 %v3860_v11, %v3435_v13 }
 0x357   :  { %v1526_v55 = vpop.f32.mrf.mxu2  ;;  %v1539_v56 = vpop.f32.mrf.mxu3  ;;  %2155 = vmatpush.bf16.msra.mxu2 %v3514_v5  ;;  %v3254_v5 = vld [vmem:[%s5745_s0 + $0xb8] sm:$0xff] }
 0x358   :  { %v1546_v61 = vadd.f32 %v3118_v37, %v1539_v56  ;;  %v1502_v62 = vpop.f32.mrf.mxu0  ;;  %v1515_v21 = vpop.f32.mrf.mxu1  ;;  %v1545_v26 = vadd.f32 %v3117_v22, %v1526_v55 }
 0x359   :  { %v3881_v21 = vld [vmem:[%s5744_s1 + $0xec] sm:$0xf0] }
 0x35a   :  { %v3249_v8 = vmul.f32 -1.442695, %v1546_v61 }
 0x35b   :  { %v3981_v12 = vpop.eup %3980 }
 0x35c   :  { %v3983_v14 = vpop.eup %3982  ;;  %v1550_v15 = vadd.f32 1.0, %v3981_v12  ;;  %3984 = vpow2.f32 %v3249_v8  ;;  %v3518_v8 = vor.u32 %v3880_v6, %v3515_v7  ;;  %v3490_v12 = vor.u32 %v3877_v10, %v3489_v9  ;;  %v3427_v7 = vld [vmem:[%s5744_s1 + $0x50] sm:$0xf0]  ;;  %v3433_v9 = vld [vmem:[%s5744_s1 + $0x48] sm:$0xf] }
 0x35d   :  { %v1569_v17 = vadd.f32 1.0, %v3983_v14  ;;  %v3497_v14 = vld [vmem:[%s5744_s1 + $0xc8] sm:$0xf]  ;;  %v3862_v10 = vld [vmem:[%s5744_s1 + $0x54] sm:$0xf0] }
 0x35e   :  { %3986 = vrcp.f32 %v1550_v15  ;;  %v1562_v53 = vand.u32 2147483648, %v1550_v15  ;;  %v1560_v33 = vand.u32 2147483647, %v1550_v15  ;;  %vm1556_vm2 = vweird.f32 %v1550_v15  ;;  %2168 = vmatpush.bf16.msra.mxu3 %v3518_v8 }
 0x35f   :  { %3988 = vrcp.f32 %v1569_v17  ;;  %v1528_v18 = vpop.f32.mrf.mxu2  ;;  %v1541_v19 = vpop.f32.mrf.mxu3  ;;  %v1581_v31 = vand.u32 2147483648, %v1569_v17  ;;  %v1579_v35 = vand.u32 2147483647, %v1569_v17  ;;  %vm1575_vm3 = vweird.f32 %v1569_v17 }
 0x360   :  { %v1563_v38 = vor.u32 1.1754944e-38, %v1562_v53  ;;  %vm1561_vm6 = vcmp.eq.f32.partialorder %v1560_v33, 8.507059e+37  ;;  %v3876_v18 = vld [vmem:[%s5744_s1 + $0xcc] sm:$0xf]  ;;  %v3499_v19 = vld [vmem:[%s5744_s1 + $0xd8] sm:$0xf0]  ;;  %v3430_v8 = vor.u32 %v3859_v2, %v3427_v7 }
 0x361   :  { %v1582_v41 = vor.u32 1.1754944e-38, %v1581_v31  ;;  %vm1580_vm7 = vcmp.eq.f32.partialorder %v1579_v35, 8.507059e+37  ;;  %v3502_v22 = vor.u32 %v3876_v18, %v3499_v19  ;;  %v3872_v53 = vld [vmem:[%s5744_s1 + $0xac] sm:$0xf]  ;;  %v3483_v31 = vld [vmem:[%s5744_s1 + $0xb8] sm:$0xf0] }
 0x362   :  { %v3985_v23 = vpop.eup %3984  ;;  %v3457_v33 = vld [vmem:[%s5744_s1 + $0x80] sm:$0xf]  ;;  %v3867_v35 = vld [vmem:[%s5744_s1 + $0x84] sm:$0xf]  ;;  %v3411_v19 = vld [vmem:[%s5744_s1 + $0x30] sm:$0xf0] }
 0x363   :  { %v1589_v24 = vadd.f32 1.0, %v3985_v23  ;;  %v3473_v23 = vld [vmem:[%s5744_s1 + $0xa0] sm:$0xf]  ;;  %2169 = vmatpush.bf16.msra.mxu3 %v3502_v22  ;;  %v3855_v18 = vld [vmem:[%s5744_s1 + $0x24] sm:$0xf] }
 0x364   :  { %v3987_v25 = vpop.eup %3986  ;;  %v3417_v22 = vld [vmem:[%s5744_s1 + $0x28] sm:$0xf] }
 0x365   :  { %v3989_v27 = vpop.eup %3988  ;;  %v1552_v28 = vmul.f32 %v3987_v25, %v1550_v15  ;;  %3990 = vrcp.f32 %v1589_v24  ;;  %vm1557_vm0 = vweird.f32 %v3987_v25  ;;  %v1601_v55 = vand.u32 2147483648, %v1589_v24  ;;  %v3878_v15 = vld [vmem:[%s5744_s1 + $0xd4] sm:$0xf0] }
 0x366   :  { %v1571_v29 = vmul.f32 %v3989_v27, %v1569_v17  ;;  %3992 = vtanh.f32 %v1545_v26  ;;  %vm1576_vm1 = vweird.f32 %v3989_v27  ;;  %vm1558_vm4 = vmor %vm1556_vm2, %vm1557_vm0  ;;  %vm1595_vm9 = vweird.f32 %v1589_v24 }
 0x367   :  { %v1553_v30 = vsub.f32 1.0, %v1552_v28  ;;  %vm1577_vm5 = vmor %vm1575_vm3, %vm1576_vm1  ;;  %v1599_v56 = vand.u32 2147483647, %v1589_v24  ;;  %v1602_v58 = vor.u32 1.1754944e-38, %v1601_v55  ;;  %v3498_v17 = vor.u32 %v3878_v15, %v3497_v14  ;;  %v3481_v28 = vld [vmem:[%s5744_s1 + $0xa8] sm:$0xf] }
 0x368   :  { %v1572_v52 = vsub.f32 1.0, %v1571_v29  ;;  %v3874_v29 = vld [vmem:[%s5744_s1 + $0xb4] sm:$0xf0]  ;;  %v3449_v55 = vld [vmem:[%s5744_s1 + $0x68] sm:$0xf] }
 0x369   :  { %v1554_v32 = vmul.f32 %v3987_v25, %v1553_v30  ;;  %vm1600_vm11 = vcmp.eq.f32.partialorder %v1599_v56, 8.507059e+37  ;;  %2156 = vmatpush.bf16.msra.mxu2 %v3498_v17  ;;  %v3866_v56 = vld [vmem:[%s5744_s1 + $0x74] sm:$0xf0]  ;;  %v3409_v14 = vld [vmem:[%s5744_s1 + $0x20] sm:$0xf] }
 0x36a   :  { %v1573_v34 = vmul.f32 %v3989_v27, %v1572_v52  ;;  %v3482_v52 = vor.u32 %v3874_v29, %v3481_v28  ;;  %v3857_v15 = vld [vmem:[%s5744_s1 + $0x2c] sm:$0xf0]  ;;  %v3419_v28 = vld [vmem:[%s5744_s1 + $0x38] sm:$0xf0] }
 0x36b   :  { %v3991_v36 = vpop.eup %3990  ;;  %v1555_v37 = vadd.f32 %v3987_v25, %v1554_v32  ;;  %v3486_v32 = vor.u32 %v3872_v53, %v3483_v31  ;;  %v3410_v17 = vor.u32 %v3857_v15, %v3409_v14 }
 0x36c   :  { %v1574_v39 = vadd.f32 %v3989_v27, %v1573_v34  ;;  %v1591_v40 = vmul.f32 %v3991_v36, %v1589_v24  ;;  %v3993_v43 = vpop.eup %3992  ;;  %vm1596_vm8 = vweird.f32 %v3991_v36  ;;  %v3873_v24 = vld [vmem:[%s5744_s1 + $0xac] sm:$0xf0] }
 0x36d   :  { %v1559_v42 = vsel %vm1558_vm4, %v3987_v25, %v1555_v37  ;;  %vm1597_vm10 = vmor %vm1595_vm9, %vm1596_vm8  ;;  %v3871_v25 = vld [vmem:[%s5744_s1 + $0xa4] sm:$0xf]  ;;  %v3474_v26 = vor.u32 %v3873_v24, %v3473_v23  ;;  %2157 = vmatpush.bf16.msra.mxu2 %v3482_v52  ;;  %v3869_v34 = vld [vmem:[%s5744_s1 + $0x8c] sm:$0xf0]  ;;  %2170 = vmatpush.bf16.msra.mxu3 %v3486_v32 }
 0x36e   :  { %v1564_v44 = vsel %vm1561_vm6, %v1563_v38, %v1559_v42  ;;  %v1578_v45 = vsel %vm1577_vm5, %v3989_v27, %v1574_v39  ;;  %v1592_v46 = vsub.f32 1.0, %v1591_v40  ;;  %v3475_v27 = vld [vmem:[%s5744_s1 + $0xb0] sm:$0xf0]  ;;  %v3465_v38 = vld [vmem:[%s5744_s1 + $0x88] sm:$0xf] }
 0x36f   :  { %v1583_v47 = vsel %vm1580_vm7, %v1582_v41, %v1578_v45  ;;  %v1606_v48 = vmul.f32 %v3993_v43, %v1564_v44  ;;  %v3478_v30 = vor.u32 %v3871_v25, %v3475_v27  ;;  %v3459_v37 = vld [vmem:[%s5744_s1 + $0x90] sm:$0xf0]  ;;  %v3870_v39 = vld [vmem:[%s5744_s1 + $0x94] sm:$0xf0]  ;;  %v3868_v42 = vld [vmem:[%s5744_s1 + $0x8c] sm:$0xf]  ;;  %v3414_v25 = vor.u32 %v3855_v18, %v3411_v19 }
 0x370   :  { %v1605_v49 = vmul.f32 %v1583_v47, %v5089_v20  ;;  %v1593_v50 = vmul.f32 %v3991_v36, %v1592_v46  ;;  %v3505_v20 = vld [vmem:[%s5744_s1 + $0xe0] sm:$0xf]  ;;  %v3462_v40 = vor.u32 %v3867_v35, %v3459_v37  ;;  %v3466_v41 = vor.u32 %v3870_v39, %v3465_v38  ;;  %v3467_v43 = vld [vmem:[%s5744_s1 + $0x98] sm:$0xf0]  ;;  %v3252_v45 = vld [vmem:[%s5745_s0 + $0xa8] sm:$0xff] }
 0x371   :  { %v3506_v0 = vor.u32 %v3881_v21, %v3505_v20  ;;  %2144 = vmatpush.bf16.msra.mxu1 %v3478_v30  ;;  %v3251_v44 = vld [vmem:[%s5745_s0 + $0xa0] sm:$0xff]  ;;  %v3470_v46 = vor.u32 %v3868_v42, %v3467_v43  ;;  %v3856_v27 = vld [vmem:[%s5744_s1 + $0x2c] sm:$0xf]  ;;  %v3401_v37 = vld [vmem:[%s5744_s1 + $0x8] sm:$0xf] }
 0x372   :  { %v5300_v51 = vadd.f32 %v1606_v48, %v1605_v49  ;;  %v1594_v54 = vadd.f32 %v3991_v36, %v1593_v50  ;;  %2158 = vmatpush.bf16.msra.mxu2 %v3466_v41  ;;  %v3441_v47 = vld [vmem:[%s5744_s1 + $0x60] sm:$0xf]  ;;  %v3865_v48 = vld [vmem:[%s5744_s1 + $0x6c] sm:$0xf0]  ;;  %v3863_v49 = vld [vmem:[%s5744_s1 + $0x64] sm:$0xf]  ;;  %v3422_v31 = vor.u32 %v3856_v27, %v3419_v28 }
 0x373   :  { %2129 = vmatpush.bf16.msra.mxu0 %v3506_v0  ;;  %2171 = vmatpush.bf16.msra.mxu3 %v3470_v46  ;;  %v3442_v50 = vor.u32 %v3865_v48, %v3441_v47  ;;  %v3425_v0 = vld [vmem:[%s5744_s1 + $0x40] sm:$0xf]  ;;  %v3854_v38 = vld [vmem:[%s5744_s1 + $0x14] sm:$0xf0]  ;;  %v3852_v41 = vld [vmem:[%s5744_s1 + $0xc] sm:$0xf] }
 0x374   :  { %3994 = vtanh.f32 %v5300_v51  ;;  %v1598_v57 = vsel %vm1597_vm10, %v3991_v36, %v1594_v54  ;;  %v3458_v36 = vor.u32 %v3869_v34, %v3457_v33  ;;  %v3443_v54 = vld [vmem:[%s5744_s1 + $0x70] sm:$0xf0]  ;;  %v3426_v6 = vor.u32 %v3861_v1, %v3425_v0  ;;  %v3393_v32 = vld [vmem:[%s5744_s1] sm:$0xf]  ;;  %v3853_v33 = vld [vmem:[%s5744_s1 + $0xc] sm:$0xf0] }
 0x375   :  { %v1603_v60 = vsel %vm1600_vm11, %v1602_v58, %v1598_v57  ;;  %2145 = vmatpush.bf16.msra.mxu1 %v3462_v40  ;;  %v3851_v34 = vld [vmem:[%s5744_s1 + $0x4] sm:$0xf]  ;;  %v3394_v35 = vor.u32 %v3853_v33, %v3393_v32  ;;  %v3403_v42 = vld [vmem:[%s5744_s1 + $0x18] sm:$0xf0]  ;;  %v3643_v32 = vld [vmem:[%s5744_s1 + $0xf0] sm:$0xf0] }
 0x376   :  { %v3406_v47 = vor.u32 %v3852_v41, %v3403_v42  ;;  %v3649_v33 = vld [vmem:[%s5744_s1 + $0xe8] sm:$0xf]  ;;  %v3909_v41 = vld [vmem:[%s5744_s1 + $0xcc] sm:$0xf0]  ;;  %v3907_v42 = vld [vmem:[%s5744_s1 + $0xc4] sm:$0xf] }
 0x377   :  { %2130 = vmatpush.bf16.msra.mxu0 %v3490_v12  ;;  %v3434_v12 = vor.u32 %v3862_v10, %v3433_v9 }
 0x37a   :  { %v3995_v59 = vpop.eup %3994 }
 0x37b   :  { %v1609_v61 = vmul.f32 %v3995_v59, %v1603_v60  ;;  %2131 = vmatpush.bf16.msra.mxu0 %v3474_v26  ;;  %v3446_v59 = vor.u32 %v3863_v49, %v3443_v54  ;;  %v3450_v60 = vor.u32 %v3866_v56, %v3449_v55  ;;  %v3858_v26 = vld [vmem:[%s5744_s1 + $0x34] sm:$0xf0]  ;;  %v3253_v54 = vld [vmem:[%s5745_s0 + $0xb0] sm:$0xff] }
 0x37c   :  { %v3418_v53 = vor.u32 %v3858_v26, %v3417_v22 }
 0x37d   :  { %v1610_v62 = vpack.c.bf16 %v1609_v61, %v1609_v61  ;;  %v3864_v61 = vld [vmem:[%s5744_s1 + $0x6c] sm:$0xf]  ;;  %2146 = vmatpush.bf16.msra.mxu1 %v3446_v59  ;;  %2159 = vmatpush.bf16.msra.mxu2 %v3450_v60 }
 0x37f   :  { %3250 = vst [vmem:[%s5746_s2 + $0x10] sm:$0xf] %v1610_v62  ;;  %1818 = vmatmul.bf16.vlgmr.msrb.gmra.mxu0 %v1610_v62  ;;  %1831 = vmatmul.bf16.vlgmr.msrb.gmra.mxu1 %v1610_v62 }
 0x380   :  { %1844 = vmatmul.bf16.vlgmr.msrb.gmra.mxu2 %v1610_v62  ;;  %1857 = vmatmul.bf16.vlgmr.msrb.gmra.mxu3 %v1610_v62  ;;  %v3451_v62 = vld [vmem:[%s5744_s1 + $0x78] sm:$0xf0] }
 0x381   :  { %2132 = vmatpush.bf16.msra.mxu0 %v3458_v36  ;;  %v3454_v63 = vor.u32 %v3864_v61, %v3451_v62  ;;  %2147 = vmatpush.bf16.msra.mxu1 %v3430_v8  ;;  %v3395_v36 = vld [vmem:[%s5744_s1 + $0x10] sm:$0xf0] }
 0x382   :  { %2160 = vmatpush.bf16.msra.mxu2 %v3434_v12  ;;  %v3398_v40 = vor.u32 %v3851_v34, %v3395_v36  ;;  %v3914_v34 = vld [vmem:[%s5744_s1 + $0xf4] sm:$0xf0] }
 0x383   :  { %2172 = vmatpush.bf16.msra.mxu3 %v3454_v63  ;;  %v3650_v36 = vor.u32 %v3914_v34, %v3649_v33  ;;  %v3891_v33 = vld [vmem:[%s5744_s1 + $0x44] sm:$0xf] }
 0x385   :  { %2133 = vmatpush.bf16.msra.mxu0 %v3442_v50  ;;  %2148 = vmatpush.bf16.msra.mxu1 %v3414_v25 }
 0x386   :  { %2161 = vmatpush.bf16.msra.mxu2 %v3418_v53  ;;  %v3911_v53 = vld [vmem:[%s5744_s1 + $0xe4] sm:$0xf] }
 0x387   :  { %2173 = vmatpush.bf16.msra.mxu3 %v3438_v16 }
 0x389   :  { %2134 = vmatpush.bf16.msra.mxu0 %v3426_v6  ;;  %2149 = vmatpush.bf16.msra.mxu1 %v3398_v40  ;;  %v3625_v40 = vld [vmem:[%s5744_s1 + $0xc0] sm:$0xf] }
 0x38b   :  { %2174 = vmatpush.bf16.msra.mxu3 %v3422_v31 }
 0x38d   :  { %2135 = vmatpush.bf16.msra.mxu0 %v3410_v17 }
 0x38f   :  { %2175 = vmatpush.bf16.msra.mxu3 %v3406_v47 }
 0x391   :  { %2136 = vmatpush.bf16.msra.mxu0 %v3394_v35  ;;  %v3646_v35 = vor.u32 %v3911_v53, %v3643_v32  ;;  %v3893_v32 = vld [vmem:[%s5744_s1 + $0x4c] sm:$0xf0] }
 0x393   :  { %2461 = vmatpush.bf16.msrb.mxu1 %v3646_v35 }
 0x3fc   :  { %v1819_v57 = vpop.f32.mrf.mxu0  ;;  %v1832_v58 = vpop.f32.mrf.mxu1 }
 0x3fd   :  { %v1862_v20 = vadd.f32 %v3251_v44, %v1819_v57  ;;  %v1863_v21 = vadd.f32 %v3252_v45, %v1832_v58  ;;  %v3402_v44 = vor.u32 %v3854_v38, %v3401_v37  ;;  %v3912_v37 = vld [vmem:[%s5744_s1 + $0xec] sm:$0xf]  ;;  %v3651_v38 = vld [vmem:[%s5744_s1 + $0xf8] sm:$0xf0] }
 0x3ff   :  { %v3383_v3 = vmul.f32 -1.442695, %v1862_v20  ;;  %v3384_v4 = vmul.f32 -1.442695, %v1863_v21  ;;  %2162 = vmatpush.bf16.msra.mxu2 %v3402_v44  ;;  %v3627_v44 = vld [vmem:[%s5744_s1 + $0xd0] sm:$0xf0] }
 0x400   :  { %v3630_v47 = vor.u32 %v3907_v42, %v3627_v44  ;;  %v3892_v42 = vld [vmem:[%s5744_s1 + $0x4c] sm:$0xf]  ;;  %v3571_v44 = vld [vmem:[%s5744_s1 + $0x58] sm:$0xf0] }
 0x401   :  { %3996 = vpow2.f32 %v3383_v3 }
 0x402   :  { %3998 = vpow2.f32 %v3384_v4  ;;  %2462 = vmatpush.bf16.msrb.mxu1 %v3630_v47  ;;  %v3574_v47 = vor.u32 %v3892_v42, %v3571_v44 }
 0x403   :  { %v1845_v23 = vpop.f32.mrf.mxu2  ;;  %v1858_v24 = vpop.f32.mrf.mxu3  ;;  %2474 = vmatpush.bf16.msrb.mxu2 %v3650_v36  ;;  %v3390_v36 = vld [vmem:[%s5745_s0 + $0xd8] sm:$0xff] }
 0x404   :  { %v1865_v29 = vadd.f32 %v3254_v5, %v1858_v24  ;;  %v1821_v30 = vpop.f32.mrf.mxu0  ;;  %v1834_v52 = vpop.f32.mrf.mxu1  ;;  %v1864_v58 = vadd.f32 %v3253_v54, %v1845_v23 }
 0x405   :  { %v3913_v52 = vld [vmem:[%s5744_s1 + $0xec] sm:$0xf0] }
 0x406   :  { %v3385_v39 = vmul.f32 -1.442695, %v1865_v29 }
 0x407   :  { %v3997_v43 = vpop.eup %3996 }
 0x408   :  { %v3999_v45 = vpop.eup %3998  ;;  %v1869_v46 = vadd.f32 1.0, %v3997_v43  ;;  %4000 = vpow2.f32 %v3385_v39  ;;  %v3654_v39 = vor.u32 %v3912_v37, %v3651_v38  ;;  %v3626_v43 = vor.u32 %v3909_v41, %v3625_v40  ;;  %v3563_v38 = vld [vmem:[%s5744_s1 + $0x50] sm:$0xf0]  ;;  %v3569_v40 = vld [vmem:[%s5744_s1 + $0x48] sm:$0xf] }
 0x409   :  { %v1888_v48 = vadd.f32 1.0, %v3999_v45  ;;  %v3633_v45 = vld [vmem:[%s5744_s1 + $0xc8] sm:$0xf]  ;;  %v3894_v41 = vld [vmem:[%s5744_s1 + $0x54] sm:$0xf0] }
 0x40a   :  { %4002 = vrcp.f32 %v1869_v46  ;;  %v1881_v21 = vand.u32 2147483648, %v1869_v46  ;;  %v1879_v1 = vand.u32 2147483647, %v1869_v46  ;;  %vm1875_vm14 = vweird.f32 %v1869_v46  ;;  %2487 = vmatpush.bf16.msrb.mxu3 %v3654_v39 }
 0x40b   :  { %4004 = vrcp.f32 %v1888_v48  ;;  %v1847_v49 = vpop.f32.mrf.mxu2  ;;  %v1860_v50 = vpop.f32.mrf.mxu3  ;;  %v1900_v63 = vand.u32 2147483648, %v1888_v48  ;;  %v1898_v3 = vand.u32 2147483647, %v1888_v48  ;;  %vm1894_vm15 = vweird.f32 %v1888_v48 }
 0x40c   :  { %v1882_v6 = vor.u32 1.1754944e-38, %v1881_v21  ;;  %vm1880_vm2 = vcmp.eq.f32.partialorder %v1879_v1, 8.507059e+37  ;;  %v3908_v49 = vld [vmem:[%s5744_s1 + $0xcc] sm:$0xf]  ;;  %v3635_v50 = vld [vmem:[%s5744_s1 + $0xd8] sm:$0xf0]  ;;  %v3566_v39 = vor.u32 %v3891_v33, %v3563_v38 }
 0x40d   :  { %v1901_v9 = vor.u32 1.1754944e-38, %v1900_v63  ;;  %vm1899_vm3 = vcmp.eq.f32.partialorder %v1898_v3, 8.507059e+37  ;;  %v3638_v54 = vor.u32 %v3908_v49, %v3635_v50  ;;  %v3904_v21 = vld [vmem:[%s5744_s1 + $0xac] sm:$0xf]  ;;  %v3619_v63 = vld [vmem:[%s5744_s1 + $0xb8] sm:$0xf0] }
 0x40e   :  { %v4001_v55 = vpop.eup %4000  ;;  %v3593_v1 = vld [vmem:[%s5744_s1 + $0x80] sm:$0xf]  ;;  %v3899_v3 = vld [vmem:[%s5744_s1 + $0x84] sm:$0xf]  ;;  %v3547_v50 = vld [vmem:[%s5744_s1 + $0x30] sm:$0xf0] }
 0x40f   :  { %v1908_v56 = vadd.f32 1.0, %v4001_v55  ;;  %v3609_v55 = vld [vmem:[%s5744_s1 + $0xa0] sm:$0xf]  ;;  %2488 = vmatpush.bf16.msrb.mxu3 %v3638_v54  ;;  %v3887_v49 = vld [vmem:[%s5744_s1 + $0x24] sm:$0xf] }
 0x410   :  { %v4003_v57 = vpop.eup %4002  ;;  %v3553_v54 = vld [vmem:[%s5744_s1 + $0x28] sm:$0xf] }
 0x411   :  { %v4005_v59 = vpop.eup %4004  ;;  %v1871_v60 = vmul.f32 %v4003_v57, %v1869_v46  ;;  %4006 = vrcp.f32 %v1908_v56  ;;  %vm1876_vm12 = vweird.f32 %v4003_v57  ;;  %v1920_v23 = vand.u32 2147483648, %v1908_v56  ;;  %v3910_v46 = vld [vmem:[%s5744_s1 + $0xd4] sm:$0xf0] }
 0x412   :  { %v1890_v61 = vmul.f32 %v4005_v59, %v1888_v48  ;;  %4008 = vtanh.f32 %v1864_v58  ;;  %vm1895_vm13 = vweird.f32 %v4005_v59  ;;  %vm1877_vm0 = vmor %vm1875_vm14, %vm1876_vm12  ;;  %vm1914_vm5 = vweird.f32 %v1908_v56 }
 0x413   :  { %v1872_v62 = vsub.f32 1.0, %v1871_v60  ;;  %vm1896_vm1 = vmor %vm1894_vm15, %vm1895_vm13  ;;  %v1918_v24 = vand.u32 2147483647, %v1908_v56  ;;  %v1921_v26 = vor.u32 1.1754944e-38, %v1920_v23  ;;  %v3634_v48 = vor.u32 %v3910_v46, %v3633_v45  ;;  %v3617_v60 = vld [vmem:[%s5744_s1 + $0xa8] sm:$0xf] }
 0x414   :  { %v1891_v20 = vsub.f32 1.0, %v1890_v61  ;;  %v3906_v61 = vld [vmem:[%s5744_s1 + $0xb4] sm:$0xf0]  ;;  %v3585_v23 = vld [vmem:[%s5744_s1 + $0x68] sm:$0xf] }
 0x415   :  { %v1873_v0 = vmul.f32 %v4003_v57, %v1872_v62  ;;  %vm1919_vm7 = vcmp.eq.f32.partialorder %v1918_v24, 8.507059e+37  ;;  %2475 = vmatpush.bf16.msrb.mxu2 %v3634_v48  ;;  %v3898_v24 = vld [vmem:[%s5744_s1 + $0x74] sm:$0xf0]  ;;  %v3545_v45 = vld [vmem:[%s5744_s1 + $0x20] sm:$0xf] }
 0x416   :  { %v1892_v2 = vmul.f32 %v4005_v59, %v1891_v20  ;;  %v3618_v20 = vor.u32 %v3906_v61, %v3617_v60  ;;  %v3889_v46 = vld [vmem:[%s5744_s1 + $0x2c] sm:$0xf0]  ;;  %v3555_v60 = vld [vmem:[%s5744_s1 + $0x38] sm:$0xf0] }
 0x417   :  { %v4007_v4 = vpop.eup %4006  ;;  %v1874_v5 = vadd.f32 %v4003_v57, %v1873_v0  ;;  %v3622_v0 = vor.u32 %v3904_v21, %v3619_v63  ;;  %v3546_v48 = vor.u32 %v3889_v46, %v3545_v45 }
 0x418   :  { %v1893_v7 = vadd.f32 %v4005_v59, %v1892_v2  ;;  %v1910_v8 = vmul.f32 %v4007_v4, %v1908_v56  ;;  %v4009_v11 = vpop.eup %4008  ;;  %vm1915_vm4 = vweird.f32 %v4007_v4  ;;  %v3905_v56 = vld [vmem:[%s5744_s1 + $0xac] sm:$0xf0] }
 0x419   :  { %v1878_v10 = vsel %vm1877_vm0, %v4003_v57, %v1874_v5  ;;  %vm1916_vm6 = vmor %vm1914_vm5, %vm1915_vm4  ;;  %v3903_v57 = vld [vmem:[%s5744_s1 + $0xa4] sm:$0xf]  ;;  %v3610_v58 = vor.u32 %v3905_v56, %v3609_v55  ;;  %2476 = vmatpush.bf16.msrb.mxu2 %v3618_v20  ;;  %v3901_v2 = vld [vmem:[%s5744_s1 + $0x8c] sm:$0xf0]  ;;  %2489 = vmatpush.bf16.msrb.mxu3 %v3622_v0 }
 0x41a   :  { %v1883_v12 = vsel %vm1880_vm2, %v1882_v6, %v1878_v10  ;;  %v1897_v13 = vsel %vm1896_vm1, %v4005_v59, %v1893_v7  ;;  %v1911_v14 = vsub.f32 1.0, %v1910_v8  ;;  %v3611_v59 = vld [vmem:[%s5744_s1 + $0xb0] sm:$0xf0]  ;;  %v3601_v6 = vld [vmem:[%s5744_s1 + $0x88] sm:$0xf] }
 0x41b   :  { %v1902_v15 = vsel %vm1899_vm3, %v1901_v9, %v1897_v13  ;;  %v1925_v16 = vmul.f32 %v4009_v11, %v1883_v12  ;;  %v3614_v62 = vor.u32 %v3903_v57, %v3611_v59  ;;  %v3595_v5 = vld [vmem:[%s5744_s1 + $0x90] sm:$0xf0]  ;;  %v3902_v7 = vld [vmem:[%s5744_s1 + $0x94] sm:$0xf0]  ;;  %v3900_v10 = vld [vmem:[%s5744_s1 + $0x8c] sm:$0xf]  ;;  %v3550_v57 = vor.u32 %v3887_v49, %v3547_v50 }
 0x41c   :  { %v1924_v17 = vmul.f32 %v1902_v15, %v5300_v51  ;;  %v1912_v18 = vmul.f32 %v4007_v4, %v1911_v14  ;;  %v3641_v51 = vld [vmem:[%s5744_s1 + $0xe0] sm:$0xf]  ;;  %v3598_v8 = vor.u32 %v3899_v3, %v3595_v5  ;;  %v3602_v9 = vor.u32 %v3902_v7, %v3601_v6  ;;  %v3603_v11 = vld [vmem:[%s5744_s1 + $0x98] sm:$0xf0]  ;;  %v3388_v13 = vld [vmem:[%s5745_s0 + $0xc8] sm:$0xff] }
 0x41d   :  { %v3642_v31 = vor.u32 %v3913_v52, %v3641_v51  ;;  %2463 = vmatpush.bf16.msrb.mxu1 %v3614_v62  ;;  %v3387_v12 = vld [vmem:[%s5745_s0 + $0xc0] sm:$0xff]  ;;  %v3606_v14 = vor.u32 %v3900_v10, %v3603_v11  ;;  %v3888_v59 = vld [vmem:[%s5744_s1 + $0x2c] sm:$0xf]  ;;  %v3537_v5 = vld [vmem:[%s5744_s1 + $0x8] sm:$0xf] }
 0x41e   :  { %v5511_v19 = vadd.f32 %v1925_v16, %v1924_v17  ;;  %v1913_v22 = vadd.f32 %v4007_v4, %v1912_v18  ;;  %2477 = vmatpush.bf16.msrb.mxu2 %v3602_v9  ;;  %v3577_v15 = vld [vmem:[%s5744_s1 + $0x60] sm:$0xf]  ;;  %v3897_v16 = vld [vmem:[%s5744_s1 + $0x6c] sm:$0xf0]  ;;  %v3895_v17 = vld [vmem:[%s5744_s1 + $0x64] sm:$0xf]  ;;  %v3558_v63 = vor.u32 %v3888_v59, %v3555_v60 }
 0x41f   :  { %2448 = vmatpush.bf16.msrb.mxu0 %v3642_v31  ;;  %2490 = vmatpush.bf16.msrb.mxu3 %v3606_v14  ;;  %v3578_v18 = vor.u32 %v3897_v16, %v3577_v15  ;;  %v3561_v31 = vld [vmem:[%s5744_s1 + $0x40] sm:$0xf]  ;;  %v3886_v6 = vld [vmem:[%s5744_s1 + $0x14] sm:$0xf0]  ;;  %v3884_v9 = vld [vmem:[%s5744_s1 + $0xc] sm:$0xf] }
 0x420   :  { %4010 = vtanh.f32 %v5511_v19  ;;  %v1917_v25 = vsel %vm1916_vm6, %v4007_v4, %v1913_v22  ;;  %v3594_v4 = vor.u32 %v3901_v2, %v3593_v1  ;;  %v3579_v22 = vld [vmem:[%s5744_s1 + $0x70] sm:$0xf0]  ;;  %v3562_v37 = vor.u32 %v3893_v32, %v3561_v31  ;;  %v3529_v0 = vld [vmem:[%s5744_s1] sm:$0xf]  ;;  %v3885_v1 = vld [vmem:[%s5744_s1 + $0xc] sm:$0xf0] }
 0x421   :  { %v1922_v28 = vsel %vm1919_vm7, %v1921_v26, %v1917_v25  ;;  %2464 = vmatpush.bf16.msrb.mxu1 %v3598_v8  ;;  %v3883_v2 = vld [vmem:[%s5744_s1 + $0x4] sm:$0xf]  ;;  %v3530_v3 = vor.u32 %v3885_v1, %v3529_v0  ;;  %v3539_v10 = vld [vmem:[%s5744_s1 + $0x18] sm:$0xf0] }
 0x422   :  { %v3542_v15 = vor.u32 %v3884_v9, %v3539_v10 }
 0x423   :  { %2449 = vmatpush.bf16.msrb.mxu0 %v3626_v43  ;;  %v3570_v43 = vor.u32 %v3894_v41, %v3569_v40 }
 0x426   :  { %v4011_v27 = vpop.eup %4010 }
 0x427   :  { %v1928_v29 = vmul.f32 %v4011_v27, %v1922_v28  ;;  %2450 = vmatpush.bf16.msrb.mxu0 %v3610_v58  ;;  %v3582_v27 = vor.u32 %v3895_v17, %v3579_v22  ;;  %v3586_v28 = vor.u32 %v3898_v24, %v3585_v23  ;;  %v3890_v58 = vld [vmem:[%s5744_s1 + $0x34] sm:$0xf0]  ;;  %v3389_v22 = vld [vmem:[%s5745_s0 + $0xd0] sm:$0xff] }
 0x428   :  { %v3554_v21 = vor.u32 %v3890_v58, %v3553_v54 }
 0x429   :  { %v1929_v30 = vpack.c.bf16 %v1928_v29, %v1928_v29  ;;  %v3896_v29 = vld [vmem:[%s5744_s1 + $0x6c] sm:$0xf]  ;;  %2465 = vmatpush.bf16.msrb.mxu1 %v3582_v27  ;;  %2478 = vmatpush.bf16.msrb.mxu2 %v3586_v28 }
 0x42b   :  { %3386 = vst [vmem:[%s5746_s2 + $0x14] sm:$0xf] %v1929_v30  ;;  %2137 = vmatmul.bf16.vlgmr.msra.gmra.mxu0 %v1929_v30  ;;  %2150 = vmatmul.bf16.vlgmr.msra.gmra.mxu1 %v1929_v30 }
 0x42c   :  { %2163 = vmatmul.bf16.vlgmr.msra.gmra.mxu2 %v1929_v30  ;;  %2176 = vmatmul.bf16.vlgmr.msra.gmra.mxu3 %v1929_v30  ;;  %v3587_v30 = vld [vmem:[%s5744_s1 + $0x78] sm:$0xf0] }
 0x42d   :  { %2451 = vmatpush.bf16.msrb.mxu0 %v3594_v4  ;;  %v3590_v53 = vor.u32 %v3896_v29, %v3587_v30  ;;  %2466 = vmatpush.bf16.msrb.mxu1 %v3566_v39  ;;  %v3531_v4 = vld [vmem:[%s5744_s1 + $0x10] sm:$0xf0] }
 0x42e   :  { %2479 = vmatpush.bf16.msrb.mxu2 %v3570_v43  ;;  %v3534_v8 = vor.u32 %v3883_v2, %v3531_v4  ;;  %v3526_v4 = vld [vmem:[%s5745_s0 + $0xf8] sm:$0xff] }
 0x42f   :  { %2491 = vmatpush.bf16.msrb.mxu3 %v3590_v53 }
 0x431   :  { %2452 = vmatpush.bf16.msrb.mxu0 %v3578_v18  ;;  %2467 = vmatpush.bf16.msrb.mxu1 %v3550_v57 }
 0x432   :  { %2480 = vmatpush.bf16.msrb.mxu2 %v3554_v21 }
 0x433   :  { %2492 = vmatpush.bf16.msrb.mxu3 %v3574_v47 }
 0x435   :  { %2453 = vmatpush.bf16.msrb.mxu0 %v3562_v37  ;;  %2468 = vmatpush.bf16.msrb.mxu1 %v3534_v8 }
 0x437   :  { %2493 = vmatpush.bf16.msrb.mxu3 %v3558_v63 }
 0x439   :  { %2454 = vmatpush.bf16.msrb.mxu0 %v3546_v48 }
 0x43b   :  { %2494 = vmatpush.bf16.msrb.mxu3 %v3542_v15 }
 0x43d   :  { %2455 = vmatpush.bf16.msrb.mxu0 %v3530_v3 }
 0x4a8   :  { %v2138_v25 = vpop.f32.mrf.mxu0  ;;  %v2151_v26 = vpop.f32.mrf.mxu1 }
 0x4a9   :  { %v2181_v51 = vadd.f32 %v3387_v12, %v2138_v25  ;;  %v2182_v52 = vadd.f32 %v3388_v13, %v2151_v26  ;;  %v3538_v12 = vor.u32 %v3886_v6, %v3537_v5 }
 0x4ab   :  { %v3519_v34 = vmul.f32 -1.442695, %v2181_v51  ;;  %v3520_v35 = vmul.f32 -1.442695, %v2182_v52  ;;  %2481 = vmatpush.bf16.msrb.mxu2 %v3538_v12 }
 0x4ad   :  { %4012 = vpow2.f32 %v3519_v34 }
 0x4ae   :  { %4014 = vpow2.f32 %v3520_v35 }
 0x4af   :  { %v2164_v55 = vpop.f32.mrf.mxu2  ;;  %v2177_v56 = vpop.f32.mrf.mxu3 }
 0x4b0   :  { %v2184_v61 = vadd.f32 %v3390_v36, %v2177_v56  ;;  %v2140_v62 = vpop.f32.mrf.mxu0  ;;  %v2153_v20 = vpop.f32.mrf.mxu1  ;;  %v2183_v26 = vadd.f32 %v3389_v22, %v2164_v55 }
 0x4b1   :  { %v3524_v20 = vld [vmem:[%s5745_s0 + $0xe8] sm:$0xff] }
 0x4b2   :  { %v3521_v7 = vmul.f32 -1.442695, %v2184_v61 }
 0x4b3   :  { %v4013_v11 = vpop.eup %4012 }
 0x4b4   :  { %v4015_v13 = vpop.eup %4014  ;;  %v2188_v14 = vadd.f32 1.0, %v4013_v11  ;;  %4016 = vpow2.f32 %v3521_v7 }
 0x4b5   :  { %v2207_v16 = vadd.f32 1.0, %v4015_v13 }
 0x4b6   :  { %4018 = vrcp.f32 %v2188_v14  ;;  %v2200_v52 = vand.u32 2147483648, %v2188_v14  ;;  %v2198_v32 = vand.u32 2147483647, %v2188_v14  ;;  %vm2194_vm10 = vweird.f32 %v2188_v14 }
 0x4b7   :  { %4020 = vrcp.f32 %v2207_v16  ;;  %v2166_v17 = vpop.f32.mrf.mxu2  ;;  %v2179_v18 = vpop.f32.mrf.mxu3  ;;  %v2219_v53 = vand.u32 2147483648, %v2207_v16  ;;  %v2217_v34 = vand.u32 2147483647, %v2207_v16  ;;  %vm2213_vm11 = vweird.f32 %v2207_v16 }
 0x4b8   :  { %v2201_v37 = vor.u32 1.1754944e-38, %v2200_v52  ;;  %vm2199_vm14 = vcmp.eq.f32.partialorder %v2198_v32, 8.507059e+37  ;;  %v3525_v17 = vld [vmem:[%s5745_s0 + $0xf0] sm:$0xff] }
 0x4b9   :  { %v2220_v40 = vor.u32 1.1754944e-38, %v2219_v53  ;;  %vm2218_vm15 = vcmp.eq.f32.partialorder %v2217_v34, 8.507059e+37 }
 0x4ba   :  { %v4017_v23 = vpop.eup %4016 }
 0x4bb   :  { %v2227_v24 = vadd.f32 1.0, %v4017_v23 }
 0x4bc   :  { %v4019_v25 = vpop.eup %4018 }
 0x4bd   :  { %v4021_v27 = vpop.eup %4020  ;;  %v2190_v28 = vmul.f32 %v4019_v25, %v2188_v14  ;;  %4022 = vrcp.f32 %v2227_v24  ;;  %vm2195_vm8 = vweird.f32 %v4019_v25  ;;  %v2239_v55 = vand.u32 2147483648, %v2227_v24 }
 0x4be   :  { %v2209_v29 = vmul.f32 %v4021_v27, %v2207_v16  ;;  %4024 = vtanh.f32 %v2183_v26  ;;  %vm2214_vm9 = vweird.f32 %v4021_v27  ;;  %vm2196_vm12 = vmor %vm2194_vm10, %vm2195_vm8  ;;  %vm2233_vm1 = vweird.f32 %v2227_v24 }
 0x4bf   :  { %v2191_v30 = vsub.f32 1.0, %v2190_v28  ;;  %vm2215_vm13 = vmor %vm2213_vm11, %vm2214_vm9  ;;  %v2237_v56 = vand.u32 2147483647, %v2227_v24  ;;  %v2240_v58 = vor.u32 1.1754944e-38, %v2239_v55 }
 0x4c0   :  { %v2210_v51 = vsub.f32 1.0, %v2209_v29 }
 0x4c1   :  { %v2192_v31 = vmul.f32 %v4019_v25, %v2191_v30  ;;  %vm2238_vm3 = vcmp.eq.f32.partialorder %v2237_v56, 8.507059e+37 }
 0x4c2   :  { %v2211_v33 = vmul.f32 %v4021_v27, %v2210_v51 }
 0x4c3   :  { %v4023_v35 = vpop.eup %4022  ;;  %v2193_v36 = vadd.f32 %v4019_v25, %v2192_v31 }
 0x4c4   :  { %v2212_v38 = vadd.f32 %v4021_v27, %v2211_v33  ;;  %v2229_v39 = vmul.f32 %v4023_v35, %v2227_v24  ;;  %v4025_v42 = vpop.eup %4024  ;;  %vm2234_vm0 = vweird.f32 %v4023_v35 }
 0x4c5   :  { %v2197_v41 = vsel %vm2196_vm12, %v4019_v25, %v2193_v36  ;;  %vm2235_vm2 = vmor %vm2233_vm1, %vm2234_vm0 }
 0x4c6   :  { %v2202_v43 = vsel %vm2199_vm14, %v2201_v37, %v2197_v41  ;;  %v2216_v44 = vsel %vm2215_vm13, %v4021_v27, %v2212_v38  ;;  %v2230_v45 = vsub.f32 1.0, %v2229_v39 }
 0x4c7   :  { %v2221_v46 = vsel %vm2218_vm15, %v2220_v40, %v2216_v44  ;;  %v2244_v47 = vmul.f32 %v4025_v42, %v2202_v43 }
 0x4c8   :  { %v2243_v48 = vmul.f32 %v2221_v46, %v5511_v19  ;;  %v2231_v49 = vmul.f32 %v4023_v35, %v2230_v45  ;;  %v3523_v19 = vld [vmem:[%s5745_s0 + $0xe0] sm:$0xff] }
 0x4ca   :  { %v5722_v50 = vadd.f32 %v2244_v47, %v2243_v48  ;;  %v2232_v54 = vadd.f32 %v4023_v35, %v2231_v49 }
 0x4cc   :  { %4026 = vtanh.f32 %v5722_v50  ;;  %v2236_v57 = vsel %vm2235_vm2, %v4023_v35, %v2232_v54 }
 0x4cd   :  { %v2241_v60 = vsel %vm2238_vm3, %v2240_v58, %v2236_v57 }
 0x4d2   :  { %v4027_v59 = vpop.eup %4026 }
 0x4d3   :  { %v2247_v61 = vmul.f32 %v4027_v59, %v2241_v60 }
 0x4d5   :  { %v2248_v62 = vpack.c.bf16 %v2247_v61, %v2247_v61 }
 0x4d7   :  { %3522 = vst [vmem:[%s5746_s2 + $0x18] sm:$0xf] %v2248_v62  ;;  %2456 = vmatmul.bf16.vlgmr.msrb.gmra.mxu0 %v2248_v62  ;;  %2469 = vmatmul.bf16.vlgmr.msrb.gmra.mxu1 %v2248_v62 }
 0x4d8   :  { %2482 = vmatmul.bf16.vlgmr.msrb.gmra.mxu2 %v2248_v62  ;;  %2495 = vmatmul.bf16.vlgmr.msrb.gmra.mxu3 %v2248_v62 }
 0x554   :  { %v2457_v21 = vpop.f32.mrf.mxu0  ;;  %v2470_v63 = vpop.f32.mrf.mxu1 }
 0x555   :  { %v2500_v0 = vadd.f32 %v3523_v19, %v2457_v21  ;;  %v2501_v1 = vadd.f32 %v3524_v20, %v2470_v63 }
 0x557   :  { %v3655_v2 = vmul.f32 -1.442695, %v2500_v0  ;;  %v3656_v3 = vmul.f32 -1.442695, %v2501_v1 }
 0x559   :  { %4028 = vpow2.f32 %v3655_v2 }
 0x55a   :  { %4030 = vpow2.f32 %v3656_v3 }
 0x55b   :  { %v2483_v5 = vpop.f32.mrf.mxu2  ;;  %v2496_v6 = vpop.f32.mrf.mxu3 }
 0x55c   :  { %v2503_v7 = vadd.f32 %v3526_v4, %v2496_v6  ;;  %v2459_v8 = vpop.f32.mrf.mxu0  ;;  %v2472_v9 = vpop.f32.mrf.mxu1  ;;  %v2502_v24 = vadd.f32 %v3525_v17, %v2483_v5 }
 0x55e   :  { %v3657_v10 = vmul.f32 -1.442695, %v2503_v7 }
 0x55f   :  { %v4029_v11 = vpop.eup %4028 }
 0x560   :  { %v4031_v12 = vpop.eup %4030  ;;  %v2507_v13 = vadd.f32 1.0, %v4029_v11  ;;  %4032 = vpow2.f32 %v3657_v10 }
 0x561   :  { %v2526_v14 = vadd.f32 1.0, %v4031_v12 }
 0x562   :  { %4034 = vrcp.f32 %v2507_v13  ;;  %v2519_v30 = vand.u32 2147483648, %v2507_v13  ;;  %v2517_v53 = vand.u32 2147483647, %v2507_v13  ;;  %vm2513_vm6 = vweird.f32 %v2507_v13 }
 0x563   :  { %4036 = vrcp.f32 %v2526_v14  ;;  %v2485_v15 = vpop.f32.mrf.mxu2  ;;  %v2498_v16 = vpop.f32.mrf.mxu3  ;;  %v2538_v51 = vand.u32 2147483648, %v2526_v14  ;;  %v2536_v32 = vand.u32 2147483647, %v2526_v14  ;;  %vm2532_vm7 = vweird.f32 %v2526_v14 }
 0x564   :  { %v2520_v35 = vor.u32 1.1754944e-38, %v2519_v30  ;;  %vm2518_vm10 = vcmp.eq.f32.partialorder %v2517_v53, 8.507059e+37 }
 0x565   :  { %v2539_v38 = vor.u32 1.1754944e-38, %v2538_v51  ;;  %vm2537_vm11 = vcmp.eq.f32.partialorder %v2536_v32, 8.507059e+37 }
 0x566   :  { %v4033_v18 = vpop.eup %4032 }
 0x567   :  { %v2546_v22 = vadd.f32 1.0, %v4033_v18 }
 0x568   :  { %v4035_v23 = vpop.eup %4034 }
 0x569   :  { %v4037_v25 = vpop.eup %4036  ;;  %v2509_v26 = vmul.f32 %v4035_v23, %v2507_v13  ;;  %4038 = vrcp.f32 %v2546_v22  ;;  %vm2514_vm4 = vweird.f32 %v4035_v23  ;;  %v2558_v54 = vand.u32 2147483648, %v2546_v22 }
 0x56a   :  { %v2528_v27 = vmul.f32 %v4037_v25, %v2526_v14  ;;  %4040 = vtanh.f32 %v2502_v24  ;;  %vm2533_vm5 = vweird.f32 %v4037_v25  ;;  %vm2515_vm8 = vmor %vm2513_vm6, %vm2514_vm4  ;;  %vm2552_vm13 = vweird.f32 %v2546_v22 }
 0x56b   :  { %v2510_v28 = vsub.f32 1.0, %v2509_v26  ;;  %vm2534_vm9 = vmor %vm2532_vm7, %vm2533_vm5  ;;  %v2556_v55 = vand.u32 2147483647, %v2546_v22  ;;  %v2559_v57 = vor.u32 1.1754944e-38, %v2558_v54 }
 0x56c   :  { %v2529_v29 = vsub.f32 1.0, %v2528_v27 }
 0x56d   :  { %v2511_v52 = vmul.f32 %v4035_v23, %v2510_v28  ;;  %vm2557_vm15 = vcmp.eq.f32.partialorder %v2556_v55, 8.507059e+37 }
 0x56e   :  { %v2530_v31 = vmul.f32 %v4037_v25, %v2529_v29 }
 0x56f   :  { %v4039_v33 = vpop.eup %4038  ;;  %v2512_v34 = vadd.f32 %v4035_v23, %v2511_v52 }
 0x570   :  { %v2531_v36 = vadd.f32 %v4037_v25, %v2530_v31  ;;  %v2548_v37 = vmul.f32 %v4039_v33, %v2546_v22  ;;  %v4041_v40 = vpop.eup %4040  ;;  %vm2553_vm12 = vweird.f32 %v4039_v33 }
 0x571   :  { %v2516_v39 = vsel %vm2515_vm8, %v4035_v23, %v2512_v34  ;;  %vm2554_vm14 = vmor %vm2552_vm13, %vm2553_vm12 }
 0x572   :  { %v2521_v41 = vsel %vm2518_vm10, %v2520_v35, %v2516_v39  ;;  %v2535_v42 = vsel %vm2534_vm9, %v4037_v25, %v2531_v36  ;;  %v2549_v43 = vsub.f32 1.0, %v2548_v37 }
 0x573   :  { %v2540_v44 = vsel %vm2537_vm11, %v2539_v38, %v2535_v42  ;;  %v2563_v45 = vmul.f32 %v4041_v40, %v2521_v41 }
 0x574   :  { %v2562_v46 = vmul.f32 %v2540_v44, %v5722_v50  ;;  %v2550_v47 = vmul.f32 %v4039_v33, %v2549_v43 }
 0x576   :  { %v2564_v48 = vadd.f32 %v2563_v45, %v2562_v46  ;;  %v2551_v49 = vadd.f32 %v4039_v33, %v2550_v47 }
 0x578   :  { %4042 = vtanh.f32 %v2564_v48  ;;  %v2555_v56 = vsel %vm2554_vm14, %v4039_v33, %v2551_v49 }
 0x579   :  { %v2560_v59 = vsel %vm2557_vm15, %v2559_v57, %v2555_v56 }
 0x57e   :  { %v4043_v58 = vpop.eup %4042 }
 0x57f   :  { %v2566_v60 = vmul.f32 %v4043_v58, %v2560_v59 }
 0x581   :  { %v2567_v61 = vpack.c.bf16 %v2566_v60, %v2566_v60 }
 0x583   :  { %3658 = vst [vmem:[%s5746_s2 + $0x1c] sm:$0xf] %v2567_v61 }

</bundles_post_ra>
